<compile_context>
chip_gen: v5e
topology: v5e:2x2
jax: 0.10.0
libtpu: 0.0.40
codegen_flags: <defaults>
</compile_context>

<pallas_src>
import functools

import jax
import jax.numpy as jnp
from jax.experimental import pallas as pl
from jax.experimental.pallas import tpu as pltpu


def _round_up(a, b):
    return (a + b - 1) // b * b


def _pick_tile(dim, max_tile, align):
    """Largest aligned tile <= ~max_tile that keeps padding small."""
    if dim <= max_tile:
        return _round_up(dim, align)
    nblk = -(-dim // max_tile)                   # cdiv
    return _round_up(-(-dim // nblk), align)


# ----------------------------------------------------------------------------
# Fused kernel:  out = (silu(x @ Wg) * (x @ Wu)) @ Wd
# grid = (M/tm, I/tn, E/tk): axis 0 parallel (rows), axis 1 reduces over the
# intermediate dim into the output accumulator, axis 2 reduces over E into the
# gate/up accumulators (reduction axes last, f32 accumulators in VMEM).
# ----------------------------------------------------------------------------
def fused_mlp_kernel(x_ref, wg_ref, wu_ref, wd_ref, o_ref,
                     accg_ref, accu_ref, acco_ref):
    j = pl.program_id(1)
    k = pl.program_id(2)
    nj = pl.num_programs(1)
    nk = pl.num_programs(2)

    @pl.when((j == 0) & (k == 0))
    def _():
        acco_ref[...] = jnp.zeros_like(acco_ref)

    @pl.when(k == 0)
    def _():
        accg_ref[...] = jnp.zeros_like(accg_ref)
        accu_ref[...] = jnp.zeros_like(accu_ref)

    # TODO(synk): Wg/Wu could be concatenated into one (tk, 2*tn) stream for a
    # single larger MXU push per step (few-% win, mostly on v5e).
    x = x_ref[...]
    accg_ref[...] += jnp.dot(x, wg_ref[...], preferred_element_type=jnp.float32)
    accu_ref[...] += jnp.dot(x, wu_ref[...], preferred_element_type=jnp.float32)

    @pl.when(k == nk - 1)
    def _():
        g = accg_ref[...]
        u = accu_ref[...]
        # SwiGLU epilogue in f32 (safe on v5e: no bf16 VPU/EUP there).
        h = (g * jax.nn.sigmoid(g) * u).astype(wd_ref.dtype)
        acco_ref[...] += jnp.dot(h, wd_ref[...],
                                 preferred_element_type=jnp.float32)

        @pl.when(j == nj - 1)
        def _():
            o_ref[...] = acco_ref[...].astype(o_ref.dtype)


def fused_mlp(x, wg, wu, wd, *, tm, tn, tk, out_dtype):
    M, E = x.shape
    _, I = wg.shape
    Eo = wd.shape[1]
    grid = (M // tm, I // tn, E // tk)

    in_bytes = x.dtype.itemsize
    cost = pl.CostEstimate(
        flops=int(2 * M * E * I * 2 + 2 * M * I * Eo),
        transcendentals=int(M * I),
        bytes_accessed=int((x.size + wg.size + wu.size + wd.size) * in_bytes
                           + M * Eo * jnp.dtype(out_dtype).itemsize),
    )

    return pl.pallas_call(
        fused_mlp_kernel,
        out_shape=jax.ShapeDtypeStruct((M, Eo), out_dtype),
        grid_spec=pltpu.PrefetchScalarGridSpec(
            num_scalar_prefetch=0,
            grid=grid,
            in_specs=[
                pl.BlockSpec((tm, tk), lambda i, j, k: (i, k)),   # x
                pl.BlockSpec((tk, tn), lambda i, j, k: (k, j)),   # Wg
                pl.BlockSpec((tk, tn), lambda i, j, k: (k, j)),   # Wu
                pl.BlockSpec((tn, Eo), lambda i, j, k: (j, 0)),   # Wd
            ],
            out_specs=pl.BlockSpec((tm, Eo), lambda i, j, k: (i, 0)),
            scratch_shapes=[
                pltpu.VMEM((tm, tn), jnp.float32),   # gate accumulator
                pltpu.VMEM((tm, tn), jnp.float32),   # up accumulator
                pltpu.VMEM((tm, Eo), jnp.float32),   # down-proj accumulator
            ],
        ),
        compiler_params=pltpu.CompilerParams(
            dimension_semantics=("parallel", "arbitrary", "arbitrary"),
            # Above the 16/32 MiB scoped defaults, below v7x's 64 MiB physical.
            vmem_limit_bytes=48 * 1024 * 1024,
        ),
        cost_estimate=cost,
    )(x, wg, wu, wd)


# ----------------------------------------------------------------------------
# LlamaMLP wrapper
# ----------------------------------------------------------------------------
@functools.partial(
    jax.jit, static_argnames=("compute_dtype", "max_tm", "max_tn", "max_tk"))
def llama_mlp(hidden_states, wg, wu, wd, *, compute_dtype=jnp.bfloat16,
              max_tm=256, max_tn=512, max_tk=512):
    """hidden_states: (B, S, E); wg, wu: (E, I); wd: (I, E)."""
    B, S, E = hidden_states.shape
    I = wg.shape[1]
    out_dtype = hidden_states.dtype
    M = B * S

    # bf16 sublane alignment (16) for tm; 128-lane alignment for tn/tk.
    tm = _pick_tile(M, max_tm, 16)
    tn = _pick_tile(I, max_tn, 128)
    tk = _pick_tile(E, max_tk, 128)

    M_p = _round_up(M, tm)
    E_p = _round_up(E, tk)       # contraction dim of gate/up
    I_p = _round_up(I, tn)       # contraction dim of down
    Eo_p = _round_up(E, 128)     # lane-dense output width of down

    x = hidden_states.reshape(M, E).astype(compute_dtype)
    wg_c = wg.astype(compute_dtype)
    wu_c = wu.astype(compute_dtype)
    wd_c = wd.astype(compute_dtype)

    # Zero-padding is exact here: padded rows/cols contribute exactly zero
    # through silu(0)*0 and the zero weight rows/cols.
    x_p = jnp.pad(x, ((0, M_p - M), (0, E_p - E)))
    wg_p = jnp.pad(wg_c, ((0, E_p - E), (0, I_p - I)))
    wu_p = jnp.pad(wu_c, ((0, E_p - E), (0, I_p - I)))
    wd_p = jnp.pad(wd_c, ((0, I_p - I), (0, Eo_p - E)))

    out_p = fused_mlp(x_p, wg_p, wu_p, wd_p,
                      tm=tm, tn=tn, tk=tk, out_dtype=out_dtype)
    return out_p[:M, :E].reshape(B, S, E)


def llama_mlp_ref(hidden_states, wg, wu, wd, compute_dtype=jnp.bfloat16):
    # Reference with matching numerics: bf16 inputs, f32 accumulation.
    x = hidden_states.astype(compute_dtype)
    g = jnp.dot(x, wg.astype(compute_dtype), preferred_element_type=jnp.float32)
    u = jnp.dot(x, wu.astype(compute_dtype), preferred_element_type=jnp.float32)
    h = (jax.nn.silu(g) * u).astype(compute_dtype)
    out = jnp.dot(h, wd.astype(compute_dtype),
                  preferred_element_type=jnp.float32)
    return out.astype(hidden_states.dtype)


if __name__ == "__main__":
    # Small config consistent with LlamaMLP (E -> I -> E, SwiGLU), with
    # deliberately non-tile-divisible M to exercise the padding path.
    batch, seq = 2, 9
    embedding_dim = 768
    intermediate_size = 1536
    dtype = jnp.float32

    key = jax.random.PRNGKey(0)
    kx, kg, ku, kd = jax.random.split(key, 4)

    x = jax.random.normal(kx, (batch, seq, embedding_dim), dtype=dtype)
    # nn.Linear(E, I, bias=False).weight has shape (I, E); we store its
    # transpose (E, I) so that y = x @ W matches y = x @ weight.T in PyTorch.
    wg = jax.random.normal(kg, (embedding_dim, intermediate_size), dtype=dtype) * 0.02
    wu = jax.random.normal(ku, (embedding_dim, intermediate_size), dtype=dtype) * 0.02
    wd = jax.random.normal(kd, (intermediate_size, embedding_dim), dtype=dtype) * 0.02

    out = llama_mlp(x, wg, wu, wd)
    out = jax.block_until_ready(out)

    ref = llama_mlp_ref(x, wg, wu, wd)
    assert out.shape == (batch, seq, embedding_dim)
    max_err = float(jnp.max(jnp.abs(out - ref)))
    assert jnp.allclose(out, ref, atol=2e-3, rtol=2e-2), (
        f"mismatch vs reference (max abs err={max_err})")

    print("KERNEL_OK")
</pallas_src>

<mosaic_0001>
module attributes {stable_mosaic.version = 11 : i64} {
  func.func @fused_mlp_kernel(%arg0: i32, %arg1: i32, %arg2: i32, %arg3: memref<32x384xbf16, #tpu.memory_space<vmem>>, %arg4: memref<384x512xbf16, #tpu.memory_space<vmem>>, %arg5: memref<384x512xbf16, #tpu.memory_space<vmem>>, %arg6: memref<512x768xbf16, #tpu.memory_space<vmem>>, %arg7: memref<32x768xf32, #tpu.memory_space<vmem>>, %arg8: memref<32x512xf32, #tpu.memory_space<vmem>>, %arg9: memref<32x512xf32, #tpu.memory_space<vmem>>, %arg10: memref<32x768xf32, #tpu.memory_space<vmem>>) attributes {dimension_semantics = [#tpu.dimension_semantics<parallel>, #tpu.dimension_semantics<arbitrary>, #tpu.dimension_semantics<arbitrary>], iteration_bounds = array<i64: 1, 3, 2>, scalar_prefetch = 0 : i64, scratch_operands = 3 : i64, tpu.core_type = #tpu.core_type<tc>, window_params = [{transform_indices = @transform_0, window_bounds = array<i64: 32, 384>}, {transform_indices = @transform_1, window_bounds = array<i64: 384, 512>}, {transform_indices = @transform_2, window_bounds = array<i64: 384, 512>}, {transform_indices = @transform_3, window_bounds = array<i64: 512, 768>}, {transform_indices = @transform_4, window_bounds = array<i64: 32, 768>}]} {
    %c0_i32 = arith.constant 0 : i32
    %0 = arith.cmpi eq, %arg1, %c0_i32 : i32
    %c0_i32_0 = arith.constant 0 : i32
    %1 = arith.cmpi eq, %arg2, %c0_i32_0 : i32
    %2 = arith.andi %0, %1 : i1
    %3 = arith.extui %2 : i1 to i32
    %c0_i32_1 = arith.constant 0 : i32
    %4 = arith.cmpi ne, %3, %c0_i32_1 : i32
    scf.if %4 {
      %cst_19 = arith.constant 0.000000e+00 : f32
      %22 = vector.broadcast %cst_19 : f32 to vector<32x768xf32>
      %c0_20 = arith.constant 0 : index
      %c0_21 = arith.constant 0 : index
      %23 = vector.load %arg10[%c0_20, %c0_21] : memref<32x768xf32, #tpu.memory_space<vmem>>, vector<32x768xf32>
      tpu.vector_store %arg10[%c0_20, %c0_21], %22 {strides = array<i32>} : memref<32x768xf32, #tpu.memory_space<vmem>>, vector<32x768xf32>,
    } else {
    }
    %c0_i32_2 = arith.constant 0 : i32
    %5 = arith.cmpi eq, %arg2, %c0_i32_2 : i32
    %6 = arith.extui %5 : i1 to i32
    %c0_i32_3 = arith.constant 0 : i32
    %7 = arith.cmpi ne, %6, %c0_i32_3 : i32
    scf.if %7 {
      %cst_19 = arith.constant 0.000000e+00 : f32
      %22 = vector.broadcast %cst_19 : f32 to vector<32x512xf32>
      %c0_20 = arith.constant 0 : index
      %c0_21 = arith.constant 0 : index
      %23 = vector.load %arg8[%c0_20, %c0_21] : memref<32x512xf32, #tpu.memory_space<vmem>>, vector<32x512xf32>
      tpu.vector_store %arg8[%c0_20, %c0_21], %22 {strides = array<i32>} : memref<32x512xf32, #tpu.memory_space<vmem>>, vector<32x512xf32>,
      %cst_22 = arith.constant 0.000000e+00 : f32
      %24 = vector.broadcast %cst_22 : f32 to vector<32x512xf32>
      %c0_23 = arith.constant 0 : index
      %c0_24 = arith.constant 0 : index
      %25 = vector.load %arg9[%c0_23, %c0_24] : memref<32x512xf32, #tpu.memory_space<vmem>>, vector<32x512xf32>
      tpu.vector_store %arg9[%c0_23, %c0_24], %24 {strides = array<i32>} : memref<32x512xf32, #tpu.memory_space<vmem>>, vector<32x512xf32>,
    } else {
    }
    %c0 = arith.constant 0 : index
    %c0_4 = arith.constant 0 : index
    %8 = vector.load %arg3[%c0, %c0_4] : memref<32x384xbf16, #tpu.memory_space<vmem>>, vector<32x384xbf16>
    %c0_5 = arith.constant 0 : index
    %c0_6 = arith.constant 0 : index
    %9 = vector.load %arg8[%c0_5, %c0_6] : memref<32x512xf32, #tpu.memory_space<vmem>>, vector<32x512xf32>
    %c0_7 = arith.constant 0 : index
    %c0_8 = arith.constant 0 : index
    %10 = vector.load %arg4[%c0_7, %c0_8] : memref<384x512xbf16, #tpu.memory_space<vmem>>, vector<384x512xbf16>
    %cst = arith.constant dense<0.000000e+00> : vector<32x512xf32>
    %11 = tpu.matmul %8, %10, %cst {dimension_numbers = #tpu.dot_dimension_numbers<[1], [0], [0], [1], [0, 0, 1, 1], [], []>} : vector<32x384xbf16>, vector<384x512xbf16>, vector<32x512xf32> -> vector<32x512xf32>
    %12 = arith.addf %9, %11 : vector<32x512xf32>
    %c0_9 = arith.constant 0 : index
    %c0_10 = arith.constant 0 : index
    %13 = vector.load %arg8[%c0_9, %c0_10] : memref<32x512xf32, #tpu.memory_space<vmem>>, vector<32x512xf32>
    tpu.vector_store %arg8[%c0_9, %c0_10], %12 {strides = array<i32>} : memref<32x512xf32, #tpu.memory_space<vmem>>, vector<32x512xf32>,
    %c0_11 = arith.constant 0 : index
    %c0_12 = arith.constant 0 : index
    %14 = vector.load %arg9[%c0_11, %c0_12] : memref<32x512xf32, #tpu.memory_space<vmem>>, vector<32x512xf32>
    %c0_13 = arith.constant 0 : index
    %c0_14 = arith.constant 0 : index
    %15 = vector.load %arg5[%c0_13, %c0_14] : memref<384x512xbf16, #tpu.memory_space<vmem>>, vector<384x512xbf16>
    %cst_15 = arith.constant dense<0.000000e+00> : vector<32x512xf32>
    %16 = tpu.matmul %8, %15, %cst_15 {dimension_numbers = #tpu.dot_dimension_numbers<[1], [0], [0], [1], [0, 0, 1, 1], [], []>} : vector<32x384xbf16>, vector<384x512xbf16>, vector<32x512xf32> -> vector<32x512xf32>
    %17 = arith.addf %14, %16 : vector<32x512xf32>
    %c0_16 = arith.constant 0 : index
    %c0_17 = arith.constant 0 : index
    %18 = vector.load %arg9[%c0_16, %c0_17] : memref<32x512xf32, #tpu.memory_space<vmem>>, vector<32x512xf32>
    tpu.vector_store %arg9[%c0_16, %c0_17], %17 {strides = array<i32>} : memref<32x512xf32, #tpu.memory_space<vmem>>, vector<32x512xf32>,
    %c1_i32 = arith.constant 1 : i32
    %19 = arith.cmpi eq, %arg2, %c1_i32 : i32
    %20 = arith.extui %19 : i1 to i32
    %c0_i32_18 = arith.constant 0 : i32
    %21 = arith.cmpi ne, %20, %c0_i32_18 : i32
    scf.if %21 {
      %c0_19 = arith.constant 0 : index
      %c0_20 = arith.constant 0 : index
      %22 = vector.load %arg8[%c0_19, %c0_20] : memref<32x512xf32, #tpu.memory_space<vmem>>, vector<32x512xf32>
      %c0_21 = arith.constant 0 : index
      %c0_22 = arith.constant 0 : index
      %23 = vector.load %arg9[%c0_21, %c0_22] : memref<32x512xf32, #tpu.memory_space<vmem>>, vector<32x512xf32>
      %24 = arith.negf %22 : vector<32x512xf32>
      %25 = math.exp %24 : vector<32x512xf32>
      %cst_23 = arith.constant 1.000000e+00 : f32
      %26 = vector.broadcast %cst_23 : f32 to vector<32x512xf32>
      %27 = arith.addf %26, %25 : vector<32x512xf32>
      %28 = arith.divf %26, %27 : vector<32x512xf32>
      %29 = arith.mulf %22, %28 : vector<32x512xf32>
      %30 = arith.mulf %29, %23 : vector<32x512xf32>
      %31 = arith.truncf %30 : vector<32x512xf32> to vector<32x512xbf16>
      %c0_24 = arith.constant 0 : index
      %c0_25 = arith.constant 0 : index
      %32 = vector.load %arg10[%c0_24, %c0_25] : memref<32x768xf32, #tpu.memory_space<vmem>>, vector<32x768xf32>
      %c0_26 = arith.constant 0 : index
      %c0_27 = arith.constant 0 : index
      %33 = vector.load %arg6[%c0_26, %c0_27] : memref<512x768xbf16, #tpu.memory_space<vmem>>, vector<512x768xbf16>
      %cst_28 = arith.constant dense<0.000000e+00> : vector<32x768xf32>
      %34 = tpu.matmul %31, %33, %cst_28 {dimension_numbers = #tpu.dot_dimension_numbers<[1], [0], [0], [1], [0, 0, 1, 1], [], []>} : vector<32x512xbf16>, vector<512x768xbf16>, vector<32x768xf32> -> vector<32x768xf32>
      %35 = arith.addf %32, %34 : vector<32x768xf32>
      %c0_29 = arith.constant 0 : index
      %c0_30 = arith.constant 0 : index
      %36 = vector.load %arg10[%c0_29, %c0_30] : memref<32x768xf32, #tpu.memory_space<vmem>>, vector<32x768xf32>
      tpu.vector_store %arg10[%c0_29, %c0_30], %35 {strides = array<i32>} : memref<32x768xf32, #tpu.memory_space<vmem>>, vector<32x768xf32>,
      %c2_i32 = arith.constant 2 : i32
      %37 = arith.cmpi eq, %arg1, %c2_i32 : i32
      %38 = arith.extui %37 : i1 to i32
      %c0_i32_31 = arith.constant 0 : i32
      %39 = arith.cmpi ne, %38, %c0_i32_31 : i32
      scf.if %39 {
        %c0_32 = arith.constant 0 : index
        %c0_33 = arith.constant 0 : index
        %40 = vector.load %arg10[%c0_32, %c0_33] : memref<32x768xf32, #tpu.memory_space<vmem>>, vector<32x768xf32>
        %c0_34 = arith.constant 0 : index
        %c0_35 = arith.constant 0 : index
        %41 = vector.load %arg7[%c0_34, %c0_35] : memref<32x768xf32, #tpu.memory_space<vmem>>, vector<32x768xf32>
        tpu.vector_store %arg7[%c0_34, %c0_35], %40 {strides = array<i32>} : memref<32x768xf32, #tpu.memory_space<vmem>>, vector<32x768xf32>,
      } else {
      }
    } else {
    }
    return
  }
  func.func @transform_0(%arg0: i32, %arg1: i32, %arg2: i32) -> (i32, i32) {
    %c0_i32 = arith.constant 0 : i32
    return %arg0, %arg2 : i32, i32
  }
  func.func @transform_1(%arg0: i32, %arg1: i32, %arg2: i32) -> (i32, i32) {
    %c0_i32 = arith.constant 0 : i32
    return %arg2, %arg1 : i32, i32
  }
  func.func @transform_2(%arg0: i32, %arg1: i32, %arg2: i32) -> (i32, i32) {
    %c0_i32 = arith.constant 0 : i32
    return %arg2, %arg1 : i32, i32
  }
  func.func @transform_3(%arg0: i32, %arg1: i32, %arg2: i32) -> (i32, i32) {
    %c0_i32 = arith.constant 0 : i32
    %c0_i32_0 = arith.constant 0 : i32
    return %arg1, %c0_i32 : i32, i32
  }
  func.func @transform_4(%arg0: i32, %arg1: i32, %arg2: i32) -> (i32, i32) {
    %c0_i32 = arith.constant 0 : i32
    %c0_i32_0 = arith.constant 0 : i32
    return %arg0, %c0_i32 : i32, i32
  }
}

</mosaic_0001>

<bundles_post_ra>
// kernel: llama_mlp.1
= control target key start
LH: loop header
LB: loop body
LE: loop exit
PB: predicated region body
PF: predicated region fallthrough
CT: control target
= control target key end

     0   :  { %s7068_s15 = smov 0   ;;  %s7070_s16 = smov 0   ;;  %s9100_s0 = inlined_call_operand.vmem [shape: bf16[32,768], index: 0, kind: input, shape index: {}]   ;;  %s9101_s1 = inlined_call_operand.vmem [shape: bf16[768,1536], index: 1, kind: input, shape index: {}]   ;;  %s9102_s2 = inlined_call_operand.vmem [shape: bf16[768,1536], index: 2, kind: input, shape index: {}]   ;;  %s9103_s3 = inlined_call_operand.vmem [shape: bf16[1536,768], index: 3, kind: input, shape index: {}]   ;;  %s9104_s4 = inlined_call_operand.vmem [shape: f32[32,768], index: 4, kind: output, shape index: {}]  }
   0x1   :  { %s7072_s17 = smov 0   ;;  %s7074_s18 = smov 0  }
   0x2   :  { %s7076_s19 = smov 0   ;;  %s7078_s20 = smov 0  }
   0x3   :  { %s7080_s21 = smov 0   ;;  %s7082_s22 = smov 0  }
   0x4   :  { %s7084_s23 = smov 0  }
   0x5 LB: > { %s26_s24 = sadd.s32 1, %s7031_s21  ;;  %s29_s25 = sadd.s32 1, %s7035_s22  ;;  %s7039_s23 = sphi %s7084_s23, %s14_s23   ;;  %s7035_s22 = sphi %s7082_s22, %s9179_s22   ;;  %s7031_s21 = sphi %s7080_s21, %s9178_s21   ;;  %s7027_s20 = sphi %s7078_s20, %s9177_s20   ;;  %s7023_s19 = sphi %s7076_s19, %s9176_s19   ;;  %s7019_s18 = sphi %s7074_s18, %s9175_s18   ;;  %s7015_s17 = sphi %s7072_s17, %s9174_s17   ;;  %s7011_s16 = sphi %s7070_s16, %s9173_s16   ;;  %s7007_s15 = sphi %s7068_s15, %s9172_s15  }
   0x6   : > { %p27_p0 = scmp.ge.s32.totalorder %s26_s24, 2  ;;  %s42_s26 = sadd.s32 1, %s7019_s18 }
   0x7   : > { %p49_p1 = scmp.ne.s32.totalorder %s7019_s18, %s7015_s17  ;;  %p50_p2 = scmp.eq.s32.totalorder %s7039_s23, 0 }
   0x8   : > { %s9181_s24 = smov (%p27_p0, %s26_s24), 0  ;;  %s9183_s25 = smov (!%p27_p0, %s29_s25), %s7035_s22 }
   0x9   : > { %s38_s27 = ssub.s32 %s7031_s21, %s9181_s24  ;;  %p7124_p3 = por %p50_p2, %p49_p1 }
   0xa   : > { %p31_p4 = scmp.ge.s32.totalorder %s9183_s25, 3  ;;  %p40_p5 = scmp.eq.s32.totalorder %s38_s27, 0 }
   0xb   : > { %p77_p6 = scmp.ne.s32.totalorder %s7011_s16, %s7007_s15  ;;  %s70_s7 = sadd.s32 1, %s7011_s16 }
   0xc   : > { %s9185_s25 = smov (%p31_p4, %s9183_s25), 0  ;;  %p4830_p9 = scmp.ge.s32.totalorder %s7039_s23, 6 }
   0xd   : > { %s7133_s29 = scalar_select %p40_p5, %s7019_s18, %s42_s26  }
   0xe   : > { %s66_s30 = ssub.s32 %s7035_s22, %s9185_s25  ;;  %p7137_p7 = por %p77_p6, %p50_p2 }
   0xf   : > { %s67_s6 = sor.u32 %s66_s30, %s38_s27  ;;  %183 = sbr.rel (%p4830_p9) target bundleno = 241 (0xf1), region = 16 }
  0x10   : > { %p68_p8 = scmp.eq.s32.totalorder %s67_s6, 0 }
  0x12   : > { %s7143_s8 = scalar_select %p68_p8, %s7011_s16, %s70_s7  }
  0x14   : > { %186 = sbr.rel (!%p7124_p3) target bundleno = 33 (0x21), region = 20  ;;  %s188_s9 = sand.u32 (%p7124_p3), 1, %s7019_s18  }
  0x15   : > { %s6430_s10 = smul.u32 (%p7124_p3), 12, %s7031_s21 }
  0x16   : > { %s6821_s11 = smul.u32 (%p7124_p3), 48, %s188_s9 }
  0x17   : > { %s196_s14 = scalar_lea.vmem (%p7124_p3), %s9100_s0, %s6430_s10 }
  0x18   : > { %v211_v0 = vld [vmem:[%s196_s14] sm:$0xff] (%p7124_p3)  ;;  %v213_v1 = vld [vmem:[%s196_s14 + $0x18] sm:$0xff] (%p7124_p3)  ;;  %v215_v2 = vld [vmem:[%s196_s14 + $0x30] sm:$0xff] (%p7124_p3)  ;;  %s190_s26 = scalar_lea.vmem (%p7124_p3), [#allocation5], %s6821_s11 }
  0x19   : > { %212 = vst [vmem:[%s190_s26] sm:$0xff] %v211_v0  ;;  %v217_v3 = vld [vmem:[%s196_s14 + $0x48] sm:$0xff]  ;;  %v4834_v5 = vld [vmem:[%s196_s14 + $0x20] sm:$0xf]  ;;  %v4836_v6 = vld [vmem:[%s196_s14 + $0x38] sm:$0xf] }
  0x1a   : > { %214 = vst [vmem:[%s190_s26 + $0xc] sm:$0xff] %v213_v1  ;;  %v4832_v4 = vld [vmem:[%s196_s14 + $0x8] sm:$0xf]  ;;  %v4838_v7 = vld [vmem:[%s196_s14 + $0x50] sm:$0xf] }
  0x1b   : > { %216 = vst [vmem:[%s190_s26 + $0x18] sm:$0xff] %v215_v2 }
  0x1c   : > { %218 = vst [vmem:[%s190_s26 + $0x24] sm:$0xff] %v217_v3 }
  0x1d   : > { %4833 = vst [vmem:[%s190_s26 + $0x8] sm:$0xf] %v4832_v4 }
  0x1e   : > { %4835 = vst [vmem:[%s190_s26 + $0x14] sm:$0xf] %v4834_v5 }
  0x1f   : > { %4837 = vst [vmem:[%s190_s26 + $0x20] sm:$0xf] %v4836_v6 }
  0x20   : > { %4839 = vst [vmem:[%s190_s26 + $0x2c] sm:$0xf] %v4838_v7 }
  0x21 PF: > { %240 = sbr.rel (!%p7137_p7) target bundleno = 137 (0x89), region = 46  ;;  %s242_s27 = sand.u32 (%p7137_p7), 1, %s7011_s16  }
  0x22   : > { %s6822_s28 = smul.u32 (%p7137_p7), 768, %s242_s27  ;;  %s4840_s30 = sshll.u32 (%p7137_p7), %s7035_s22, 2 }
  0x23   : > { %s6829_s6 = smul.u32 (%p7137_p7), 576, %s7031_s21 }
  0x24   : > { %s7166_s13 = scalar_lea.vmem (%p7137_p7), [#allocation6], %s6822_s28 }
  0x25   : > { %s248_s7 = sadd.s32 (%p7137_p7), %s6829_s6, %s4840_s30 }
  0x26   : > { %s4841_s9 = sshll.u32 %s248_s7, 2 }
  0x27   : > { %s7161_s12 = scalar_lea.vmem %s9101_s1, %s4841_s9 }
  0x28   : > { %v263_v8 = vld [vmem:[%s7161_s12] sm:$0xff]  ;;  %v265_v9 = vld [vmem:[%s7161_s12 + $0x8] sm:$0xff]  ;;  %v267_v10 = vld [vmem:[%s7161_s12 + $0x30] sm:$0xff] }
  0x29   : > { %264 = vst [vmem:[%s7166_s13] sm:$0xff] %v263_v8  ;;  %v269_v11 = vld [vmem:[%s7161_s12 + $0x38] sm:$0xff]  ;;  %v271_v12 = vld [vmem:[%s7161_s12 + $0x60] sm:$0xff]  ;;  %v273_v13 = vld [vmem:[%s7161_s12 + $0x68] sm:$0xff] }
  0x2a   : > { %266 = vst [vmem:[%s7166_s13 + $0x8] sm:$0xff] %v265_v9  ;;  %v275_v14 = vld [vmem:[%s7161_s12 + $0x90] sm:$0xff]  ;;  %v277_v15 = vld [vmem:[%s7161_s12 + $0x98] sm:$0xff]  ;;  %v279_v16 = vld [vmem:[%s7161_s12 + $0xc0] sm:$0xff] }
  0x2b   : > { %268 = vst [vmem:[%s7166_s13 + $0x10] sm:$0xff] %v267_v10  ;;  %v281_v17 = vld [vmem:[%s7161_s12 + $0xc8] sm:$0xff]  ;;  %v283_v18 = vld [vmem:[%s7161_s12 + $0xf0] sm:$0xff]  ;;  %v285_v19 = vld [vmem:[%s7161_s12 + $0xf8] sm:$0xff] }
  0x2c   : > { %270 = vst [vmem:[%s7166_s13 + $0x18] sm:$0xff] %v269_v11  ;;  %v287_v20 = vld [vmem:[%s7161_s12 + $0x120] sm:$0xff]  ;;  %v289_v21 = vld [vmem:[%s7161_s12 + $0x128] sm:$0xff]  ;;  %v291_v22 = vld [vmem:[%s7161_s12 + $0x150] sm:$0xff] }
  0x2d   : > { %272 = vst [vmem:[%s7166_s13 + $0x20] sm:$0xff] %v271_v12  ;;  %v293_v23 = vld [vmem:[%s7161_s12 + $0x158] sm:$0xff]  ;;  %v295_v24 = vld [vmem:[%s7161_s12 + $0x180] sm:$0xff]  ;;  %v297_v25 = vld [vmem:[%s7161_s12 + $0x188] sm:$0xff] }
  0x2e   : > { %274 = vst [vmem:[%s7166_s13 + $0x28] sm:$0xff] %v273_v13  ;;  %v299_v26 = vld [vmem:[%s7161_s12 + $0x1b0] sm:$0xff]  ;;  %v301_v27 = vld [vmem:[%s7161_s12 + $0x1b8] sm:$0xff]  ;;  %v303_v28 = vld [vmem:[%s7161_s12 + $0x1e0] sm:$0xff] }
  0x2f   : > { %276 = vst [vmem:[%s7166_s13 + $0x30] sm:$0xff] %v275_v14  ;;  %v305_v29 = vld [vmem:[%s7161_s12 + $0x1e8] sm:$0xff]  ;;  %v307_v30 = vld [vmem:[%s7161_s12 + $0x210] sm:$0xff]  ;;  %v309_v31 = vld [vmem:[%s7161_s12 + $0x218] sm:$0xff] }
  0x30   : > { %278 = vst [vmem:[%s7166_s13 + $0x38] sm:$0xff] %v277_v15  ;;  %v311_v32 = vld [vmem:[%s7161_s12 + $0x240] sm:$0xff]  ;;  %v313_v33 = vld [vmem:[%s7161_s12 + $0x248] sm:$0xff]  ;;  %v315_v34 = vld [vmem:[%s7161_s12 + $0x270] sm:$0xff] }
  0x31   : > { %280 = vst [vmem:[%s7166_s13 + $0x40] sm:$0xff] %v279_v16  ;;  %v317_v35 = vld [vmem:[%s7161_s12 + $0x278] sm:$0xff]  ;;  %v319_v36 = vld [vmem:[%s7161_s12 + $0x2a0] sm:$0xff]  ;;  %v321_v37 = vld [vmem:[%s7161_s12 + $0x2a8] sm:$0xff] }
  0x32   : > { %282 = vst [vmem:[%s7166_s13 + $0x48] sm:$0xff] %v281_v17  ;;  %v323_v38 = vld [vmem:[%s7161_s12 + $0x2d0] sm:$0xff]  ;;  %v325_v39 = vld [vmem:[%s7161_s12 + $0x2d8] sm:$0xff]  ;;  %v327_v40 = vld [vmem:[%s7161_s12 + $0x300] sm:$0xff] }
  0x33   : > { %284 = vst [vmem:[%s7166_s13 + $0x50] sm:$0xff] %v283_v18  ;;  %v329_v41 = vld [vmem:[%s7161_s12 + $0x308] sm:$0xff]  ;;  %v331_v42 = vld [vmem:[%s7161_s12 + $0x330] sm:$0xff]  ;;  %v333_v43 = vld [vmem:[%s7161_s12 + $0x338] sm:$0xff] }
  0x34   : > { %286 = vst [vmem:[%s7166_s13 + $0x58] sm:$0xff] %v285_v19  ;;  %v335_v44 = vld [vmem:[%s7161_s12 + $0x360] sm:$0xff]  ;;  %v337_v45 = vld [vmem:[%s7161_s12 + $0x368] sm:$0xff]  ;;  %v339_v46 = vld [vmem:[%s7161_s12 + $0x390] sm:$0xff] }
  0x35   : > { %288 = vst [vmem:[%s7166_s13 + $0x60] sm:$0xff] %v287_v20  ;;  %v341_v47 = vld [vmem:[%s7161_s12 + $0x398] sm:$0xff]  ;;  %v343_v48 = vld [vmem:[%s7161_s12 + $0x3c0] sm:$0xff]  ;;  %v345_v49 = vld [vmem:[%s7161_s12 + $0x3c8] sm:$0xff] }
  0x36   : > { %290 = vst [vmem:[%s7166_s13 + $0x68] sm:$0xff] %v289_v21  ;;  %v347_v50 = vld [vmem:[%s7161_s12 + $0x3f0] sm:$0xff]  ;;  %v349_v51 = vld [vmem:[%s7161_s12 + $0x3f8] sm:$0xff]  ;;  %v351_v52 = vld [vmem:[%s7161_s12 + $0x420] sm:$0xff] }
  0x37   : > { %292 = vst [vmem:[%s7166_s13 + $0x70] sm:$0xff] %v291_v22  ;;  %v353_v53 = vld [vmem:[%s7161_s12 + $0x428] sm:$0xff]  ;;  %v355_v54 = vld [vmem:[%s7161_s12 + $0x450] sm:$0xff]  ;;  %v357_v55 = vld [vmem:[%s7161_s12 + $0x458] sm:$0xff] }
  0x38   : > { %294 = vst [vmem:[%s7166_s13 + $0x78] sm:$0xff] %v293_v23  ;;  %v359_v56 = vld [vmem:[%s7161_s12 + $0x480] sm:$0xff]  ;;  %v361_v57 = vld [vmem:[%s7161_s12 + $0x488] sm:$0xff]  ;;  %v363_v58 = vld [vmem:[%s7161_s12 + $0x4b0] sm:$0xff] }
  0x39   : > { %296 = vst [vmem:[%s7166_s13 + $0x80] sm:$0xff] %v295_v24  ;;  %v365_v59 = vld [vmem:[%s7161_s12 + $0x4b8] sm:$0xff]  ;;  %v367_v60 = vld [vmem:[%s7161_s12 + $0x4e0] sm:$0xff]  ;;  %v369_v61 = vld [vmem:[%s7161_s12 + $0x4e8] sm:$0xff] }
  0x3a   : > { %298 = vst [vmem:[%s7166_s13 + $0x88] sm:$0xff] %v297_v25  ;;  %v371_v62 = vld [vmem:[%s7161_s12 + $0x510] sm:$0xff]  ;;  %v373_v63 = vld [vmem:[%s7161_s12 + $0x518] sm:$0xff]  ;;  %v375_v0 = vld [vmem:[%s7161_s12 + $0x540] sm:$0xff] }
  0x3b   : > { %300 = vst [vmem:[%s7166_s13 + $0x90] sm:$0xff] %v299_v26  ;;  %v377_v1 = vld [vmem:[%s7161_s12 + $0x548] sm:$0xff]  ;;  %v379_v2 = vld [vmem:[%s7161_s12 + $0x570] sm:$0xff]  ;;  %v381_v3 = vld [vmem:[%s7161_s12 + $0x578] sm:$0xff] }
  0x3c   : > { %302 = vst [vmem:[%s7166_s13 + $0x98] sm:$0xff] %v301_v27  ;;  %v383_v4 = vld [vmem:[%s7161_s12 + $0x5a0] sm:$0xff]  ;;  %v385_v5 = vld [vmem:[%s7161_s12 + $0x5a8] sm:$0xff]  ;;  %v387_v6 = vld [vmem:[%s7161_s12 + $0x5d0] sm:$0xff] }
  0x3d   : > { %304 = vst [vmem:[%s7166_s13 + $0xa0] sm:$0xff] %v303_v28  ;;  %v389_v7 = vld [vmem:[%s7161_s12 + $0x5d8] sm:$0xff]  ;;  %v391_v8 = vld [vmem:[%s7161_s12 + $0x600] sm:$0xff]  ;;  %v393_v9 = vld [vmem:[%s7161_s12 + $0x608] sm:$0xff] }
  0x3e   : > { %306 = vst [vmem:[%s7166_s13 + $0xa8] sm:$0xff] %v305_v29  ;;  %v395_v10 = vld [vmem:[%s7161_s12 + $0x630] sm:$0xff]  ;;  %v397_v11 = vld [vmem:[%s7161_s12 + $0x638] sm:$0xff]  ;;  %v399_v12 = vld [vmem:[%s7161_s12 + $0x660] sm:$0xff] }
  0x3f   : > { %308 = vst [vmem:[%s7166_s13 + $0xb0] sm:$0xff] %v307_v30  ;;  %v401_v13 = vld [vmem:[%s7161_s12 + $0x668] sm:$0xff]  ;;  %v403_v14 = vld [vmem:[%s7161_s12 + $0x690] sm:$0xff]  ;;  %v405_v15 = vld [vmem:[%s7161_s12 + $0x698] sm:$0xff] }
  0x40   : > { %310 = vst [vmem:[%s7166_s13 + $0xb8] sm:$0xff] %v309_v31  ;;  %v407_v16 = vld [vmem:[%s7161_s12 + $0x6c0] sm:$0xff]  ;;  %v409_v17 = vld [vmem:[%s7161_s12 + $0x6c8] sm:$0xff]  ;;  %v411_v18 = vld [vmem:[%s7161_s12 + $0x6f0] sm:$0xff] }
  0x41   : > { %312 = vst [vmem:[%s7166_s13 + $0xc0] sm:$0xff] %v311_v32  ;;  %v413_v19 = vld [vmem:[%s7161_s12 + $0x6f8] sm:$0xff]  ;;  %v415_v20 = vld [vmem:[%s7161_s12 + $0x720] sm:$0xff]  ;;  %v417_v21 = vld [vmem:[%s7161_s12 + $0x728] sm:$0xff] }
  0x42   : > { %314 = vst [vmem:[%s7166_s13 + $0xc8] sm:$0xff] %v313_v33  ;;  %v419_v22 = vld [vmem:[%s7161_s12 + $0x750] sm:$0xff]  ;;  %v421_v23 = vld [vmem:[%s7161_s12 + $0x758] sm:$0xff]  ;;  %v423_v24 = vld [vmem:[%s7161_s12 + $0x780] sm:$0xff] }
  0x43   : > { %316 = vst [vmem:[%s7166_s13 + $0xd0] sm:$0xff] %v315_v34  ;;  %v425_v25 = vld [vmem:[%s7161_s12 + $0x788] sm:$0xff]  ;;  %v427_v26 = vld [vmem:[%s7161_s12 + $0x7b0] sm:$0xff]  ;;  %v429_v27 = vld [vmem:[%s7161_s12 + $0x7b8] sm:$0xff] }
  0x44   : > { %318 = vst [vmem:[%s7166_s13 + $0xd8] sm:$0xff] %v317_v35  ;;  %v431_v28 = vld [vmem:[%s7161_s12 + $0x7e0] sm:$0xff]  ;;  %v433_v29 = vld [vmem:[%s7161_s12 + $0x7e8] sm:$0xff]  ;;  %v435_v30 = vld [vmem:[%s7161_s12 + $0x810] sm:$0xff] }
  0x45   : > { %320 = vst [vmem:[%s7166_s13 + $0xe0] sm:$0xff] %v319_v36  ;;  %v437_v31 = vld [vmem:[%s7161_s12 + $0x818] sm:$0xff]  ;;  %v439_v32 = vld [vmem:[%s7161_s12 + $0x840] sm:$0xff]  ;;  %v441_v33 = vld [vmem:[%s7161_s12 + $0x848] sm:$0xff] }
  0x46   : > { %322 = vst [vmem:[%s7166_s13 + $0xe8] sm:$0xff] %v321_v37  ;;  %v443_v34 = vld [vmem:[%s7161_s12 + $0x870] sm:$0xff]  ;;  %v445_v35 = vld [vmem:[%s7161_s12 + $0x878] sm:$0xff]  ;;  %v447_v36 = vld [vmem:[%s7161_s12 + $0x8a0] sm:$0xff] }
  0x47   : > { %324 = vst [vmem:[%s7166_s13 + $0xf0] sm:$0xff] %v323_v38  ;;  %v449_v37 = vld [vmem:[%s7161_s12 + $0x8a8] sm:$0xff]  ;;  %v451_v38 = vld [vmem:[%s7161_s12 + $0x8d0] sm:$0xff] }
  0x48   : > { %326 = vst [vmem:[%s7166_s13 + $0xf8] sm:$0xff] %v325_v39  ;;  %v453_v39 = vld [vmem:[%s7161_s12 + $0x8d8] sm:$0xff] }
  0x49   : > { %328 = vst [vmem:[%s7166_s13 + $0x100] sm:$0xff] %v327_v40 }
  0x4a   : > { %330 = vst [vmem:[%s7166_s13 + $0x108] sm:$0xff] %v329_v41 }
  0x4b   : > { %332 = vst [vmem:[%s7166_s13 + $0x110] sm:$0xff] %v331_v42 }
  0x4c   : > { %334 = vst [vmem:[%s7166_s13 + $0x118] sm:$0xff] %v333_v43 }
  0x4d   : > { %336 = vst [vmem:[%s7166_s13 + $0x120] sm:$0xff] %v335_v44 }
  0x4e   : > { %338 = vst [vmem:[%s7166_s13 + $0x128] sm:$0xff] %v337_v45 }
  0x4f   : > { %340 = vst [vmem:[%s7166_s13 + $0x130] sm:$0xff] %v339_v46 }
  0x50   : > { %342 = vst [vmem:[%s7166_s13 + $0x138] sm:$0xff] %v341_v47 }
  0x51   : > { %344 = vst [vmem:[%s7166_s13 + $0x140] sm:$0xff] %v343_v48 }
  0x52   : > { %346 = vst [vmem:[%s7166_s13 + $0x148] sm:$0xff] %v345_v49 }
  0x53   : > { %348 = vst [vmem:[%s7166_s13 + $0x150] sm:$0xff] %v347_v50 }
  0x54   : > { %350 = vst [vmem:[%s7166_s13 + $0x158] sm:$0xff] %v349_v51 }
  0x55   : > { %352 = vst [vmem:[%s7166_s13 + $0x160] sm:$0xff] %v351_v52 }
  0x56   : > { %354 = vst [vmem:[%s7166_s13 + $0x168] sm:$0xff] %v353_v53 }
  0x57   : > { %356 = vst [vmem:[%s7166_s13 + $0x170] sm:$0xff] %v355_v54 }
  0x58   : > { %358 = vst [vmem:[%s7166_s13 + $0x178] sm:$0xff] %v357_v55 }
  0x59   : > { %360 = vst [vmem:[%s7166_s13 + $0x180] sm:$0xff] %v359_v56 }
  0x5a   : > { %362 = vst [vmem:[%s7166_s13 + $0x188] sm:$0xff] %v361_v57 }
  0x5b   : > { %364 = vst [vmem:[%s7166_s13 + $0x190] sm:$0xff] %v363_v58 }
  0x5c   : > { %366 = vst [vmem:[%s7166_s13 + $0x198] sm:$0xff] %v365_v59 }
  0x5d   : > { %368 = vst [vmem:[%s7166_s13 + $0x1a0] sm:$0xff] %v367_v60 }
  0x5e   : > { %370 = vst [vmem:[%s7166_s13 + $0x1a8] sm:$0xff] %v369_v61 }
  0x5f   : > { %372 = vst [vmem:[%s7166_s13 + $0x1b0] sm:$0xff] %v371_v62 }
  0x60   : > { %374 = vst [vmem:[%s7166_s13 + $0x1b8] sm:$0xff] %v373_v63 }
  0x61   : > { %376 = vst [vmem:[%s7166_s13 + $0x1c0] sm:$0xff] %v375_v0 }
  0x62   : > { %378 = vst [vmem:[%s7166_s13 + $0x1c8] sm:$0xff] %v377_v1 }
  0x63   : > { %380 = vst [vmem:[%s7166_s13 + $0x1d0] sm:$0xff] %v379_v2 }
  0x64   : > { %382 = vst [vmem:[%s7166_s13 + $0x1d8] sm:$0xff] %v381_v3 }
  0x65   : > { %384 = vst [vmem:[%s7166_s13 + $0x1e0] sm:$0xff] %v383_v4 }
  0x66   : > { %386 = vst [vmem:[%s7166_s13 + $0x1e8] sm:$0xff] %v385_v5 }
  0x67   : > { %388 = vst [vmem:[%s7166_s13 + $0x1f0] sm:$0xff] %v387_v6 }
  0x68   : > { %390 = vst [vmem:[%s7166_s13 + $0x1f8] sm:$0xff] %v389_v7 }
  0x69   : > { %392 = vst [vmem:[%s7166_s13 + $0x200] sm:$0xff] %v391_v8 }
  0x6a   : > { %394 = vst [vmem:[%s7166_s13 + $0x208] sm:$0xff] %v393_v9 }
  0x6b   : > { %396 = vst [vmem:[%s7166_s13 + $0x210] sm:$0xff] %v395_v10 }
  0x6c   : > { %398 = vst [vmem:[%s7166_s13 + $0x218] sm:$0xff] %v397_v11 }
  0x6d   : > { %400 = vst [vmem:[%s7166_s13 + $0x220] sm:$0xff] %v399_v12 }
  0x6e   : > { %402 = vst [vmem:[%s7166_s13 + $0x228] sm:$0xff] %v401_v13 }
  0x6f   : > { %404 = vst [vmem:[%s7166_s13 + $0x230] sm:$0xff] %v403_v14 }
  0x70   : > { %406 = vst [vmem:[%s7166_s13 + $0x238] sm:$0xff] %v405_v15 }
  0x71   : > { %408 = vst [vmem:[%s7166_s13 + $0x240] sm:$0xff] %v407_v16 }
  0x72   : > { %410 = vst [vmem:[%s7166_s13 + $0x248] sm:$0xff] %v409_v17 }
  0x73   : > { %412 = vst [vmem:[%s7166_s13 + $0x250] sm:$0xff] %v411_v18 }
  0x74   : > { %414 = vst [vmem:[%s7166_s13 + $0x258] sm:$0xff] %v413_v19 }
  0x75   : > { %416 = vst [vmem:[%s7166_s13 + $0x260] sm:$0xff] %v415_v20 }
  0x76   : > { %418 = vst [vmem:[%s7166_s13 + $0x268] sm:$0xff] %v417_v21 }
  0x77   : > { %420 = vst [vmem:[%s7166_s13 + $0x270] sm:$0xff] %v419_v22 }
  0x78   : > { %422 = vst [vmem:[%s7166_s13 + $0x278] sm:$0xff] %v421_v23 }
  0x79   : > { %424 = vst [vmem:[%s7166_s13 + $0x280] sm:$0xff] %v423_v24 }
  0x7a   : > { %426 = vst [vmem:[%s7166_s13 + $0x288] sm:$0xff] %v425_v25 }
  0x7b   : > { %428 = vst [vmem:[%s7166_s13 + $0x290] sm:$0xff] %v427_v26 }
  0x7c   : > { %430 = vst [vmem:[%s7166_s13 + $0x298] sm:$0xff] %v429_v27 }
  0x7d   : > { %432 = vst [vmem:[%s7166_s13 + $0x2a0] sm:$0xff] %v431_v28 }
  0x7e   : > { %434 = vst [vmem:[%s7166_s13 + $0x2a8] sm:$0xff] %v433_v29 }
  0x7f   : > { %436 = vst [vmem:[%s7166_s13 + $0x2b0] sm:$0xff] %v435_v30 }
  0x80   : > { %438 = vst [vmem:[%s7166_s13 + $0x2b8] sm:$0xff] %v437_v31 }
  0x81   : > { %440 = vst [vmem:[%s7166_s13 + $0x2c0] sm:$0xff] %v439_v32 }
  0x82   : > { %442 = vst [vmem:[%s7166_s13 + $0x2c8] sm:$0xff] %v441_v33 }
  0x83   : > { %444 = vst [vmem:[%s7166_s13 + $0x2d0] sm:$0xff] %v443_v34 }
  0x84   : > { %446 = vst [vmem:[%s7166_s13 + $0x2d8] sm:$0xff] %v445_v35 }
  0x85   : > { %448 = vst [vmem:[%s7166_s13 + $0x2e0] sm:$0xff] %v447_v36 }
  0x86   : > { %450 = vst [vmem:[%s7166_s13 + $0x2e8] sm:$0xff] %v449_v37 }
  0x87   : > { %452 = vst [vmem:[%s7166_s13 + $0x2f0] sm:$0xff] %v451_v38 }
  0x88   : > { %454 = vst [vmem:[%s7166_s13 + $0x2f8] sm:$0xff] %v453_v39 }
  0x89 PF: > { %460 = sbr.rel (!%p7137_p7) target bundleno = 241 (0xf1), region = 69  ;;  %s462_s14 = sand.u32 (%p7137_p7), 1, %s7011_s16  }
  0x8a   : > { %s6824_s26 = smul.u32 (%p7137_p7), 768, %s462_s14  ;;  %s4842_s27 = sshll.u32 (%p7137_p7), %s7035_s22, 2 }
  0x8b   : > { %s6830_s28 = smul.u32 (%p7137_p7), 576, %s7031_s21 }
  0x8c   : > { %s7370_s5 = scalar_lea.vmem (%p7137_p7), [#allocation7], %s6824_s26 }
  0x8d   : > { %s468_s30 = sadd.s32 (%p7137_p7), %s6830_s28, %s4842_s27 }
  0x8e   : > { %s4843_s6 = sshll.u32 %s468_s30, 2 }
  0x8f   : > { %s7365_s10 = scalar_lea.vmem %s9102_s2, %s4843_s6 }
  0x90   : > { %v483_v40 = vld [vmem:[%s7365_s10] sm:$0xff]  ;;  %v485_v41 = vld [vmem:[%s7365_s10 + $0x8] sm:$0xff]  ;;  %v487_v42 = vld [vmem:[%s7365_s10 + $0x30] sm:$0xff] }
  0x91   : > { %484 = vst [vmem:[%s7370_s5] sm:$0xff] %v483_v40  ;;  %v489_v43 = vld [vmem:[%s7365_s10 + $0x38] sm:$0xff]  ;;  %v491_v44 = vld [vmem:[%s7365_s10 + $0x60] sm:$0xff]  ;;  %v493_v45 = vld [vmem:[%s7365_s10 + $0x68] sm:$0xff] }
  0x92   : > { %486 = vst [vmem:[%s7370_s5 + $0x8] sm:$0xff] %v485_v41  ;;  %v495_v46 = vld [vmem:[%s7365_s10 + $0x90] sm:$0xff]  ;;  %v497_v47 = vld [vmem:[%s7365_s10 + $0x98] sm:$0xff]  ;;  %v499_v48 = vld [vmem:[%s7365_s10 + $0xc0] sm:$0xff] }
  0x93   : > { %488 = vst [vmem:[%s7370_s5 + $0x10] sm:$0xff] %v487_v42  ;;  %v501_v49 = vld [vmem:[%s7365_s10 + $0xc8] sm:$0xff]  ;;  %v503_v50 = vld [vmem:[%s7365_s10 + $0xf0] sm:$0xff]  ;;  %v505_v51 = vld [vmem:[%s7365_s10 + $0xf8] sm:$0xff] }
  0x94   : > { %490 = vst [vmem:[%s7370_s5 + $0x18] sm:$0xff] %v489_v43  ;;  %v507_v52 = vld [vmem:[%s7365_s10 + $0x120] sm:$0xff]  ;;  %v509_v53 = vld [vmem:[%s7365_s10 + $0x128] sm:$0xff]  ;;  %v511_v54 = vld [vmem:[%s7365_s10 + $0x150] sm:$0xff] }
  0x95   : > { %492 = vst [vmem:[%s7370_s5 + $0x20] sm:$0xff] %v491_v44  ;;  %v513_v55 = vld [vmem:[%s7365_s10 + $0x158] sm:$0xff]  ;;  %v515_v56 = vld [vmem:[%s7365_s10 + $0x180] sm:$0xff]  ;;  %v517_v57 = vld [vmem:[%s7365_s10 + $0x188] sm:$0xff] }
  0x96   : > { %494 = vst [vmem:[%s7370_s5 + $0x28] sm:$0xff] %v493_v45  ;;  %v519_v58 = vld [vmem:[%s7365_s10 + $0x1b0] sm:$0xff]  ;;  %v521_v59 = vld [vmem:[%s7365_s10 + $0x1b8] sm:$0xff]  ;;  %v523_v60 = vld [vmem:[%s7365_s10 + $0x1e0] sm:$0xff] }
  0x97   : > { %496 = vst [vmem:[%s7370_s5 + $0x30] sm:$0xff] %v495_v46  ;;  %v525_v61 = vld [vmem:[%s7365_s10 + $0x1e8] sm:$0xff]  ;;  %v527_v62 = vld [vmem:[%s7365_s10 + $0x210] sm:$0xff]  ;;  %v529_v63 = vld [vmem:[%s7365_s10 + $0x218] sm:$0xff] }
  0x98   : > { %498 = vst [vmem:[%s7370_s5 + $0x38] sm:$0xff] %v497_v47  ;;  %v531_v0 = vld [vmem:[%s7365_s10 + $0x240] sm:$0xff]  ;;  %v533_v1 = vld [vmem:[%s7365_s10 + $0x248] sm:$0xff]  ;;  %v535_v2 = vld [vmem:[%s7365_s10 + $0x270] sm:$0xff] }
  0x99   : > { %500 = vst [vmem:[%s7370_s5 + $0x40] sm:$0xff] %v499_v48  ;;  %v537_v3 = vld [vmem:[%s7365_s10 + $0x278] sm:$0xff]  ;;  %v539_v4 = vld [vmem:[%s7365_s10 + $0x2a0] sm:$0xff]  ;;  %v541_v5 = vld [vmem:[%s7365_s10 + $0x2a8] sm:$0xff] }
  0x9a   : > { %502 = vst [vmem:[%s7370_s5 + $0x48] sm:$0xff] %v501_v49  ;;  %v543_v6 = vld [vmem:[%s7365_s10 + $0x2d0] sm:$0xff]  ;;  %v545_v7 = vld [vmem:[%s7365_s10 + $0x2d8] sm:$0xff]  ;;  %v547_v8 = vld [vmem:[%s7365_s10 + $0x300] sm:$0xff] }
  0x9b   : > { %504 = vst [vmem:[%s7370_s5 + $0x50] sm:$0xff] %v503_v50  ;;  %v549_v9 = vld [vmem:[%s7365_s10 + $0x308] sm:$0xff]  ;;  %v551_v10 = vld [vmem:[%s7365_s10 + $0x330] sm:$0xff]  ;;  %v553_v11 = vld [vmem:[%s7365_s10 + $0x338] sm:$0xff] }
  0x9c   : > { %506 = vst [vmem:[%s7370_s5 + $0x58] sm:$0xff] %v505_v51  ;;  %v555_v12 = vld [vmem:[%s7365_s10 + $0x360] sm:$0xff]  ;;  %v557_v13 = vld [vmem:[%s7365_s10 + $0x368] sm:$0xff]  ;;  %v559_v14 = vld [vmem:[%s7365_s10 + $0x390] sm:$0xff] }
  0x9d   : > { %508 = vst [vmem:[%s7370_s5 + $0x60] sm:$0xff] %v507_v52  ;;  %v561_v15 = vld [vmem:[%s7365_s10 + $0x398] sm:$0xff]  ;;  %v563_v16 = vld [vmem:[%s7365_s10 + $0x3c0] sm:$0xff]  ;;  %v565_v17 = vld [vmem:[%s7365_s10 + $0x3c8] sm:$0xff] }
  0x9e   : > { %510 = vst [vmem:[%s7370_s5 + $0x68] sm:$0xff] %v509_v53  ;;  %v567_v18 = vld [vmem:[%s7365_s10 + $0x3f0] sm:$0xff]  ;;  %v569_v19 = vld [vmem:[%s7365_s10 + $0x3f8] sm:$0xff]  ;;  %v571_v20 = vld [vmem:[%s7365_s10 + $0x420] sm:$0xff] }
  0x9f   : > { %512 = vst [vmem:[%s7370_s5 + $0x70] sm:$0xff] %v511_v54  ;;  %v573_v21 = vld [vmem:[%s7365_s10 + $0x428] sm:$0xff]  ;;  %v575_v22 = vld [vmem:[%s7365_s10 + $0x450] sm:$0xff]  ;;  %v577_v23 = vld [vmem:[%s7365_s10 + $0x458] sm:$0xff] }
  0xa0   : > { %514 = vst [vmem:[%s7370_s5 + $0x78] sm:$0xff] %v513_v55  ;;  %v579_v24 = vld [vmem:[%s7365_s10 + $0x480] sm:$0xff]  ;;  %v581_v25 = vld [vmem:[%s7365_s10 + $0x488] sm:$0xff]  ;;  %v583_v26 = vld [vmem:[%s7365_s10 + $0x4b0] sm:$0xff] }
  0xa1   : > { %516 = vst [vmem:[%s7370_s5 + $0x80] sm:$0xff] %v515_v56  ;;  %v585_v27 = vld [vmem:[%s7365_s10 + $0x4b8] sm:$0xff]  ;;  %v587_v28 = vld [vmem:[%s7365_s10 + $0x4e0] sm:$0xff]  ;;  %v589_v29 = vld [vmem:[%s7365_s10 + $0x4e8] sm:$0xff] }
  0xa2   : > { %518 = vst [vmem:[%s7370_s5 + $0x88] sm:$0xff] %v517_v57  ;;  %v591_v30 = vld [vmem:[%s7365_s10 + $0x510] sm:$0xff]  ;;  %v593_v31 = vld [vmem:[%s7365_s10 + $0x518] sm:$0xff]  ;;  %v595_v32 = vld [vmem:[%s7365_s10 + $0x540] sm:$0xff] }
  0xa3   : > { %520 = vst [vmem:[%s7370_s5 + $0x90] sm:$0xff] %v519_v58  ;;  %v597_v33 = vld [vmem:[%s7365_s10 + $0x548] sm:$0xff]  ;;  %v599_v34 = vld [vmem:[%s7365_s10 + $0x570] sm:$0xff]  ;;  %v601_v35 = vld [vmem:[%s7365_s10 + $0x578] sm:$0xff] }
  0xa4   : > { %522 = vst [vmem:[%s7370_s5 + $0x98] sm:$0xff] %v521_v59  ;;  %v603_v36 = vld [vmem:[%s7365_s10 + $0x5a0] sm:$0xff]  ;;  %v605_v37 = vld [vmem:[%s7365_s10 + $0x5a8] sm:$0xff]  ;;  %v607_v38 = vld [vmem:[%s7365_s10 + $0x5d0] sm:$0xff] }
  0xa5   : > { %524 = vst [vmem:[%s7370_s5 + $0xa0] sm:$0xff] %v523_v60  ;;  %v609_v39 = vld [vmem:[%s7365_s10 + $0x5d8] sm:$0xff]  ;;  %v611_v40 = vld [vmem:[%s7365_s10 + $0x600] sm:$0xff]  ;;  %v613_v41 = vld [vmem:[%s7365_s10 + $0x608] sm:$0xff] }
  0xa6   : > { %526 = vst [vmem:[%s7370_s5 + $0xa8] sm:$0xff] %v525_v61  ;;  %v615_v42 = vld [vmem:[%s7365_s10 + $0x630] sm:$0xff]  ;;  %v617_v43 = vld [vmem:[%s7365_s10 + $0x638] sm:$0xff]  ;;  %v619_v44 = vld [vmem:[%s7365_s10 + $0x660] sm:$0xff] }
  0xa7   : > { %528 = vst [vmem:[%s7370_s5 + $0xb0] sm:$0xff] %v527_v62  ;;  %v621_v45 = vld [vmem:[%s7365_s10 + $0x668] sm:$0xff]  ;;  %v623_v46 = vld [vmem:[%s7365_s10 + $0x690] sm:$0xff]  ;;  %v625_v47 = vld [vmem:[%s7365_s10 + $0x698] sm:$0xff] }
  0xa8   : > { %530 = vst [vmem:[%s7370_s5 + $0xb8] sm:$0xff] %v529_v63  ;;  %v627_v48 = vld [vmem:[%s7365_s10 + $0x6c0] sm:$0xff]  ;;  %v629_v49 = vld [vmem:[%s7365_s10 + $0x6c8] sm:$0xff]  ;;  %v631_v50 = vld [vmem:[%s7365_s10 + $0x6f0] sm:$0xff] }
  0xa9   : > { %532 = vst [vmem:[%s7370_s5 + $0xc0] sm:$0xff] %v531_v0  ;;  %v633_v51 = vld [vmem:[%s7365_s10 + $0x6f8] sm:$0xff]  ;;  %v635_v52 = vld [vmem:[%s7365_s10 + $0x720] sm:$0xff]  ;;  %v637_v53 = vld [vmem:[%s7365_s10 + $0x728] sm:$0xff] }
  0xaa   : > { %534 = vst [vmem:[%s7370_s5 + $0xc8] sm:$0xff] %v533_v1  ;;  %v639_v54 = vld [vmem:[%s7365_s10 + $0x750] sm:$0xff]  ;;  %v641_v55 = vld [vmem:[%s7365_s10 + $0x758] sm:$0xff]  ;;  %v643_v56 = vld [vmem:[%s7365_s10 + $0x780] sm:$0xff] }
  0xab   : > { %536 = vst [vmem:[%s7370_s5 + $0xd0] sm:$0xff] %v535_v2  ;;  %v645_v57 = vld [vmem:[%s7365_s10 + $0x788] sm:$0xff]  ;;  %v647_v58 = vld [vmem:[%s7365_s10 + $0x7b0] sm:$0xff]  ;;  %v649_v59 = vld [vmem:[%s7365_s10 + $0x7b8] sm:$0xff] }
  0xac   : > { %538 = vst [vmem:[%s7370_s5 + $0xd8] sm:$0xff] %v537_v3  ;;  %v651_v60 = vld [vmem:[%s7365_s10 + $0x7e0] sm:$0xff]  ;;  %v653_v61 = vld [vmem:[%s7365_s10 + $0x7e8] sm:$0xff]  ;;  %v655_v62 = vld [vmem:[%s7365_s10 + $0x810] sm:$0xff] }
  0xad   : > { %540 = vst [vmem:[%s7370_s5 + $0xe0] sm:$0xff] %v539_v4  ;;  %v657_v63 = vld [vmem:[%s7365_s10 + $0x818] sm:$0xff]  ;;  %v659_v0 = vld [vmem:[%s7365_s10 + $0x840] sm:$0xff]  ;;  %v661_v1 = vld [vmem:[%s7365_s10 + $0x848] sm:$0xff] }
  0xae   : > { %542 = vst [vmem:[%s7370_s5 + $0xe8] sm:$0xff] %v541_v5  ;;  %v663_v2 = vld [vmem:[%s7365_s10 + $0x870] sm:$0xff]  ;;  %v665_v3 = vld [vmem:[%s7365_s10 + $0x878] sm:$0xff]  ;;  %v667_v4 = vld [vmem:[%s7365_s10 + $0x8a0] sm:$0xff] }
  0xaf   : > { %544 = vst [vmem:[%s7370_s5 + $0xf0] sm:$0xff] %v543_v6  ;;  %v669_v5 = vld [vmem:[%s7365_s10 + $0x8a8] sm:$0xff]  ;;  %v671_v6 = vld [vmem:[%s7365_s10 + $0x8d0] sm:$0xff] }
  0xb0   : > { %546 = vst [vmem:[%s7370_s5 + $0xf8] sm:$0xff] %v545_v7  ;;  %v673_v7 = vld [vmem:[%s7365_s10 + $0x8d8] sm:$0xff] }
  0xb1   : > { %548 = vst [vmem:[%s7370_s5 + $0x100] sm:$0xff] %v547_v8 }
  0xb2   : > { %550 = vst [vmem:[%s7370_s5 + $0x108] sm:$0xff] %v549_v9 }
  0xb3   : > { %552 = vst [vmem:[%s7370_s5 + $0x110] sm:$0xff] %v551_v10 }
  0xb4   : > { %554 = vst [vmem:[%s7370_s5 + $0x118] sm:$0xff] %v553_v11 }
  0xb5   : > { %556 = vst [vmem:[%s7370_s5 + $0x120] sm:$0xff] %v555_v12 }
  0xb6   : > { %558 = vst [vmem:[%s7370_s5 + $0x128] sm:$0xff] %v557_v13 }
  0xb7   : > { %560 = vst [vmem:[%s7370_s5 + $0x130] sm:$0xff] %v559_v14 }
  0xb8   : > { %562 = vst [vmem:[%s7370_s5 + $0x138] sm:$0xff] %v561_v15 }
  0xb9   : > { %564 = vst [vmem:[%s7370_s5 + $0x140] sm:$0xff] %v563_v16 }
  0xba   : > { %566 = vst [vmem:[%s7370_s5 + $0x148] sm:$0xff] %v565_v17 }
  0xbb   : > { %568 = vst [vmem:[%s7370_s5 + $0x150] sm:$0xff] %v567_v18 }
  0xbc   : > { %570 = vst [vmem:[%s7370_s5 + $0x158] sm:$0xff] %v569_v19 }
  0xbd   : > { %572 = vst [vmem:[%s7370_s5 + $0x160] sm:$0xff] %v571_v20 }
  0xbe   : > { %574 = vst [vmem:[%s7370_s5 + $0x168] sm:$0xff] %v573_v21 }
  0xbf   : > { %576 = vst [vmem:[%s7370_s5 + $0x170] sm:$0xff] %v575_v22 }
  0xc0   : > { %578 = vst [vmem:[%s7370_s5 + $0x178] sm:$0xff] %v577_v23 }
  0xc1   : > { %580 = vst [vmem:[%s7370_s5 + $0x180] sm:$0xff] %v579_v24 }
  0xc2   : > { %582 = vst [vmem:[%s7370_s5 + $0x188] sm:$0xff] %v581_v25 }
  0xc3   : > { %584 = vst [vmem:[%s7370_s5 + $0x190] sm:$0xff] %v583_v26 }
  0xc4   : > { %586 = vst [vmem:[%s7370_s5 + $0x198] sm:$0xff] %v585_v27 }
  0xc5   : > { %588 = vst [vmem:[%s7370_s5 + $0x1a0] sm:$0xff] %v587_v28 }
  0xc6   : > { %590 = vst [vmem:[%s7370_s5 + $0x1a8] sm:$0xff] %v589_v29 }
  0xc7   : > { %592 = vst [vmem:[%s7370_s5 + $0x1b0] sm:$0xff] %v591_v30 }
  0xc8   : > { %594 = vst [vmem:[%s7370_s5 + $0x1b8] sm:$0xff] %v593_v31 }
  0xc9   : > { %596 = vst [vmem:[%s7370_s5 + $0x1c0] sm:$0xff] %v595_v32 }
  0xca   : > { %598 = vst [vmem:[%s7370_s5 + $0x1c8] sm:$0xff] %v597_v33 }
  0xcb   : > { %600 = vst [vmem:[%s7370_s5 + $0x1d0] sm:$0xff] %v599_v34 }
  0xcc   : > { %602 = vst [vmem:[%s7370_s5 + $0x1d8] sm:$0xff] %v601_v35 }
  0xcd   : > { %604 = vst [vmem:[%s7370_s5 + $0x1e0] sm:$0xff] %v603_v36 }
  0xce   : > { %606 = vst [vmem:[%s7370_s5 + $0x1e8] sm:$0xff] %v605_v37 }
  0xcf   : > { %608 = vst [vmem:[%s7370_s5 + $0x1f0] sm:$0xff] %v607_v38 }
  0xd0   : > { %610 = vst [vmem:[%s7370_s5 + $0x1f8] sm:$0xff] %v609_v39 }
  0xd1   : > { %612 = vst [vmem:[%s7370_s5 + $0x200] sm:$0xff] %v611_v40 }
  0xd2   : > { %614 = vst [vmem:[%s7370_s5 + $0x208] sm:$0xff] %v613_v41 }
  0xd3   : > { %616 = vst [vmem:[%s7370_s5 + $0x210] sm:$0xff] %v615_v42 }
  0xd4   : > { %618 = vst [vmem:[%s7370_s5 + $0x218] sm:$0xff] %v617_v43 }
  0xd5   : > { %620 = vst [vmem:[%s7370_s5 + $0x220] sm:$0xff] %v619_v44 }
  0xd6   : > { %622 = vst [vmem:[%s7370_s5 + $0x228] sm:$0xff] %v621_v45 }
  0xd7   : > { %624 = vst [vmem:[%s7370_s5 + $0x230] sm:$0xff] %v623_v46 }
  0xd8   : > { %626 = vst [vmem:[%s7370_s5 + $0x238] sm:$0xff] %v625_v47 }
  0xd9   : > { %628 = vst [vmem:[%s7370_s5 + $0x240] sm:$0xff] %v627_v48 }
  0xda   : > { %630 = vst [vmem:[%s7370_s5 + $0x248] sm:$0xff] %v629_v49 }
  0xdb   : > { %632 = vst [vmem:[%s7370_s5 + $0x250] sm:$0xff] %v631_v50 }
  0xdc   : > { %634 = vst [vmem:[%s7370_s5 + $0x258] sm:$0xff] %v633_v51 }
  0xdd   : > { %636 = vst [vmem:[%s7370_s5 + $0x260] sm:$0xff] %v635_v52 }
  0xde   : > { %638 = vst [vmem:[%s7370_s5 + $0x268] sm:$0xff] %v637_v53 }
  0xdf   : > { %640 = vst [vmem:[%s7370_s5 + $0x270] sm:$0xff] %v639_v54 }
  0xe0   : > { %642 = vst [vmem:[%s7370_s5 + $0x278] sm:$0xff] %v641_v55 }
  0xe1   : > { %644 = vst [vmem:[%s7370_s5 + $0x280] sm:$0xff] %v643_v56 }
  0xe2   : > { %646 = vst [vmem:[%s7370_s5 + $0x288] sm:$0xff] %v645_v57 }
  0xe3   : > { %648 = vst [vmem:[%s7370_s5 + $0x290] sm:$0xff] %v647_v58 }
  0xe4   : > { %650 = vst [vmem:[%s7370_s5 + $0x298] sm:$0xff] %v649_v59 }
  0xe5   : > { %652 = vst [vmem:[%s7370_s5 + $0x2a0] sm:$0xff] %v651_v60 }
  0xe6   : > { %654 = vst [vmem:[%s7370_s5 + $0x2a8] sm:$0xff] %v653_v61 }
  0xe7   : > { %656 = vst [vmem:[%s7370_s5 + $0x2b0] sm:$0xff] %v655_v62 }
  0xe8   : > { %658 = vst [vmem:[%s7370_s5 + $0x2b8] sm:$0xff] %v657_v63 }
  0xe9   : > { %660 = vst [vmem:[%s7370_s5 + $0x2c0] sm:$0xff] %v659_v0 }
  0xea   : > { %662 = vst [vmem:[%s7370_s5 + $0x2c8] sm:$0xff] %v661_v1 }
  0xeb   : > { %664 = vst [vmem:[%s7370_s5 + $0x2d0] sm:$0xff] %v663_v2 }
  0xec   : > { %666 = vst [vmem:[%s7370_s5 + $0x2d8] sm:$0xff] %v665_v3 }
  0xed   : > { %668 = vst [vmem:[%s7370_s5 + $0x2e0] sm:$0xff] %v667_v4 }
  0xee   : > { %670 = vst [vmem:[%s7370_s5 + $0x2e8] sm:$0xff] %v669_v5 }
  0xef   : > { %672 = vst [vmem:[%s7370_s5 + $0x2f0] sm:$0xff] %v671_v6 }
  0xf0   : > { %674 = vst [vmem:[%s7370_s5 + $0x2f8] sm:$0xff] %v673_v7 }
  0xf1 PF: > { %p4844_p10 = scmp.ge.s32.totalorder %s7039_s23, 1  ;;  %p689_p11 = scmp.lt.s32.totalorder %s7039_s23, 7 }
  0xf3   : > { %p690_p12 = pnand %p4844_p10, %p689_p11 }
  0xf4   : > { %s696_s11 = sand.u32 (!%p690_p12), 1, %s7015_s17   ;;  %s703_s12 = sand.u32 (!%p690_p12), 1, %s7007_s15  }
  0xf5   : > { %693 = sbr.rel (%p690_p12) target bundleno = 1128 (0x468), region = 96  ;;  %s4845_s14 = sshll.u32 (!%p690_p12), %s7027_s20, 6 }
  0xf6   : > { %s6826_s13 = smul.u32 (!%p690_p12), 48, %s696_s11  ;;  %p757_p13 = scmp.lt.s32.totalorder (!%p690_p12), %s4845_s14, 191 }
  0xf7   : > { %s6827_s26 = smul.u32 (!%p690_p12), 768, %s703_s12  ;;  %p770_p0 = scmp.eq.s32.totalorder (!%p690_p12), %s7027_s20, 0 }
  0xf8   : > { %p771_p1 = scmp.eq.s32.totalorder (!%p690_p12), %s7023_s19, 0  ;;  %s7573_s7 = scalar_lea.vmem (!%p690_p12), [#allocation5], %s6826_s13 }
  0xf9   : > { %s7575_s9 = scalar_lea.vmem (!%p690_p12), [#allocation6], %s6827_s26  ;;  %s7577_s17 = scalar_lea.vmem (!%p690_p12), [#allocation7], %s6827_s26 }
  0xfa   : > { %s9187_s14 = smov (!%p757_p13, %s4845_s14), 191  ;;  %p772_p2 = pnand %p771_p1, %p770_p0 }
  0xfb   : > { %s6828_s27 = smul.u32 24, %s9187_s14 }
  0xfc   : > { %775 = sbr.rel (%p772_p2) target bundleno = 282 (0x11a), region = 112 }
  0xfd   : > { %s7571_s6 = scalar_lea.vmem %s9103_s3, %s6828_s27 }
 0x101   : > { %v7041_v8 = vmov 0.0  }
 0x102   : > { %776 = vst [vmem:[#allocation4 + $0x88] sm:$0xff] %v7041_v8 }
 0x103   : > { %777 = vst [vmem:[#allocation4 + $0x8] sm:$0xff] %v7041_v8 }
 0x104   : > { %778 = vst [vmem:[#allocation4 + $0x58] sm:$0xff] %v7041_v8 }
 0x105   : > { %779 = vst [vmem:[#allocation4 + $0x50] sm:$0xff] %v7041_v8 }
 0x106   : > { %780 = vst [vmem:[#allocation4 + $0xb8] sm:$0xff] %v7041_v8 }
 0x107   : > { %781 = vst [vmem:[#allocation4] sm:$0xff] %v7041_v8 }
 0x108   : > { %782 = vst [vmem:[#allocation4 + $0xb0] sm:$0xff] %v7041_v8 }
 0x109   : > { %783 = vst [vmem:[#allocation4 + $0x98] sm:$0xff] %v7041_v8 }
 0x10a   : > { %784 = vst [vmem:[#allocation4 + $0x68] sm:$0xff] %v7041_v8 }
 0x10b   : > { %785 = vst [vmem:[#allocation4 + $0x30] sm:$0xff] %v7041_v8 }
 0x10c   : > { %786 = vst [vmem:[#allocation4 + $0x78] sm:$0xff] %v7041_v8 }
 0x10d   : > { %787 = vst [vmem:[#allocation4 + $0x40] sm:$0xff] %v7041_v8 }
 0x10e   : > { %788 = vst [vmem:[#allocation4 + $0x20] sm:$0xff] %v7041_v8 }
 0x10f   : > { %789 = vst [vmem:[#allocation4 + $0x10] sm:$0xff] %v7041_v8 }
 0x110   : > { %790 = vst [vmem:[#allocation4 + $0x28] sm:$0xff] %v7041_v8 }
 0x111   : > { %791 = vst [vmem:[#allocation4 + $0xa8] sm:$0xff] %v7041_v8 }
 0x112   : > { %792 = vst [vmem:[#allocation4 + $0x60] sm:$0xff] %v7041_v8 }
 0x113   : > { %793 = vst [vmem:[#allocation4 + $0x48] sm:$0xff] %v7041_v8 }
 0x114   : > { %794 = vst [vmem:[#allocation4 + $0x80] sm:$0xff] %v7041_v8 }
 0x115   : > { %795 = vst [vmem:[#allocation4 + $0xa0] sm:$0xff] %v7041_v8 }
 0x116   : > { %796 = vst [vmem:[#allocation4 + $0x18] sm:$0xff] %v7041_v8 }
 0x117   : > { %797 = vst [vmem:[#allocation4 + $0x70] sm:$0xff] %v7041_v8 }
 0x118   : > { %798 = vst [vmem:[#allocation4 + $0x90] sm:$0xff] %v7041_v8 }
 0x119   : > { %799 = vst [vmem:[#allocation4 + $0x38] sm:$0xff] %v7041_v8 }
 0x11a PF: > { %p4847_p3 = scmp.ne.s32.totalorder %s7023_s19, 0 }
 0x11c   : > { %802 = sbr.rel (%p4847_p3) target bundleno = 322 (0x142), region = 116 }
 0x121   : > { %v7042_v9 = vmov 0.0  }
 0x122   : > { %803 = vst [vmem:[#allocation2 + $0x30] sm:$0xff] %v7042_v9 }
 0x123   : > { %804 = vst [vmem:[#allocation2] sm:$0xff] %v7042_v9 }
 0x124   : > { %805 = vst [vmem:[#allocation2 + $0x58] sm:$0xff] %v7042_v9 }
 0x125   : > { %806 = vst [vmem:[#allocation2 + $0x18] sm:$0xff] %v7042_v9 }
 0x126   : > { %807 = vst [vmem:[#allocation2 + $0x50] sm:$0xff] %v7042_v9 }
 0x127   : > { %808 = vst [vmem:[#allocation2 + $0x68] sm:$0xff] %v7042_v9 }
 0x128   : > { %809 = vst [vmem:[#allocation2 + $0x8] sm:$0xff] %v7042_v9 }
 0x129   : > { %810 = vst [vmem:[#allocation2 + $0x48] sm:$0xff] %v7042_v9 }
 0x12a   : > { %811 = vst [vmem:[#allocation2 + $0x40] sm:$0xff] %v7042_v9 }
 0x12b   : > { %812 = vst [vmem:[#allocation2 + $0x20] sm:$0xff] %v7042_v9 }
 0x12c   : > { %813 = vst [vmem:[#allocation2 + $0x10] sm:$0xff] %v7042_v9 }
 0x12d   : > { %814 = vst [vmem:[#allocation2 + $0x38] sm:$0xff] %v7042_v9 }
 0x12e   : > { %815 = vst [vmem:[#allocation2 + $0x60] sm:$0xff] %v7042_v9 }
 0x12f   : > { %816 = vst [vmem:[#allocation2 + $0x70] sm:$0xff] %v7042_v9 }
 0x130   : > { %817 = vst [vmem:[#allocation2 + $0x78] sm:$0xff] %v7042_v9 }
 0x131   : > { %818 = vst [vmem:[#allocation2 + $0x28] sm:$0xff] %v7042_v9 }
 0x132   : > { %819 = vst [vmem:[#allocation3 + $0x28] sm:$0xff] %v7042_v9 }
 0x133   : > { %820 = vst [vmem:[#allocation3 + $0x68] sm:$0xff] %v7042_v9 }
 0x134   : > { %821 = vst [vmem:[#allocation3 + $0x10] sm:$0xff] %v7042_v9 }
 0x135   : > { %822 = vst [vmem:[#allocation3 + $0x40] sm:$0xff] %v7042_v9 }
 0x136   : > { %823 = vst [vmem:[#allocation3 + $0x48] sm:$0xff] %v7042_v9 }
 0x137   : > { %824 = vst [vmem:[#allocation3 + $0x30] sm:$0xff] %v7042_v9 }
 0x138   : > { %825 = vst [vmem:[#allocation3 + $0x70] sm:$0xff] %v7042_v9 }
 0x139   : > { %826 = vst [vmem:[#allocation3 + $0x38] sm:$0xff] %v7042_v9 }
 0x13a   : > { %827 = vst [vmem:[#allocation3 + $0x20] sm:$0xff] %v7042_v9 }
 0x13b   : > { %828 = vst [vmem:[#allocation3 + $0x78] sm:$0xff] %v7042_v9 }
 0x13c   : > { %829 = vst [vmem:[#allocation3 + $0x18] sm:$0xff] %v7042_v9 }
 0x13d   : > { %830 = vst [vmem:[#allocation3 + $0x58] sm:$0xff] %v7042_v9 }
 0x13e   : > { %831 = vst [vmem:[#allocation3] sm:$0xff] %v7042_v9 }
 0x13f   : > { %832 = vst [vmem:[#allocation3 + $0x8] sm:$0xff] %v7042_v9 }
 0x140   : > { %833 = vst [vmem:[#allocation3 + $0x60] sm:$0xff] %v7042_v9 }
 0x141   : > { %834 = vst [vmem:[#allocation3 + $0x50] sm:$0xff] %v7042_v9 }
 0x142 PF: > { %v4986_v10 = vld [vmem:[%s7575_s9 + $0xe0] sm:$0xf]  ;;  %v6467_v11 = vld [vmem:[%s7575_s9 + $0xec] sm:$0xf0]  ;;  %v6465_v19 = vld [vmem:[%s7575_s9 + $0xe4] sm:$0xf] }
 0x143   : > { %v5114_v12 = vld [vmem:[%s7575_s9 + $0x1e0] sm:$0xf]  ;;  %v4987_v13 = vor.u32 %v6467_v11, %v4986_v10  ;;  %v6499_v14 = vld [vmem:[%s7575_s9 + $0x1ec] sm:$0xf0]  ;;  %v4988_v20 = vld [vmem:[%s7575_s9 + $0xf0] sm:$0xf0] }
 0x144   : > { %v5242_v15 = vld [vmem:[%s7575_s9 + $0x2e0] sm:$0xf]  ;;  %v6531_v16 = vld [vmem:[%s7575_s9 + $0x2ec] sm:$0xf0]  ;;  %v5115_v17 = vor.u32 %v6499_v14, %v5114_v12  ;;  %v4991_v22 = vor.u32 %v6465_v19, %v4988_v20  ;;  %v6461_v30 = vld [vmem:[%s7575_s9 + $0xc4] sm:$0xf] }
 0x145   : > { %v5243_v18 = vor.u32 %v6531_v16, %v5242_v15  ;;  %v4970_v21 = vld [vmem:[%s7575_s9 + $0xc0] sm:$0xf]  ;;  %1467 = vmatpush.bf16.msra.mxu0 %v4987_v13  ;;  %v6463_v23 = vld [vmem:[%s7575_s9 + $0xcc] sm:$0xf0]  ;;  %v4972_v32 = vld [vmem:[%s7575_s9 + $0xd0] sm:$0xf0] }
 0x146   : > { %v5098_v24 = vld [vmem:[%s7575_s9 + $0x1c0] sm:$0xf]  ;;  %v6495_v25 = vld [vmem:[%s7575_s9 + $0x1cc] sm:$0xf0]  ;;  %1486 = vmatpush.bf16.msra.mxu1 %v5115_v17  ;;  %v4971_v26 = vor.u32 %v6463_v23, %v4970_v21  ;;  %1524 = vmatpush.bf16.msra.mxu3 %v4991_v22  ;;  %v4975_v35 = vor.u32 %v6461_v30, %v4972_v32  ;;  %v6457_v41 = vld [vmem:[%s7575_s9 + $0xa4] sm:$0xf] }
 0x147   : > { %1505 = vmatpush.bf16.msra.mxu2 %v5243_v18  ;;  %v5099_v27 = vor.u32 %v6495_v25, %v5098_v24  ;;  %v5226_v28 = vld [vmem:[%s7575_s9 + $0x2c0] sm:$0xf]  ;;  %v6527_v29 = vld [vmem:[%s7575_s9 + $0x2cc] sm:$0xf0]  ;;  %v4956_v42 = vld [vmem:[%s7575_s9 + $0xb0] sm:$0xf0] }
 0x148   : > { %v5227_v31 = vor.u32 %v6527_v29, %v5226_v28  ;;  %v4954_v33 = vld [vmem:[%s7575_s9 + $0xa0] sm:$0xf]  ;;  %v6459_v34 = vld [vmem:[%s7575_s9 + $0xac] sm:$0xf0]  ;;  %v4959_v48 = vor.u32 %v6457_v41, %v4956_v42  ;;  %v6453_v52 = vld [vmem:[%s7575_s9 + $0x84] sm:$0xf] }
 0x149   : > { %v5082_v36 = vld [vmem:[%s7575_s9 + $0x1a0] sm:$0xf]  ;;  %v6491_v37 = vld [vmem:[%s7575_s9 + $0x1ac] sm:$0xf0]  ;;  %1468 = vmatpush.bf16.msra.mxu0 %v4971_v26  ;;  %v4955_v39 = vor.u32 %v6459_v34, %v4954_v33  ;;  %v4940_v53 = vld [vmem:[%s7575_s9 + $0x90] sm:$0xf0] }
 0x14a   : > { %v5210_v38 = vld [vmem:[%s7575_s9 + $0x2a0] sm:$0xf]  ;;  %v6523_v40 = vld [vmem:[%s7575_s9 + $0x2ac] sm:$0xf0]  ;;  %1487 = vmatpush.bf16.msra.mxu1 %v5099_v27  ;;  %v5083_v43 = vor.u32 %v6491_v37, %v5082_v36  ;;  %1525 = vmatpush.bf16.msra.mxu3 %v4975_v35  ;;  %v4943_v60 = vor.u32 %v6453_v52, %v4940_v53  ;;  %v6449_v0 = vld [vmem:[%s7575_s9 + $0x64] sm:$0xf] }
 0x14b   : > { %1506 = vmatpush.bf16.msra.mxu2 %v5227_v31  ;;  %v5211_v44 = vor.u32 %v6523_v40, %v5210_v38  ;;  %v4938_v45 = vld [vmem:[%s7575_s9 + $0x80] sm:$0xf]  ;;  %v6455_v46 = vld [vmem:[%s7575_s9 + $0x8c] sm:$0xf0]  ;;  %v4924_v1 = vld [vmem:[%s7575_s9 + $0x70] sm:$0xf0] }
 0x14c   : > { %v5066_v47 = vld [vmem:[%s7575_s9 + $0x180] sm:$0xf]  ;;  %v6487_v49 = vld [vmem:[%s7575_s9 + $0x18c] sm:$0xf0]  ;;  %v4939_v54 = vor.u32 %v6455_v46, %v4938_v45  ;;  %v4927_v8 = vor.u32 %v6449_v0, %v4924_v1  ;;  %v6445_v12 = vld [vmem:[%s7575_s9 + $0x44] sm:$0xf] }
 0x14d   : > { %v5194_v50 = vld [vmem:[%s7575_s9 + $0x280] sm:$0xf]  ;;  %v6519_v51 = vld [vmem:[%s7575_s9 + $0x28c] sm:$0xf0]  ;;  %1469 = vmatpush.bf16.msra.mxu0 %v4955_v39  ;;  %v5067_v55 = vor.u32 %v6487_v49, %v5066_v47  ;;  %v4908_v13 = vld [vmem:[%s7575_s9 + $0x50] sm:$0xf0] }
 0x14e   : > { %1488 = vmatpush.bf16.msra.mxu1 %v5083_v43  ;;  %v5195_v56 = vor.u32 %v6519_v51, %v5194_v50  ;;  %v4922_v57 = vld [vmem:[%s7575_s9 + $0x60] sm:$0xf]  ;;  %v6451_v58 = vld [vmem:[%s7575_s9 + $0x6c] sm:$0xf0]  ;;  %1526 = vmatpush.bf16.msra.mxu3 %v4959_v48  ;;  %v4911_v20 = vor.u32 %v6445_v12, %v4908_v13  ;;  %v6441_v24 = vld [vmem:[%s7575_s9 + $0x24] sm:$0xf] }
 0x14f   : > { %1507 = vmatpush.bf16.msra.mxu2 %v5211_v44  ;;  %v5050_v59 = vld [vmem:[%s7575_s9 + $0x160] sm:$0xf]  ;;  %v6483_v61 = vld [vmem:[%s7575_s9 + $0x16c] sm:$0xf0]  ;;  %v4923_v2 = vor.u32 %v6451_v58, %v4922_v57  ;;  %v4892_v25 = vld [vmem:[%s7575_s9 + $0x30] sm:$0xf0] }
 0x150   : > { %v5178_v62 = vld [vmem:[%s7575_s9 + $0x260] sm:$0xf]  ;;  %v6515_v63 = vld [vmem:[%s7575_s9 + $0x26c] sm:$0xf0]  ;;  %v5051_v3 = vor.u32 %v6483_v61, %v5050_v59  ;;  %v4895_v35 = vor.u32 %v6441_v24, %v4892_v25  ;;  %v6437_v36 = vld [vmem:[%s7575_s9 + $0x4] sm:$0xf] }
 0x151   : > { %1470 = vmatpush.bf16.msra.mxu0 %v4939_v54  ;;  %v5179_v4 = vor.u32 %v6515_v63, %v5178_v62  ;;  %v4906_v5 = vld [vmem:[%s7575_s9 + $0x40] sm:$0xf]  ;;  %v6447_v6 = vld [vmem:[%s7575_s9 + $0x4c] sm:$0xf0]  ;;  %v4876_v37 = vld [vmem:[%s7575_s9 + $0x10] sm:$0xf0] }
 0x152   : > { %1489 = vmatpush.bf16.msra.mxu1 %v5067_v55  ;;  %v5034_v7 = vld [vmem:[%s7575_s9 + $0x140] sm:$0xf]  ;;  %1527 = vmatpush.bf16.msra.mxu3 %v4943_v60  ;;  %v6479_v9 = vld [vmem:[%s7575_s9 + $0x14c] sm:$0xf0]  ;;  %v4907_v14 = vor.u32 %v6447_v6, %v4906_v5  ;;  %v6432_v39 = vld [vmem:[%s7573_s7 + $0x8] sm:$0xf0]  ;;  %v4879_v51 = vor.u32 %v6437_v36, %v4876_v37 }
 0x153   : > { %1508 = vmatpush.bf16.msra.mxu2 %v5195_v56  ;;  %v5162_v10 = vld [vmem:[%s7575_s9 + $0x240] sm:$0xf]  ;;  %v6511_v11 = vld [vmem:[%s7575_s9 + $0x24c] sm:$0xf0]  ;;  %v5035_v15 = vor.u32 %v6479_v9, %v5034_v7  ;;  %v4994_v40 = vld [vmem:[%s7575_s9 + $0xe8] sm:$0xf] }
 0x154   : > { %v5163_v16 = vor.u32 %v6511_v11, %v5162_v10  ;;  %v4890_v17 = vld [vmem:[%s7575_s9 + $0x20] sm:$0xf]  ;;  %v6443_v18 = vld [vmem:[%s7575_s9 + $0x2c] sm:$0xf0]  ;;  %v6468_v41 = vld [vmem:[%s7575_s9 + $0xf4] sm:$0xf0] }
 0x155   : > { %1471 = vmatpush.bf16.msra.mxu0 %v4923_v2  ;;  %v5018_v19 = vld [vmem:[%s7575_s9 + $0x120] sm:$0xf]  ;;  %v6475_v21 = vld [vmem:[%s7575_s9 + $0x12c] sm:$0xf0]  ;;  %v4891_v26 = vor.u32 %v6443_v18, %v4890_v17  ;;  %v6431_v43 = vld [vmem:[%s7573_s7 + $0x4] sm:$0xf]  ;;  %v4995_v52 = vor.u32 %v6468_v41, %v4994_v40 }
 0x156   : > { %1490 = vmatpush.bf16.msra.mxu1 %v5051_v3  ;;  %1528 = vmatpush.bf16.msra.mxu3 %v4927_v8  ;;  %v5146_v22 = vld [vmem:[%s7575_s9 + $0x220] sm:$0xf]  ;;  %v6507_v23 = vld [vmem:[%s7575_s9 + $0x22c] sm:$0xf0]  ;;  %v5019_v30 = vor.u32 %v6475_v21, %v5018_v19  ;;  %v6529_v44 = vld [vmem:[%s7575_s9 + $0x2e4] sm:$0xf] }
 0x157   : > { %1509 = vmatpush.bf16.msra.mxu2 %v5179_v4  ;;  %v4874_v27 = vld [vmem:[%s7575_s9] sm:$0xf]  ;;  %v6439_v28 = vld [vmem:[%s7575_s9 + $0xc] sm:$0xf0]  ;;  %v5147_v31 = vor.u32 %v6507_v23, %v5146_v22  ;;  %v5244_v45 = vld [vmem:[%s7575_s9 + $0x2f0] sm:$0xf0] }
 0x158   : > { %v5002_v29 = vld [vmem:[%s7575_s9 + $0x100] sm:$0xf]  ;;  %v6471_v32 = vld [vmem:[%s7575_s9 + $0x10c] sm:$0xf0]  ;;  %v4875_v42 = vor.u32 %v6439_v28, %v4874_v27  ;;  %v4858_v49 = vld [vmem:[%s7573_s7 + $0x8] sm:$0xf]  ;;  %v5247_v57 = vor.u32 %v6529_v44, %v5244_v45 }
 0x159   : > { %1472 = vmatpush.bf16.msra.mxu0 %v4907_v14  ;;  %v5130_v33 = vld [vmem:[%s7575_s9 + $0x200] sm:$0xf]  ;;  %v6503_v34 = vld [vmem:[%s7575_s9 + $0x20c] sm:$0xf0]  ;;  %v5003_v46 = vor.u32 %v6471_v32, %v5002_v29  ;;  %v6433_v50 = vld [vmem:[%s7573_s7 + $0x10] sm:$0xf0] }
 0x15a   : > { %1491 = vmatpush.bf16.msra.mxu1 %v5035_v15  ;;  %1529 = vmatpush.bf16.msra.mxu3 %v4911_v20  ;;  %v4850_v38 = vld [vmem:[%s7573_s7] sm:$0xf]  ;;  %v5131_v47 = vor.u32 %v6503_v34, %v5130_v33  ;;  %v4852_v48 = vld [vmem:[%s7573_s7 + $0xc] sm:$0xf0]  ;;  %v6497_v53 = vld [vmem:[%s7575_s9 + $0x1e4] sm:$0xf]  ;;  %v7664_v62 = vor.u32 %v6433_v50, %v4858_v49 }
 0x15b   : > { %1510 = vmatpush.bf16.msra.mxu2 %v5163_v16  ;;  %v5116_v54 = vld [vmem:[%s7575_s9 + $0x1f0] sm:$0xf0]  ;;  %v5122_v55 = vld [vmem:[%s7575_s9 + $0x1e8] sm:$0xf]  ;;  %v7657_v56 = vor.u32 %v6432_v39, %v4850_v38  ;;  %v6500_v58 = vld [vmem:[%s7575_s9 + $0x1f4] sm:$0xf0]  ;;  %v7662_v61 = vor.u32 %v6431_v43, %v4852_v48 }
 0x15c   : > { %v4978_v59 = vld [vmem:[%s7575_s9 + $0xc8] sm:$0xf]  ;;  %v6464_v60 = vld [vmem:[%s7575_s9 + $0xd4] sm:$0xf0]  ;;  %v6525_v63 = vld [vmem:[%s7575_s9 + $0x2c4] sm:$0xf]  ;;  %v5119_v1 = vor.u32 %v6497_v53, %v5116_v54  ;;  %v5123_v2 = vor.u32 %v6500_v58, %v5122_v55 }
 0x15d   : > { %1473 = vmatpush.bf16.msra.mxu0 %v4891_v26  ;;  %v5228_v0 = vld [vmem:[%s7575_s9 + $0x2d0] sm:$0xf0]  ;;  %v4979_v3 = vor.u32 %v6464_v60, %v4978_v59  ;;  %v6493_v4 = vld [vmem:[%s7575_s9 + $0x1c4] sm:$0xf]  ;;  %v5106_v6 = vld [vmem:[%s7575_s9 + $0x1c8] sm:$0xf] }
 0x15e   : > { %1492 = vmatpush.bf16.msra.mxu1 %v5019_v30  ;;  %1530 = vmatpush.bf16.msra.mxu3 %v4895_v35  ;;  %v5100_v5 = vld [vmem:[%s7575_s9 + $0x1d0] sm:$0xf0]  ;;  %v5231_v7 = vor.u32 %v6525_v63, %v5228_v0  ;;  %v6496_v8 = vld [vmem:[%s7575_s9 + $0x1d4] sm:$0xf0]  ;;  %v4962_v9 = vld [vmem:[%s7575_s9 + $0xa8] sm:$0xf] }
 0x15f   : > { %1511 = vmatpush.bf16.msra.mxu2 %v5147_v31  ;;  %v6460_v10 = vld [vmem:[%s7575_s9 + $0xb4] sm:$0xf0]  ;;  %v6521_v11 = vld [vmem:[%s7575_s9 + $0x2a4] sm:$0xf]  ;;  %v5212_v12 = vld [vmem:[%s7575_s9 + $0x2b0] sm:$0xf0]  ;;  %v5103_v13 = vor.u32 %v6493_v4, %v5100_v5  ;;  %v5107_v14 = vor.u32 %v6496_v8, %v5106_v6 }
 0x160   : > { %v4963_v15 = vor.u32 %v6460_v10, %v4962_v9  ;;  %v6489_v16 = vld [vmem:[%s7575_s9 + $0x1a4] sm:$0xf]  ;;  %v5084_v17 = vld [vmem:[%s7575_s9 + $0x1b0] sm:$0xf0]  ;;  %v5090_v18 = vld [vmem:[%s7575_s9 + $0x1a8] sm:$0xf]  ;;  %v5215_v19 = vor.u32 %v6521_v11, %v5212_v12 }
 0x161   : > { %1474 = vmatpush.bf16.msra.mxu0 %v4875_v42  ;;  %v6492_v20 = vld [vmem:[%s7575_s9 + $0x1b4] sm:$0xf0]  ;;  %v4946_v21 = vld [vmem:[%s7575_s9 + $0x88] sm:$0xf]  ;;  %v6517_v23 = vld [vmem:[%s7575_s9 + $0x284] sm:$0xf]  ;;  %v5087_v25 = vor.u32 %v6489_v16, %v5084_v17 }
 0x162   : > { %1493 = vmatpush.bf16.msra.mxu1 %v5003_v46  ;;  %1531 = vmatpush.bf16.msra.mxu3 %v4879_v51  ;;  %v6456_v22 = vld [vmem:[%s7575_s9 + $0x94] sm:$0xf0]  ;;  %v5196_v24 = vld [vmem:[%s7575_s9 + $0x290] sm:$0xf0]  ;;  %v6485_v26 = vld [vmem:[%s7575_s9 + $0x184] sm:$0xf]  ;;  %v5091_v28 = vor.u32 %v6492_v20, %v5090_v18 }
 0x163   : > { %1512 = vmatpush.bf16.msra.mxu2 %v5131_v47  ;;  %v5068_v27 = vld [vmem:[%s7575_s9 + $0x190] sm:$0xf0]  ;;  %v4947_v29 = vor.u32 %v6456_v22, %v4946_v21  ;;  %v5074_v30 = vld [vmem:[%s7575_s9 + $0x188] sm:$0xf]  ;;  %v6488_v31 = vld [vmem:[%s7575_s9 + $0x194] sm:$0xf0]  ;;  %v5199_v33 = vor.u32 %v6517_v23, %v5196_v24 }
 0x164   : > { %1475 = vmatmul.bf16.vlgmr.msra.gmra.mxu0 %v7657_v56  ;;  %v4862_v32 = vld [vmem:[%s7573_s7 + $0x18] sm:$0xf]  ;;  %v6435_v34 = vld [vmem:[%s7573_s7 + $0x20] sm:$0xf0]  ;;  %v6434_v37 = vld [vmem:[%s7573_s7 + $0x1c] sm:$0xf]  ;;  %v5071_v40 = vor.u32 %v6485_v26, %v5068_v27  ;;  %v5075_v44 = vor.u32 %v6488_v31, %v5074_v30 }
 0x165   : > { %1494 = vmatmul.bf16.vlgmr.msra.gmra.mxu1 %v7662_v61  ;;  %1532 = vmatmul.bf16.vlgmr.msra.gmra.mxu3 %v7657_v56  ;;  %v4930_v35 = vld [vmem:[%s7575_s9 + $0x68] sm:$0xf]  ;;  %v6452_v36 = vld [vmem:[%s7575_s9 + $0x74] sm:$0xf0]  ;;  %v6513_v38 = vld [vmem:[%s7575_s9 + $0x264] sm:$0xf]  ;;  %v7705_v49 = vor.u32 %v6435_v34, %v4862_v32 }
 0x166   : > { %1562 = vmatpush.bf16.msrb.mxu1 %v5247_v57  ;;  %1513 = vmatmul.bf16.vlgmr.msra.gmra.mxu2 %v7664_v62  ;;  %v5180_v39 = vld [vmem:[%s7575_s9 + $0x270] sm:$0xf0]  ;;  %v4864_v41 = vld [vmem:[%s7573_s7 + $0x24] sm:$0xf0]  ;;  %v4870_v42 = vld [vmem:[%s7573_s7 + $0x20] sm:$0xf]  ;;  %v4931_v45 = vor.u32 %v6452_v36, %v4930_v35 }
 0x167   : > { %1581 = vmatpush.bf16.msrb.mxu2 %v4995_v52  ;;  %1543 = vmatpush.bf16.msrb.mxu0 %v5119_v1  ;;  %v6436_v43 = vld [vmem:[%s7573_s7 + $0x28] sm:$0xf0]  ;;  %v6481_v46 = vld [vmem:[%s7575_s9 + $0x164] sm:$0xf]  ;;  %v5052_v47 = vld [vmem:[%s7575_s9 + $0x170] sm:$0xf0]  ;;  %v5183_v50 = vor.u32 %v6513_v38, %v5180_v39  ;;  %v7710_v54 = vor.u32 %v6434_v37, %v4864_v41 }
 0x168   : > { %1600 = vmatpush.bf16.msrb.mxu3 %v5123_v2  ;;  %v5058_v48 = vld [vmem:[%s7575_s9 + $0x168] sm:$0xf]  ;;  %v6484_v51 = vld [vmem:[%s7575_s9 + $0x174] sm:$0xf0]  ;;  %v7712_v55 = vor.u32 %v6436_v43, %v4870_v42  ;;  %v6509_v57 = vld [vmem:[%s7575_s9 + $0x244] sm:$0xf]  ;;  %v5055_v59 = vor.u32 %v6481_v46, %v5052_v47 }
 0x169   : > { %v4914_v52 = vld [vmem:[%s7575_s9 + $0x48] sm:$0xf]  ;;  %v6448_v53 = vld [vmem:[%s7575_s9 + $0x54] sm:$0xf0]  ;;  %v5164_v58 = vld [vmem:[%s7575_s9 + $0x250] sm:$0xf0]  ;;  %v5059_v60 = vor.u32 %v6484_v51, %v5058_v48 }
 0x16a   : > { %1563 = vmatpush.bf16.msrb.mxu1 %v5231_v7  ;;  %v4915_v63 = vor.u32 %v6448_v53, %v4914_v52  ;;  %v6477_v0 = vld [vmem:[%s7575_s9 + $0x144] sm:$0xf]  ;;  %v5036_v1 = vld [vmem:[%s7575_s9 + $0x150] sm:$0xf0]  ;;  %v5042_v2 = vld [vmem:[%s7575_s9 + $0x148] sm:$0xf] }
 0x16b   : > { %1582 = vmatpush.bf16.msrb.mxu2 %v4979_v3  ;;  %1544 = vmatpush.bf16.msrb.mxu0 %v5103_v13  ;;  %v5167_v3 = vor.u32 %v6509_v57, %v5164_v58  ;;  %v6480_v4 = vld [vmem:[%s7575_s9 + $0x154] sm:$0xf0]  ;;  %v4898_v5 = vld [vmem:[%s7575_s9 + $0x28] sm:$0xf]  ;;  %v6505_v7 = vld [vmem:[%s7575_s9 + $0x224] sm:$0xf]  ;;  %v5039_v9 = vor.u32 %v6477_v0, %v5036_v1 }
 0x16c   : > { %1601 = vmatpush.bf16.msrb.mxu3 %v5107_v14  ;;  %v6444_v6 = vld [vmem:[%s7575_s9 + $0x34] sm:$0xf0]  ;;  %v5148_v8 = vld [vmem:[%s7575_s9 + $0x230] sm:$0xf0]  ;;  %v6473_v10 = vld [vmem:[%s7575_s9 + $0x124] sm:$0xf]  ;;  %v5043_v11 = vor.u32 %v6480_v4, %v5042_v2 }
 0x16d   : > { %v4899_v12 = vor.u32 %v6444_v6, %v4898_v5  ;;  %v5020_v13 = vld [vmem:[%s7575_s9 + $0x130] sm:$0xf0]  ;;  %v5026_v14 = vld [vmem:[%s7575_s9 + $0x128] sm:$0xf]  ;;  %v5151_v16 = vor.u32 %v6505_v7, %v5148_v8  ;;  %v6440_v18 = vld [vmem:[%s7575_s9 + $0x14] sm:$0xf0] }
 0x16e   : > { %1564 = vmatpush.bf16.msrb.mxu1 %v5215_v19  ;;  %v4882_v17 = vld [vmem:[%s7575_s9 + $0x8] sm:$0xf]  ;;  %v6501_v19 = vld [vmem:[%s7575_s9 + $0x204] sm:$0xf]  ;;  %v5132_v20 = vld [vmem:[%s7575_s9 + $0x210] sm:$0xf0]  ;;  %v5023_v23 = vor.u32 %v6473_v10, %v5020_v13 }
 0x16f   : > { %1583 = vmatpush.bf16.msrb.mxu2 %v4963_v15  ;;  %1545 = vmatpush.bf16.msrb.mxu0 %v5087_v25  ;;  %v6476_v15 = vld [vmem:[%s7575_s9 + $0x134] sm:$0xf0]  ;;  %v6498_v21 = vld [vmem:[%s7575_s9 + $0x1ec] sm:$0xf]  ;;  %v5124_v22 = vld [vmem:[%s7575_s9 + $0x1f8] sm:$0xf0]  ;;  %v5135_v32 = vor.u32 %v6501_v19, %v5132_v20 }
 0x170   : > { %1602 = vmatpush.bf16.msrb.mxu3 %v5091_v28  ;;  %v6469_v24 = vld [vmem:[%s7575_s9 + $0x104] sm:$0xf]  ;;  %v6466_v25 = vld [vmem:[%s7575_s9 + $0xec] sm:$0xf]  ;;  %v4996_v26 = vld [vmem:[%s7575_s9 + $0xf8] sm:$0xf0]  ;;  %v5027_v27 = vor.u32 %v6476_v15, %v5026_v14  ;;  %v4883_v28 = vor.u32 %v6440_v18, %v4882_v17 }
 0x171   : > { %v5010_v30 = vld [vmem:[%s7575_s9 + $0x108] sm:$0xf]  ;;  %v6472_v31 = vld [vmem:[%s7575_s9 + $0x114] sm:$0xf0]  ;;  %v6530_v36 = vld [vmem:[%s7575_s9 + $0x2ec] sm:$0xf]  ;;  %v4999_v37 = vor.u32 %v6466_v25, %v4996_v26 }
 0x172   : > { %1565 = vmatpush.bf16.msrb.mxu1 %v5199_v33  ;;  %v5127_v33 = vor.u32 %v6498_v21, %v5124_v22  ;;  %v5250_v34 = vld [vmem:[%s7575_s9 + $0x2e8] sm:$0xf]  ;;  %v6532_v35 = vld [vmem:[%s7575_s9 + $0x2f4] sm:$0xf0]  ;;  %v5252_v38 = vld [vmem:[%s7575_s9 + $0x2f8] sm:$0xf0]  ;;  %v5011_v42 = vor.u32 %v6472_v31, %v5010_v30 }
 0x173   : > { %1584 = vmatpush.bf16.msrb.mxu2 %v4947_v29  ;;  %1546 = vmatpush.bf16.msrb.mxu0 %v5071_v40  ;;  %v5004_v29 = vld [vmem:[%s7575_s9 + $0x110] sm:$0xf0]  ;;  %v6494_v39 = vld [vmem:[%s7575_s9 + $0x1cc] sm:$0xf]  ;;  %v5108_v40 = vld [vmem:[%s7575_s9 + $0x1d8] sm:$0xf0]  ;;  %v5251_v43 = vor.u32 %v6532_v35, %v5250_v34  ;;  %v5255_v46 = vor.u32 %v6530_v36, %v5252_v38 }
 0x174   : > { %1603 = vmatpush.bf16.msrb.mxu3 %v5075_v44  ;;  %1480 = vmatmul.bf16.gmra.mxu0 %v7705_v49  ;;  %v5007_v41 = vor.u32 %v6469_v24, %v5004_v29  ;;  %v5234_v44 = vld [vmem:[%s7575_s9 + $0x2c8] sm:$0xf]  ;;  %v5111_v47 = vor.u32 %v6494_v39, %v5108_v40  ;;  %v6462_v48 = vld [vmem:[%s7575_s9 + $0xcc] sm:$0xf]  ;;  %v5236_v52 = vld [vmem:[%s7575_s9 + $0x2d8] sm:$0xf0] }
 0x175   : > { %1499 = vmatmul.bf16.gmra.mxu1 %v7710_v54  ;;  %1537 = vmatmul.bf16.gmra.mxu3 %v7705_v49  ;;  %v6526_v51 = vld [vmem:[%s7575_s9 + $0x2cc] sm:$0xf]  ;;  %v5092_v57 = vld [vmem:[%s7575_s9 + $0x1b8] sm:$0xf0]  ;;  %v5202_v10 = vld [vmem:[%s7575_s9 + $0x288] sm:$0xf] }
 0x176   : > { %1566 = vmatpush.bf16.msrb.mxu1 %v5183_v50  ;;  %1518 = vmatmul.bf16.gmra.mxu2 %v7712_v55  ;;  %v4980_v50 = vld [vmem:[%s7575_s9 + $0xd8] sm:$0xf0]  ;;  %v6490_v53 = vld [vmem:[%s7575_s9 + $0x1ac] sm:$0xf]  ;;  %v5239_v0 = vor.u32 %v6526_v51, %v5236_v52  ;;  %v5186_v22 = vld [vmem:[%s7575_s9 + $0x268] sm:$0xf] }
 0x177   : > { %1585 = vmatpush.bf16.msrb.mxu2 %v4931_v45  ;;  %1547 = vmatpush.bf16.msrb.mxu0 %v5055_v59  ;;  %v6528_v45 = vld [vmem:[%s7575_s9 + $0x2d4] sm:$0xf0]  ;;  %v4983_v59 = vor.u32 %v6462_v48, %v4980_v50  ;;  %v5095_v1 = vor.u32 %v6490_v53, %v5092_v57  ;;  %v6458_v2 = vld [vmem:[%s7575_s9 + $0xac] sm:$0xf]  ;;  %v5220_v5 = vld [vmem:[%s7575_s9 + $0x2b8] sm:$0xf0] }
 0x178   : > { %1604 = vmatpush.bf16.msrb.mxu3 %v5059_v60  ;;  %v5235_v58 = vor.u32 %v6528_v45, %v5234_v44  ;;  %v5218_v60 = vld [vmem:[%s7575_s9 + $0x2a8] sm:$0xf]  ;;  %v6522_v4 = vld [vmem:[%s7575_s9 + $0x2ac] sm:$0xf]  ;;  %v5076_v7 = vld [vmem:[%s7575_s9 + $0x198] sm:$0xf0] }
 0x179   : > { %v6486_v6 = vld [vmem:[%s7575_s9 + $0x18c] sm:$0xf]  ;;  %v4948_v15 = vld [vmem:[%s7575_s9 + $0x98] sm:$0xf0]  ;;  %v5170_v34 = vld [vmem:[%s7575_s9 + $0x248] sm:$0xf] }
 0x17a   : > { %1567 = vmatpush.bf16.msrb.mxu1 %v5167_v3  ;;  %v4964_v3 = vld [vmem:[%s7575_s9 + $0xb8] sm:$0xf0]  ;;  %v5079_v13 = vor.u32 %v6486_v6, %v5076_v7  ;;  %v6454_v14 = vld [vmem:[%s7575_s9 + $0x8c] sm:$0xf]  ;;  %v6512_v35 = vld [vmem:[%s7575_s9 + $0x254] sm:$0xf0] }
 0x17b   : > { %1586 = vmatpush.bf16.msrb.mxu2 %v4915_v63  ;;  %1548 = vmatpush.bf16.msrb.mxu0 %v5039_v9  ;;  %v6524_v63 = vld [vmem:[%s7575_s9 + $0x2b4] sm:$0xf0]  ;;  %v4967_v9 = vor.u32 %v6458_v2, %v4964_v3  ;;  %v5204_v17 = vld [vmem:[%s7575_s9 + $0x298] sm:$0xf0]  ;;  %v6482_v18 = vld [vmem:[%s7575_s9 + $0x16c] sm:$0xf]  ;;  %v4951_v21 = vor.u32 %v6454_v14, %v4948_v15  ;;  %v5171_v44 = vor.u32 %v6512_v35, %v5170_v34 }
 0x17c   : > { %1605 = vmatpush.bf16.msrb.mxu3 %v5043_v11  ;;  %v5219_v8 = vor.u32 %v6524_v63, %v5218_v60  ;;  %v6520_v11 = vld [vmem:[%s7575_s9 + $0x294] sm:$0xf0]  ;;  %v5060_v19 = vld [vmem:[%s7575_s9 + $0x178] sm:$0xf0]  ;;  %v6450_v26 = vld [vmem:[%s7575_s9 + $0x6c] sm:$0xf] }
 0x17d   : > { %v5203_v20 = vor.u32 %v6520_v11, %v5202_v10  ;;  %v5063_v25 = vor.u32 %v6482_v18, %v5060_v19  ;;  %v5188_v29 = vld [vmem:[%s7575_s9 + $0x278] sm:$0xf0]  ;;  %v6478_v30 = vld [vmem:[%s7575_s9 + $0x14c] sm:$0xf]  ;;  %v5626_v60 = vld [vmem:[%s7577_s17 + $0x2e0] sm:$0xf] }
 0x17e   : > { %1568 = vmatpush.bf16.msrb.mxu1 %v5151_v16  ;;  %v6518_v16 = vld [vmem:[%s7575_s9 + $0x28c] sm:$0xf]  ;;  %v5044_v31 = vld [vmem:[%s7575_s9 + $0x158] sm:$0xf0]  ;;  %v6627_v63 = vld [vmem:[%s7577_s17 + $0x2ec] sm:$0xf0] }
 0x17f   : > { %1587 = vmatpush.bf16.msrb.mxu2 %v4899_v12  ;;  %1549 = vmatpush.bf16.msrb.mxu0 %v5023_v23  ;;  %v5223_v12 = vor.u32 %v6522_v4, %v5220_v5  ;;  %v6516_v23 = vld [vmem:[%s7575_s9 + $0x274] sm:$0xf0]  ;;  %v5207_v24 = vor.u32 %v6518_v16, %v5204_v17  ;;  %v6446_v38 = vld [vmem:[%s7575_s9 + $0x4c] sm:$0xf]  ;;  %v4916_v39 = vld [vmem:[%s7575_s9 + $0x58] sm:$0xf0]  ;;  %v5627_v10 = vor.u32 %v6627_v63, %v5626_v60 }
 0x180   : > { %1606 = vmatpush.bf16.msrb.mxu3 %v5027_v27  ;;  %v4932_v27 = vld [vmem:[%s7575_s9 + $0x78] sm:$0xf0]  ;;  %v6510_v40 = vld [vmem:[%s7575_s9 + $0x24c] sm:$0xf]  ;;  %v4919_v45 = vor.u32 %v6446_v38, %v4916_v39  ;;  %v5138_v2 = vld [vmem:[%s7575_s9 + $0x208] sm:$0xf] }
 0x181   : > { %v6442_v51 = vld [vmem:[%s7575_s9 + $0x2c] sm:$0xf]  ;;  %v4900_v52 = vld [vmem:[%s7575_s9 + $0x38] sm:$0xf0]  ;;  %v6504_v3 = vld [vmem:[%s7575_s9 + $0x214] sm:$0xf0] }
 0x182   : > { %1569 = vmatpush.bf16.msrb.mxu1 %v5135_v32  ;;  %v5187_v32 = vor.u32 %v6516_v23, %v5186_v22  ;;  %v6506_v53 = vld [vmem:[%s7575_s9 + $0x22c] sm:$0xf]  ;;  %v5156_v57 = vld [vmem:[%s7575_s9 + $0x238] sm:$0xf0]  ;;  %v5370_v11 = vld [vmem:[%s7577_s17 + $0xe0] sm:$0xf]  ;;  %v5139_v17 = vor.u32 %v6504_v3, %v5138_v2 }
 0x183   : > { %1588 = vmatpush.bf16.msrb.mxu2 %v4883_v28  ;;  %1550 = vmatpush.bf16.msrb.mxu0 %v5007_v41  ;;  %v6514_v28 = vld [vmem:[%s7575_s9 + $0x26c] sm:$0xf]  ;;  %v5172_v41 = vld [vmem:[%s7575_s9 + $0x258] sm:$0xf0]  ;;  %v5159_v5 = vor.u32 %v6506_v53, %v5156_v57  ;;  %v6595_v14 = vld [vmem:[%s7577_s17 + $0x1ec] sm:$0xf0] }
 0x184   : > { %1607 = vmatpush.bf16.msrb.mxu3 %v5011_v42  ;;  %v5191_v36 = vor.u32 %v6514_v28, %v5188_v29  ;;  %v6474_v42 = vld [vmem:[%s7575_s9 + $0x12c] sm:$0xf]  ;;  %v5175_v48 = vor.u32 %v6510_v40, %v5172_v41  ;;  %v4884_v7 = vld [vmem:[%s7575_s9 + $0x18] sm:$0xf0]  ;;  %v6561_v15 = vld [vmem:[%s7577_s17 + $0xe4] sm:$0xf] }
 0x185   : > { %1570 = vmatmul.bf16.vlgmr.msrb.gmra.mxu1 %v7664_v62  ;;  %v6438_v4 = vld [vmem:[%s7575_s9 + $0xc] sm:$0xf]  ;;  %v5372_v16 = vld [vmem:[%s7577_s17 + $0xf0] sm:$0xf0]  ;;  %v5610_v19 = vld [vmem:[%s7577_s17 + $0x2c0] sm:$0xf] }
 0x186   : > { %1638 = vmatpush.bf16.msra.mxu1 %v4999_v37  ;;  %1551 = vmatmul.bf16.vlgmr.msrb.gmra.mxu0 %v7662_v61  ;;  %v5047_v37 = vor.u32 %v6478_v30, %v5044_v31  ;;  %v4887_v18 = vor.u32 %v6438_v4, %v4884_v7  ;;  %v5482_v28 = vld [vmem:[%s7577_s17 + $0x1c0] sm:$0xf]  ;;  %v6591_v29 = vld [vmem:[%s7577_s17 + $0x1cc] sm:$0xf0]  ;;  %v6557_v31 = vld [vmem:[%s7577_s17 + $0xc4] sm:$0xf] }
 0x187   : > { %1657 = vmatpush.bf16.msra.mxu2 %v5127_v33  ;;  %1619 = vmatpush.bf16.msra.mxu0 %v5251_v43  ;;  %v4935_v33 = vor.u32 %v6450_v26, %v4932_v27  ;;  %v5028_v43 = vld [vmem:[%s7575_s9 + $0x138] sm:$0xf0]  ;;  %v6559_v26 = vld [vmem:[%s7577_s17 + $0xcc] sm:$0xf0]  ;;  %v5338_v35 = vld [vmem:[%s7577_s17 + $0xa0] sm:$0xf] }
 0x188   : > { %1676 = vmatpush.bf16.msra.mxu3 %v5255_v46  ;;  %1589 = vmatmul.bf16.vlgmr.msrb.gmra.mxu2 %v7657_v56  ;;  %v5154_v46 = vld [vmem:[%s7575_s9 + $0x228] sm:$0xf]  ;;  %v5031_v50 = vor.u32 %v6474_v42, %v5028_v43  ;;  %v6619_v34 = vld [vmem:[%s7577_s17 + $0x2ac] sm:$0xf0]  ;;  %v5466_v39 = vld [vmem:[%s7577_s17 + $0x1a0] sm:$0xf] }
 0x189   : > { %1608 = vmatmul.bf16.vlgmr.msrb.gmra.mxu3 %v7662_v61  ;;  %v6587_v40 = vld [vmem:[%s7577_s17 + $0x1ac] sm:$0xf0]  ;;  %v6553_v43 = vld [vmem:[%s7577_s17 + $0xa4] sm:$0xf]  ;;  %v5324_v60 = vld [vmem:[%s7577_s17 + $0x90] sm:$0xf0] }
 0x18a   : > { %1639 = vmatpush.bf16.msra.mxu1 %v4983_v59  ;;  %v5012_v59 = vld [vmem:[%s7575_s9 + $0x118] sm:$0xf0]  ;;  %v6583_v53 = vld [vmem:[%s7577_s17 + $0x18c] sm:$0xf0]  ;;  %v5562_v63 = vld [vmem:[%s7577_s17 + $0x260] sm:$0xf] }
 0x18b   : > { %1658 = vmatpush.bf16.msra.mxu2 %v5111_v47  ;;  %1620 = vmatpush.bf16.msra.mxu0 %v5235_v58  ;;  %v6508_v47 = vld [vmem:[%s7575_s9 + $0x234] sm:$0xf0]  ;;  %v6470_v58 = vld [vmem:[%s7575_s9 + $0x10c] sm:$0xf]  ;;  %v6547_v2 = vld [vmem:[%s7577_s17 + $0x6c] sm:$0xf0] }
 0x18c   : > { %1677 = vmatpush.bf16.msra.mxu3 %v5239_v0  ;;  %v5155_v0 = vor.u32 %v6508_v47, %v5154_v46  ;;  %v5015_v6 = vor.u32 %v6470_v58, %v5012_v59  ;;  %v6615_v46 = vld [vmem:[%s7577_s17 + $0x28c] sm:$0xf0]  ;;  %v5322_v47 = vld [vmem:[%s7577_s17 + $0x80] sm:$0xf]  ;;  %v6549_v59 = vld [vmem:[%s7577_s17 + $0x84] sm:$0xf] }
 0x18d   : > { %v5327_v4 = vor.u32 %v6549_v59, %v5324_v60  ;;  %v5506_v59 = vld [vmem:[%s7577_s17 + $0x1e8] sm:$0xf]  ;;  %v6596_v60 = vld [vmem:[%s7577_s17 + $0x1f4] sm:$0xf0]  ;;  %p5640_p4 = scmp.ne.s32.totalorder %s7023_s19, 1 }
 0x18e   : > { %1640 = vmatpush.bf16.msra.mxu1 %v4967_v9  ;;  %v5140_v9 = vld [vmem:[%s7575_s9 + $0x218] sm:$0xf0]  ;;  %p6425_p5 = scmp.ne.s32.totalorder (!%p5640_p4), %s7027_s20, 2 }
 0x18f   : > { %1659 = vmatpush.bf16.msra.mxu2 %v5095_v1  ;;  %1621 = vmatpush.bf16.msra.mxu0 %v5219_v8  ;;  %v4903_v1 = vor.u32 %v6442_v51, %v4900_v52  ;;  %v6502_v8 = vld [vmem:[%s7575_s9 + $0x20c] sm:$0xf]  ;;  %v5450_v52 = vld [vmem:[%s7577_s17 + $0x180] sm:$0xf] }
 0x190   : > { %1678 = vmatpush.bf16.msra.mxu3 %v5223_v12  ;;  %v6563_v12 = vld [vmem:[%s7577_s17 + $0xec] sm:$0xf0]  ;;  %v5451_v3 = vor.u32 %v6583_v53, %v5450_v52  ;;  %v6625_v52 = vld [vmem:[%s7577_s17 + $0x2e4] sm:$0xf]  ;;  %v5628_v53 = vld [vmem:[%s7577_s17 + $0x2f0] sm:$0xf0] }
 0x191   : > { %v5371_v22 = vor.u32 %v6563_v12, %v5370_v11  ;;  %v5546_v11 = vld [vmem:[%s7577_s17 + $0x240] sm:$0xf]  ;;  %v6607_v12 = vld [vmem:[%s7577_s17 + $0x24c] sm:$0xf0] }
 0x192   : > { %1641 = vmatpush.bf16.msra.mxu1 %v4951_v21  ;;  %v5143_v21 = vor.u32 %v6502_v8, %v5140_v9  ;;  %v6545_v9 = vld [vmem:[%s7577_s17 + $0x64] sm:$0xf] }
 0x193   : > { %1660 = vmatpush.bf16.msra.mxu2 %v5079_v13  ;;  %1622 = vmatpush.bf16.msra.mxu0 %v5203_v20  ;;  %v5498_v13 = vld [vmem:[%s7577_s17 + $0x1e0] sm:$0xf]  ;;  %v6623_v20 = vld [vmem:[%s7577_s17 + $0x2cc] sm:$0xf0] }
 0x194   : > { %1679 = vmatpush.bf16.msra.mxu3 %v5207_v24  ;;  %v5499_v23 = vor.u32 %v6595_v14, %v5498_v13  ;;  %v5375_v24 = vor.u32 %v6561_v15, %v5372_v16  ;;  %v5611_v27 = vor.u32 %v6623_v20, %v5610_v19  ;;  %v5290_v13 = vld [vmem:[%s7577_s17 + $0x40] sm:$0xf]  ;;  %v6543_v14 = vld [vmem:[%s7577_s17 + $0x4c] sm:$0xf0]  ;;  %v5547_v19 = vor.u32 %v6607_v12, %v5546_v11  ;;  %v5490_v11 = vld [vmem:[%s7577_s17 + $0x1c8] sm:$0xf] }
 0x195   : > { %1575 = vmatmul.bf16.gmra.mxu1 %v7712_v55  ;;  %v5291_v20 = vor.u32 %v6543_v14, %v5290_v13  ;;  %v6592_v12 = vld [vmem:[%s7577_s17 + $0x1d4] sm:$0xf0]  ;;  %v5346_v13 = vld [vmem:[%s7577_s17 + $0xa8] sm:$0xf] }
 0x196   : > { %1642 = vmatpush.bf16.msra.mxu1 %v4935_v33  ;;  %1556 = vmatmul.bf16.gmra.mxu0 %v7710_v54  ;;  %v5594_v33 = vld [vmem:[%s7577_s17 + $0x2a0] sm:$0xf]  ;;  %v6556_v14 = vld [vmem:[%s7577_s17 + $0xb4] sm:$0xf0] }
 0x197   : > { %1661 = vmatpush.bf16.msra.mxu2 %v5063_v25  ;;  %1623 = vmatpush.bf16.msra.mxu0 %v5187_v32  ;;  %v5354_v25 = vld [vmem:[%s7577_s17 + $0xc0] sm:$0xf]  ;;  %v5356_v32 = vld [vmem:[%s7577_s17 + $0xd0] sm:$0xf0]  ;;  %v5595_v41 = vor.u32 %v6619_v34, %v5594_v33 }
 0x198   : > { %1680 = vmatpush.bf16.msra.mxu3 %v5191_v36  ;;  %1594 = vmatmul.bf16.gmra.mxu2 %v7705_v49  ;;  %v5355_v30 = vor.u32 %v6559_v26, %v5354_v25  ;;  %v6555_v36 = vld [vmem:[%s7577_s17 + $0xac] sm:$0xf0]  ;;  %v5359_v38 = vor.u32 %v6557_v31, %v5356_v32  ;;  %v5274_v25 = vld [vmem:[%s7577_s17 + $0x20] sm:$0xf]  ;;  %v6537_v31 = vld [vmem:[%s7577_s17 + $0x24] sm:$0xf] }
 0x199   : > { %1613 = vmatmul.bf16.gmra.mxu3 %v7710_v54  ;;  %v5339_v42 = vor.u32 %v6555_v36, %v5338_v35  ;;  %v6539_v26 = vld [vmem:[%s7577_s17 + $0x2c] sm:$0xf0]  ;;  %v5276_v34 = vld [vmem:[%s7577_s17 + $0x30] sm:$0xf0]  ;;  %v5514_v35 = vld [vmem:[%s7577_s17 + $0x200] sm:$0xf] }
 0x19a   : > { %1643 = vmatpush.bf16.msra.mxu1 %v4919_v45  ;;  %v5578_v45 = vld [vmem:[%s7577_s17 + $0x280] sm:$0xf]  ;;  %v5275_v33 = vor.u32 %v6539_v26, %v5274_v25  ;;  %v6599_v36 = vld [vmem:[%s7577_s17 + $0x20c] sm:$0xf0]  ;;  %v5330_v25 = vld [vmem:[%s7577_s17 + $0x88] sm:$0xf] }
 0x19b   : > { %1662 = vmatpush.bf16.msra.mxu2 %v5047_v37  ;;  %1624 = vmatpush.bf16.msra.mxu0 %v5171_v44  ;;  %v5483_v37 = vor.u32 %v6591_v29, %v5482_v28  ;;  %v5340_v44 = vld [vmem:[%s7577_s17 + $0xb0] sm:$0xf0]  ;;  %v5579_v57 = vor.u32 %v6615_v46, %v5578_v45  ;;  %v5402_v29 = vld [vmem:[%s7577_s17 + $0x120] sm:$0xf]  ;;  %v6567_v46 = vld [vmem:[%s7577_s17 + $0x10c] sm:$0xf0] }
 0x19c   : > { %1681 = vmatpush.bf16.msra.mxu3 %v5175_v48  ;;  %v6551_v48 = vld [vmem:[%s7577_s17 + $0x8c] sm:$0xf0]  ;;  %v5343_v51 = vor.u32 %v6553_v43, %v5340_v44  ;;  %v5279_v44 = vor.u32 %v6537_v31, %v5276_v34  ;;  %v5386_v45 = vld [vmem:[%s7577_s17 + $0x100] sm:$0xf]  ;;  %v6552_v26 = vld [vmem:[%s7577_s17 + $0x94] sm:$0xf0] }
 0x19d   : > { %v5323_v58 = vor.u32 %v6551_v48, %v5322_v47  ;;  %v6533_v47 = vld [vmem:[%s7577_s17 + $0x4] sm:$0xf]  ;;  %v5515_v48 = vor.u32 %v6599_v36, %v5514_v35  ;;  %v6584_v34 = vld [vmem:[%s7577_s17 + $0x194] sm:$0xf0]  ;;  %v5331_v35 = vor.u32 %v6552_v26, %v5330_v25  ;;  %v6594_v25 = vld [vmem:[%s7577_s17 + $0x1ec] sm:$0xf] }
 0x19e   : > { %1644 = vmatpush.bf16.msra.mxu1 %v4903_v1  ;;  %v5306_v1 = vld [vmem:[%s7577_s17 + $0x60] sm:$0xf]  ;;  %v6613_v31 = vld [vmem:[%s7577_s17 + $0x284] sm:$0xf]  ;;  %v5508_v26 = vld [vmem:[%s7577_s17 + $0x1f8] sm:$0xf0] }
 0x19f   : > { %1663 = vmatpush.bf16.msra.mxu2 %v5031_v50  ;;  %1625 = vmatpush.bf16.msra.mxu0 %v5155_v0  ;;  %v5467_v50 = vor.u32 %v6587_v40, %v5466_v39  ;;  %v6611_v0 = vld [vmem:[%s7577_s17 + $0x26c] sm:$0xf0]  ;;  %v5307_v8 = vor.u32 %v6547_v2, %v5306_v1  ;;  %v5378_v39 = vld [vmem:[%s7577_s17 + $0xe8] sm:$0xf]  ;;  %v6564_v40 = vld [vmem:[%s7577_s17 + $0xf4] sm:$0xf0] }
 0x1a0   : > { %1682 = vmatpush.bf16.msra.mxu3 %v5159_v5  ;;  %v5434_v5 = vld [vmem:[%s7577_s17 + $0x160] sm:$0xf]  ;;  %v5563_v7 = vor.u32 %v6611_v0, %v5562_v63  ;;  %v5362_v63 = vld [vmem:[%s7577_s17 + $0xc8] sm:$0xf]  ;;  %v6560_v0 = vld [vmem:[%s7577_s17 + $0xd4] sm:$0xf0] }
 0x1a1   : > { %v6589_v1 = vld [vmem:[%s7577_s17 + $0x1c4] sm:$0xf]  ;;  %v5484_v2 = vld [vmem:[%s7577_s17 + $0x1d0] sm:$0xf0] }
 0x1a2   : > { %1645 = vmatpush.bf16.msra.mxu1 %v4887_v18  ;;  %v6575_v18 = vld [vmem:[%s7577_s17 + $0x14c] sm:$0xf0] }
 0x1a3   : > { %1664 = vmatpush.bf16.msra.mxu2 %v5015_v6  ;;  %1626 = vmatpush.bf16.msra.mxu0 %v5139_v17  ;;  %v6579_v6 = vld [vmem:[%s7577_s17 + $0x16c] sm:$0xf0]  ;;  %v5418_v17 = vld [vmem:[%s7577_s17 + $0x140] sm:$0xf] }
 0x1a4   : > { %1683 = vmatpush.bf16.msra.mxu3 %v5143_v21  ;;  %v5435_v15 = vor.u32 %v6579_v6, %v5434_v5  ;;  %v6541_v21 = vld [vmem:[%s7577_s17 + $0x44] sm:$0xf]  ;;  %v5631_v5 = vor.u32 %v6625_v52, %v5628_v53  ;;  %v5507_v6 = vor.u32 %v6596_v60, %v5506_v59  ;;  %v5548_v60 = vld [vmem:[%s7577_s17 + $0x250] sm:$0xf0] }
 0x1a5   : > { %1646 = vmatmul.bf16.vlgmr.msra.gmra.mxu1 %v7657_v56  ;;  %v6605_v59 = vld [vmem:[%s7577_s17 + $0x244] sm:$0xf] }
 0x1a6   : > { %2338 = vmatpush.bf16.msrb.mxu1 %v5499_v23  ;;  %1627 = vmatmul.bf16.vlgmr.msra.gmra.mxu0 %v7664_v62  ;;  %v5530_v23 = vld [vmem:[%s7577_s17 + $0x220] sm:$0xf] }
 0x1a7   : > { %2357 = vmatpush.bf16.msrb.mxu2 %v5627_v10  ;;  %2319 = vmatpush.bf16.msrb.mxu0 %v5371_v22  ;;  %v5308_v10 = vld [vmem:[%s7577_s17 + $0x70] sm:$0xf0] }
 0x1a8   : > { %2376 = vmatpush.bf16.msrb.mxu3 %v5375_v24  ;;  %1665 = vmatmul.bf16.vlgmr.msra.gmra.mxu2 %v7662_v61  ;;  %v5311_v16 = vor.u32 %v6545_v9, %v5308_v10  ;;  %v5292_v22 = vld [vmem:[%s7577_s17 + $0x50] sm:$0xf0]  ;;  %v6603_v24 = vld [vmem:[%s7577_s17 + $0x22c] sm:$0xf0]  ;;  %v5487_v9 = vor.u32 %v6589_v1, %v5484_v2 }
 0x1a9   : > { %1684 = vmatmul.bf16.vlgmr.msra.gmra.mxu3 %v7664_v62  ;;  %v5295_v28 = vor.u32 %v6541_v21, %v5292_v22  ;;  %v5531_v32 = vor.u32 %v6603_v24, %v5530_v23  ;;  %v5612_v10 = vld [vmem:[%s7577_s17 + $0x2d0] sm:$0xf0]  ;;  %v5474_v21 = vld [vmem:[%s7577_s17 + $0x1a8] sm:$0xf]  ;;  %v6588_v22 = vld [vmem:[%s7577_s17 + $0x1b4] sm:$0xf0]  ;;  %v5347_v23 = vor.u32 %v6556_v14, %v5346_v13 }
 0x1aa   : > { %2339 = vmatpush.bf16.msrb.mxu1 %v5483_v37  ;;  %v5258_v37 = vld [vmem:[%s7577_s17] sm:$0xf]  ;;  %v5266_v13 = vld [vmem:[%s7577_s17 + $0x8] sm:$0xf] }
 0x1ab   : > { %2358 = vmatpush.bf16.msrb.mxu2 %v5611_v27  ;;  %2320 = vmatpush.bf16.msrb.mxu0 %v5355_v30  ;;  %v5419_v27 = vor.u32 %v6575_v18, %v5418_v17  ;;  %v6571_v30 = vld [vmem:[%s7577_s17 + $0x12c] sm:$0xf0]  ;;  %v6585_v17 = vld [vmem:[%s7577_s17 + $0x1a4] sm:$0xf]  ;;  %v5468_v18 = vld [vmem:[%s7577_s17 + $0x1b0] sm:$0xf0] }
 0x1ac   : > { %2377 = vmatpush.bf16.msrb.mxu3 %v5359_v38  ;;  %v6535_v38 = vld [vmem:[%s7577_s17 + $0xc] sm:$0xf0]  ;;  %v5403_v43 = vor.u32 %v6571_v30, %v5402_v29  ;;  %v5471_v24 = vor.u32 %v6585_v17, %v5468_v18  ;;  %v6581_v29 = vld [vmem:[%s7577_s17 + $0x184] sm:$0xf]  ;;  %v5452_v30 = vld [vmem:[%s7577_s17 + $0x190] sm:$0xf0] }
 0x1ad   : > { %v5455_v36 = vor.u32 %v6581_v29, %v5452_v30  ;;  %v6565_v17 = vld [vmem:[%s7577_s17 + $0x104] sm:$0xf]  ;;  %v5388_v18 = vld [vmem:[%s7577_s17 + $0x110] sm:$0xf0]  ;;  %v6562_v29 = vld [vmem:[%s7577_s17 + $0xec] sm:$0xf] }
 0x1ae   : > { %2340 = vmatpush.bf16.msrb.mxu1 %v5467_v50  ;;  %v5259_v50 = vor.u32 %v6535_v38, %v5258_v37  ;;  %v5314_v37 = vld [vmem:[%s7577_s17 + $0x68] sm:$0xf]  ;;  %v6548_v38 = vld [vmem:[%s7577_s17 + $0x74] sm:$0xf0] }
 0x1af   : > { %2359 = vmatpush.bf16.msrb.mxu2 %v5595_v41  ;;  %2321 = vmatpush.bf16.msrb.mxu0 %v5339_v42  ;;  %v6593_v41 = vld [vmem:[%s7577_s17 + $0x1e4] sm:$0xf]  ;;  %v5500_v42 = vld [vmem:[%s7577_s17 + $0x1f0] sm:$0xf0] }
 0x1b0   : > { %2378 = vmatpush.bf16.msrb.mxu3 %v5343_v51  ;;  %v5260_v51 = vld [vmem:[%s7577_s17 + $0x10] sm:$0xf0] }
 0x1b2   : > { %2341 = vmatpush.bf16.msrb.mxu1 %v5451_v3  ;;  %v5387_v3 = vor.u32 %v6567_v46, %v5386_v45  ;;  %v5442_v45 = vld [vmem:[%s7577_s17 + $0x168] sm:$0xf]  ;;  %v6580_v46 = vld [vmem:[%s7577_s17 + $0x174] sm:$0xf0] }
 0x1b3   : > { %2360 = vmatpush.bf16.msrb.mxu2 %v5579_v57  ;;  %2322 = vmatpush.bf16.msrb.mxu0 %v5323_v58  ;;  %v5379_v57 = vor.u32 %v6564_v40, %v5378_v39  ;;  %v5503_v58 = vor.u32 %v6593_v41, %v5500_v42  ;;  %v6577_v41 = vld [vmem:[%s7577_s17 + $0x164] sm:$0xf]  ;;  %v5436_v42 = vld [vmem:[%s7577_s17 + $0x170] sm:$0xf0]  ;;  %v5443_v53 = vor.u32 %v6580_v46, %v5442_v45  ;;  %v6558_v45 = vld [vmem:[%s7577_s17 + $0xcc] sm:$0xf] }
 0x1b4   : > { %2379 = vmatpush.bf16.msrb.mxu3 %v5327_v4  ;;  %v5263_v4 = vor.u32 %v6533_v47, %v5260_v51  ;;  %v5315_v47 = vor.u32 %v6548_v38, %v5314_v37  ;;  %v6544_v51 = vld [vmem:[%s7577_s17 + $0x54] sm:$0xf0]  ;;  %v5511_v37 = vor.u32 %v6594_v25, %v5508_v26  ;;  %v5364_v46 = vld [vmem:[%s7577_s17 + $0xd8] sm:$0xf0]  ;;  %v5570_v26 = vld [vmem:[%s7577_s17 + $0x268] sm:$0xf] }
 0x1b5   : > { %1651 = vmatmul.bf16.gmra.mxu1 %v7705_v49 }
 0x1b6   : > { %2342 = vmatpush.bf16.msrb.mxu1 %v5435_v15  ;;  %1632 = vmatmul.bf16.gmra.mxu0 %v7712_v55 }
 0x1b7   : > { %2361 = vmatpush.bf16.msrb.mxu2 %v5563_v7  ;;  %2323 = vmatpush.bf16.msrb.mxu0 %v5307_v8  ;;  %v6621_v7 = vld [vmem:[%s7577_s17 + $0x2c4] sm:$0xf]  ;;  %v5363_v8 = vor.u32 %v6560_v0, %v5362_v63  ;;  %v5426_v63 = vld [vmem:[%s7577_s17 + $0x148] sm:$0xf]  ;;  %v6576_v0 = vld [vmem:[%s7577_s17 + $0x154] sm:$0xf0] }
 0x1b8   : > { %2380 = vmatpush.bf16.msrb.mxu3 %v5311_v16  ;;  %1670 = vmatmul.bf16.gmra.mxu2 %v7710_v54  ;;  %v5615_v15 = vor.u32 %v6621_v7, %v5612_v10  ;;  %v5491_v16 = vor.u32 %v6592_v12, %v5490_v11  ;;  %v6569_v7 = vld [vmem:[%s7577_s17 + $0x124] sm:$0xf]  ;;  %v5532_v10 = vld [vmem:[%s7577_s17 + $0x230] sm:$0xf0]  ;;  %v5410_v11 = vld [vmem:[%s7577_s17 + $0x128] sm:$0xf] }
 0x1b9   : > { %1689 = vmatmul.bf16.gmra.mxu3 %v7712_v55  ;;  %v6572_v12 = vld [vmem:[%s7577_s17 + $0x134] sm:$0xf0] }
 0x1ba   : > { %2343 = vmatpush.bf16.msrb.mxu1 %v5419_v27 }
 0x1bb   : > { %2362 = vmatpush.bf16.msrb.mxu2 %v5547_v19  ;;  %2324 = vmatpush.bf16.msrb.mxu0 %v5291_v20  ;;  %v6617_v19 = vld [vmem:[%s7577_s17 + $0x2a4] sm:$0xf]  ;;  %v5596_v20 = vld [vmem:[%s7577_s17 + $0x2b0] sm:$0xf0] }
 0x1bc   : > { %2381 = vmatpush.bf16.msrb.mxu3 %v5295_v28  ;;  %v5599_v27 = vor.u32 %v6617_v19, %v5596_v20  ;;  %v5475_v28 = vor.u32 %v6588_v22, %v5474_v21  ;;  %v5411_v20 = vor.u32 %v6572_v12, %v5410_v11  ;;  %v6597_v21 = vld [vmem:[%s7577_s17 + $0x204] sm:$0xf]  ;;  %v5516_v22 = vld [vmem:[%s7577_s17 + $0x210] sm:$0xf0]  ;;  %v5586_v11 = vld [vmem:[%s7577_s17 + $0x288] sm:$0xf] }
 0x1bd   : > { %v6616_v12 = vld [vmem:[%s7577_s17 + $0x294] sm:$0xf0] }
 0x1be   : > { %2344 = vmatpush.bf16.msrb.mxu1 %v5403_v43  ;;  %v6609_v43 = vld [vmem:[%s7577_s17 + $0x264] sm:$0xf] }
 0x1bf   : > { %2363 = vmatpush.bf16.msrb.mxu2 %v5531_v32  ;;  %2325 = vmatpush.bf16.msrb.mxu0 %v5275_v33  ;;  %v5580_v32 = vld [vmem:[%s7577_s17 + $0x290] sm:$0xf0]  ;;  %v5458_v33 = vld [vmem:[%s7577_s17 + $0x188] sm:$0xf] }
 0x1c0   : > { %2382 = vmatpush.bf16.msrb.mxu3 %v5279_v44  ;;  %v5583_v39 = vor.u32 %v6613_v31, %v5580_v32  ;;  %v5459_v40 = vor.u32 %v6584_v34, %v5458_v33  ;;  %v5564_v44 = vld [vmem:[%s7577_s17 + $0x270] sm:$0xf0]  ;;  %v5391_v31 = vor.u32 %v6565_v17, %v5388_v18  ;;  %v5380_v32 = vld [vmem:[%s7577_s17 + $0xf8] sm:$0xf0]  ;;  %v6626_v33 = vld [vmem:[%s7577_s17 + $0x2ec] sm:$0xf] }
 0x1c1   : > { %v5567_v52 = vor.u32 %v6609_v43, %v5564_v44  ;;  %v5636_v34 = vld [vmem:[%s7577_s17 + $0x2f8] sm:$0xf0]  ;;  %v5618_v43 = vld [vmem:[%s7577_s17 + $0x2c8] sm:$0xf]  ;;  %v6624_v44 = vld [vmem:[%s7577_s17 + $0x2d4] sm:$0xf0] }
 0x1c2   : > { %2345 = vmatpush.bf16.msrb.mxu1 %v5387_v3  ;;  %v5282_v3 = vld [vmem:[%s7577_s17 + $0x28] sm:$0xf]  ;;  %v5588_v17 = vld [vmem:[%s7577_s17 + $0x298] sm:$0xf0]  ;;  %v843_v18 = vld [vmem:[#allocation2 + $0x30] sm:$0xff] }
 0x1c3   : > { %2364 = vmatpush.bf16.msrb.mxu2 %v5515_v48  ;;  %2326 = vmatpush.bf16.msrb.mxu0 %v5259_v50  ;;  %v5439_v48 = vor.u32 %v6577_v41, %v5436_v42  ;;  %v5298_v50 = vld [vmem:[%s7577_s17 + $0x48] sm:$0xf]  ;;  %v5383_v41 = vor.u32 %v6562_v29, %v5380_v32  ;;  %v5639_v42 = vor.u32 %v6626_v33, %v5636_v34  ;;  %v5316_v32 = vld [vmem:[%s7577_s17 + $0x78] sm:$0xf0]  ;;  %v6610_v33 = vld [vmem:[%s7577_s17 + $0x26c] sm:$0xf] }
 0x1c4   : > { %2383 = vmatpush.bf16.msrb.mxu3 %v5263_v4  ;;  %v5299_v1 = vor.u32 %v6544_v51, %v5298_v50  ;;  %v6540_v4 = vld [vmem:[%s7577_s17 + $0x34] sm:$0xf0]  ;;  %v5619_v51 = vor.u32 %v6624_v44, %v5618_v43  ;;  %v5572_v34 = vld [vmem:[%s7577_s17 + $0x278] sm:$0xf0] }
 0x1c5   : > { %2346 = vmatmul.bf16.vlgmr.msrb.gmra.mxu1 %v7662_v61  ;;  %v5283_v14 = vor.u32 %v6540_v4, %v5282_v3  ;;  %v5604_v3 = vld [vmem:[%s7577_s17 + $0x2b8] sm:$0xf0]  ;;  %v5575_v43 = vor.u32 %v6610_v33, %v5572_v34  ;;  %v6608_v44 = vld [vmem:[%s7577_s17 + $0x254] sm:$0xf0] }
 0x1c6   : > { %2414 = vmatpush.bf16.msra.mxu1 %v5631_v5  ;;  %2327 = vmatmul.bf16.vlgmr.msrb.gmra.mxu0 %v7657_v56  ;;  %v5551_v5 = vor.u32 %v6605_v59, %v5548_v60  ;;  %v5602_v59 = vld [vmem:[%s7577_s17 + $0x2a8] sm:$0xf]  ;;  %v6620_v60 = vld [vmem:[%s7577_s17 + $0x2b4] sm:$0xf0] }
 0x1c7   : > { %2433 = vmatpush.bf16.msra.mxu2 %v5379_v57  ;;  %2395 = vmatpush.bf16.msra.mxu0 %v5503_v58  ;;  %v6573_v57 = vld [vmem:[%s7577_s17 + $0x144] sm:$0xf]  ;;  %v5420_v58 = vld [vmem:[%s7577_s17 + $0x150] sm:$0xf0] }
 0x1c8   : > { %2452 = vmatpush.bf16.msra.mxu3 %v5507_v6  ;;  %2365 = vmatmul.bf16.vlgmr.msrb.gmra.mxu2 %v7664_v62  ;;  %v5423_v2 = vor.u32 %v6573_v57, %v5420_v58  ;;  %v5427_v6 = vor.u32 %v6576_v0, %v5426_v63  ;;  %v6586_v57 = vld [vmem:[%s7577_s17 + $0x1ac] sm:$0xf]  ;;  %v5476_v58 = vld [vmem:[%s7577_s17 + $0x1b8] sm:$0xf0] }
 0x1c9   : > { %2384 = vmatmul.bf16.vlgmr.msrb.gmra.mxu3 %v7657_v56  ;;  %v6554_v63 = vld [vmem:[%s7577_s17 + $0xac] sm:$0xf] }
 0x1ca   : > { %2415 = vmatpush.bf16.msra.mxu1 %v5615_v15 }
 0x1cb   : > { %2434 = vmatpush.bf16.msra.mxu2 %v5363_v8  ;;  %2396 = vmatpush.bf16.msra.mxu0 %v5487_v9  ;;  %v5404_v8 = vld [vmem:[%s7577_s17 + $0x130] sm:$0xf0]  ;;  %v6601_v9 = vld [vmem:[%s7577_s17 + $0x224] sm:$0xf] }
 0x1cc   : > { %2453 = vmatpush.bf16.msra.mxu3 %v5491_v16  ;;  %v5407_v15 = vor.u32 %v6569_v7, %v5404_v8  ;;  %v6536_v16 = vld [vmem:[%s7577_s17 + $0x14] sm:$0xf0]  ;;  %v5535_v19 = vor.u32 %v6601_v9, %v5532_v10  ;;  %v6582_v7 = vld [vmem:[%s7577_s17 + $0x18c] sm:$0xf]  ;;  %v5460_v8 = vld [vmem:[%s7577_s17 + $0x198] sm:$0xf0] }
 0x1cd   : > { %v5267_v30 = vor.u32 %v6536_v16, %v5266_v13  ;;  %v6550_v13 = vld [vmem:[%s7577_s17 + $0x8c] sm:$0xf] }
 0x1ce   : > { %2416 = vmatpush.bf16.msra.mxu1 %v5599_v27  ;;  %v5634_v27 = vld [vmem:[%s7577_s17 + $0x2e8] sm:$0xf]  ;;  %v6614_v16 = vld [vmem:[%s7577_s17 + $0x28c] sm:$0xf] }
 0x1cf   : > { %2435 = vmatpush.bf16.msra.mxu2 %v5347_v23  ;;  %2397 = vmatpush.bf16.msra.mxu0 %v5471_v24  ;;  %v5394_v23 = vld [vmem:[%s7577_s17 + $0x108] sm:$0xf]  ;;  %v6568_v24 = vld [vmem:[%s7577_s17 + $0x114] sm:$0xf0]  ;;  %v5591_v25 = vor.u32 %v6614_v16, %v5588_v17 }
 0x1d0   : > { %2454 = vmatpush.bf16.msra.mxu3 %v5475_v28  ;;  %v6628_v28 = vld [vmem:[%s7577_s17 + $0x2f4] sm:$0xf0] }
 0x1d1   : > { %v5635_v38 = vor.u32 %v6628_v28, %v5634_v27  ;;  %v6612_v27 = vld [vmem:[%s7577_s17 + $0x274] sm:$0xf0]  ;;  %v6546_v28 = vld [vmem:[%s7577_s17 + $0x6c] sm:$0xf] }
 0x1d2   : > { %2417 = vmatpush.bf16.msra.mxu1 %v5583_v39  ;;  %v6590_v39 = vld [vmem:[%s7577_s17 + $0x1cc] sm:$0xf] }
 0x1d3   : > { %2436 = vmatpush.bf16.msra.mxu2 %v5331_v35  ;;  %2398 = vmatpush.bf16.msra.mxu0 %v5455_v36  ;;  %v5519_v35 = vor.u32 %v6597_v21, %v5516_v22  ;;  %v5395_v36 = vor.u32 %v6568_v24, %v5394_v23  ;;  %v6578_v21 = vld [vmem:[%s7577_s17 + $0x16c] sm:$0xf]  ;;  %v5444_v22 = vld [vmem:[%s7577_s17 + $0x178] sm:$0xf0] }
 0x1d4   : > { %2455 = vmatpush.bf16.msra.mxu3 %v5459_v40  ;;  %v5492_v40 = vld [vmem:[%s7577_s17 + $0x1d8] sm:$0xf0] }
 0x1d5   : > { %2351 = vmatmul.bf16.gmra.mxu1 %v7710_v54  ;;  %v5495_v50 = vor.u32 %v6590_v39, %v5492_v40  ;;  %v6574_v39 = vld [vmem:[%s7577_s17 + $0x14c] sm:$0xf]  ;;  %v5428_v40 = vld [vmem:[%s7577_s17 + $0x158] sm:$0xf0] }
 0x1d6   : > { %2418 = vmatpush.bf16.msra.mxu1 %v5567_v52  ;;  %2332 = vmatmul.bf16.gmra.mxu0 %v7705_v49  ;;  %v5367_v52 = vor.u32 %v6558_v45, %v5364_v46  ;;  %v6542_v45 = vld [vmem:[%s7577_s17 + $0x4c] sm:$0xf]  ;;  %v5300_v46 = vld [vmem:[%s7577_s17 + $0x58] sm:$0xf0] }
 0x1d7   : > { %2437 = vmatpush.bf16.msra.mxu2 %v5315_v47  ;;  %2399 = vmatpush.bf16.msra.mxu0 %v5439_v48  ;;  %v6622_v47 = vld [vmem:[%s7577_s17 + $0x2cc] sm:$0xf]  ;;  %v5620_v48 = vld [vmem:[%s7577_s17 + $0x2d8] sm:$0xf0] }
 0x1d8   : > { %2456 = vmatpush.bf16.msra.mxu3 %v5443_v53  ;;  %2370 = vmatmul.bf16.gmra.mxu2 %v7712_v55  ;;  %v5623_v53 = vor.u32 %v6622_v47, %v5620_v48  ;;  %v6606_v47 = vld [vmem:[%s7577_s17 + $0x24c] sm:$0xf]  ;;  %v5556_v48 = vld [vmem:[%s7577_s17 + $0x258] sm:$0xf0] }
 0x1d9   : > { %2389 = vmatmul.bf16.gmra.mxu3 %v7705_v49 }
 0x1da   : > { %2419 = vmatpush.bf16.msra.mxu1 %v5551_v5  ;;  %v5479_v5 = vor.u32 %v6586_v57, %v5476_v58  ;;  %v6570_v57 = vld [vmem:[%s7577_s17 + $0x12c] sm:$0xf]  ;;  %v5412_v58 = vld [vmem:[%s7577_s17 + $0x138] sm:$0xf0] }
 0x1db   : > { %2438 = vmatpush.bf16.msra.mxu2 %v5299_v1  ;;  %2400 = vmatpush.bf16.msra.mxu0 %v5423_v2  ;;  %v5348_v1 = vld [vmem:[%s7577_s17 + $0xb8] sm:$0xf0]  ;;  %v6618_v2 = vld [vmem:[%s7577_s17 + $0x2ac] sm:$0xf] }
 0x1dc   : > { %2457 = vmatpush.bf16.msra.mxu3 %v5427_v6  ;;  %v5603_v6 = vor.u32 %v6620_v60, %v5602_v59  ;;  %v5351_v9 = vor.u32 %v6554_v63, %v5348_v1  ;;  %v5607_v10 = vor.u32 %v6618_v2, %v5604_v3  ;;  %v5303_v60 = vor.u32 %v6542_v45, %v5300_v46  ;;  %v6604_v1 = vld [vmem:[%s7577_s17 + $0x234] sm:$0xf0]  ;;  %v6538_v2 = vld [vmem:[%s7577_s17 + $0x2c] sm:$0xf]  ;;  %v844_v45 = vld [vmem:[#allocation2] sm:$0xff] }
 0x1dd   : > { %v5559_v63 = vor.u32 %v6606_v47, %v5556_v48 }
 0x1de   : > { %2420 = vmatpush.bf16.msra.mxu1 %v5535_v19  ;;  %v5463_v19 = vor.u32 %v6582_v7, %v5460_v8  ;;  %v6602_v7 = vld [vmem:[%s7577_s17 + $0x22c] sm:$0xf]  ;;  %v5540_v8 = vld [vmem:[%s7577_s17 + $0x238] sm:$0xf0] }
 0x1df   : > { %2439 = vmatpush.bf16.msra.mxu2 %v5283_v14  ;;  %2401 = vmatpush.bf16.msra.mxu0 %v5407_v15  ;;  %v5332_v15 = vld [vmem:[%s7577_s17 + $0x98] sm:$0xf0]  ;;  %v5543_v17 = vor.u32 %v6602_v7, %v5540_v8  ;;  %v856_v7 = vld [vmem:[#allocation2 + $0x70] sm:$0xff] }
 0x1e0   : > { %2458 = vmatpush.bf16.msra.mxu3 %v5411_v20  ;;  %v5587_v20 = vor.u32 %v6616_v12, %v5586_v11  ;;  %v5335_v24 = vor.u32 %v6550_v13, %v5332_v15  ;;  %v5415_v11 = vor.u32 %v6570_v57, %v5412_v58  ;;  %v6566_v13 = vld [vmem:[%s7577_s17 + $0x10c] sm:$0xf]  ;;  %v5522_v15 = vld [vmem:[%s7577_s17 + $0x208] sm:$0xf] }
 0x1e1   : > { %v1476_v0 = vpop.f32.mrf.mxu0 }
 0x1e2   : > { %2421 = vmatpush.bf16.msra.mxu1 %v5519_v35  ;;  %v1495_v4 = vpop.f32.mrf.mxu1 }
 0x1e3   : > { %2440 = vmatpush.bf16.msra.mxu2 %v5267_v30  ;;  %2402 = vmatpush.bf16.msra.mxu0 %v5391_v31  ;;  %v1496_v14 = vadd.f32 %v1495_v4, %v1476_v0  ;;  %v5538_v0 = vld [vmem:[%s7577_s17 + $0x228] sm:$0xf] }
 0x1e4   : > { %2459 = vmatpush.bf16.msra.mxu3 %v5395_v36  ;;  %v5539_v12 = vor.u32 %v6604_v1, %v5538_v0 }
 0x1e5   : > { %2422 = vmatmul.bf16.vlgmr.msra.gmra.mxu1 %v7664_v62 }
 0x1e6   : > { %2490 = vmatpush.bf16.msrb.mxu1 %v5383_v41  ;;  %2403 = vmatmul.bf16.vlgmr.msra.gmra.mxu0 %v7662_v61  ;;  %v5554_v41 = vld [vmem:[%s7577_s17 + $0x248] sm:$0xf] }
 0x1e7   : > { %2509 = vmatpush.bf16.msrb.mxu2 %v5511_v37  ;;  %2471 = vmatpush.bf16.msrb.mxu0 %v5635_v38  ;;  %v5447_v37 = vor.u32 %v6578_v21, %v5444_v22  ;;  %v5571_v38 = vor.u32 %v6612_v27, %v5570_v26  ;;  %v6598_v22 = vld [vmem:[%s7577_s17 + $0x20c] sm:$0xf]  ;;  %v851_v26 = vld [vmem:[#allocation2 + $0x40] sm:$0xff] }
 0x1e8   : > { %2528 = vmatpush.bf16.msrb.mxu3 %v5639_v42  ;;  %2441 = vmatmul.bf16.vlgmr.msra.gmra.mxu2 %v7657_v56  ;;  %v7997_v30 = vpop.f32.mrf.mxu3  ;;  %v5319_v42 = vor.u32 %v6546_v28, %v5316_v32 }
 0x1e9   : > { %2460 = vmatmul.bf16.vlgmr.msra.gmra.mxu3 %v7662_v61  ;;  %v1514_v23 = vpop.f32.mrf.mxu2  ;;  %v1478_v31 = vpop.f32.mrf.mxu0 }
 0x1ea   : > { %2491 = vmatpush.bf16.msrb.mxu1 %v5367_v52  ;;  %v1515_v29 = vadd.f32 %v1514_v23, %v1496_v14  ;;  %v1497_v35 = vpop.f32.mrf.mxu1  ;;  %v5431_v52 = vor.u32 %v6574_v39, %v5428_v40  ;;  %v5396_v14 = vld [vmem:[%s7577_s17 + $0x118] sm:$0xf0] }
 0x1eb   : > { %2510 = vmatpush.bf16.msrb.mxu2 %v5495_v50  ;;  %2472 = vmatpush.bf16.msrb.mxu0 %v5619_v51  ;;  %v1498_v50 = vadd.f32 %v1497_v35, %v1478_v31  ;;  %v847_v51 = vld [vmem:[#allocation2 + $0x50] sm:$0xff]  ;;  %v5524_v23 = vld [vmem:[%s7577_s17 + $0x218] sm:$0xf0] }
 0x1ec   : > { %2529 = vmatpush.bf16.msrb.mxu3 %v5623_v53  ;;  %v1695_v36 = vadd.f32 %v1515_v29, %v843_v18  ;;  %v5555_v53 = vor.u32 %v6608_v44, %v5554_v41  ;;  %v6600_v18 = vld [vmem:[%s7577_s17 + $0x214] sm:$0xf0]  ;;  %v5527_v29 = vor.u32 %v6598_v22, %v5524_v23 }
 0x1ed   : > { %v846_v22 = vld [vmem:[#allocation2 + $0x18] sm:$0xff] }
 0x1ee   : > { %2492 = vmatpush.bf16.msrb.mxu1 %v5351_v9  ;;  %1711 = vst [vmem:[#allocation2 + $0x30] sm:$0xff] %v1695_v36 }
 0x1ef   : > { %2511 = vmatpush.bf16.msrb.mxu2 %v5479_v5  ;;  %2473 = vmatpush.bf16.msrb.mxu0 %v5603_v6  ;;  %v5284_v6 = vld [vmem:[%s7577_s17 + $0x38] sm:$0xf0] }
 0x1f0   : > { %2530 = vmatpush.bf16.msrb.mxu3 %v5607_v10  ;;  %v8015_v4 = vpop.f32.mrf.mxu3  ;;  %v5287_v16 = vor.u32 %v6538_v2, %v5284_v6 }
 0x1f1   : > { %v1516_v59 = vpop.f32.mrf.mxu2  ;;  %v1481_v5 = vpop.f32.mrf.mxu0 }
 0x1f2   : > { %2493 = vmatpush.bf16.msrb.mxu1 %v5335_v24  ;;  %v1517_v3 = vadd.f32 %v1516_v59, %v1498_v50  ;;  %v1500_v9 = vpop.f32.mrf.mxu1  ;;  %v5399_v24 = vor.u32 %v6566_v13, %v5396_v14  ;;  %v845_v13 = vld [vmem:[#allocation2 + $0x58] sm:$0xff] }
 0x1f3   : > { %2512 = vmatpush.bf16.msrb.mxu2 %v5463_v19  ;;  %2474 = vmatpush.bf16.msrb.mxu0 %v5587_v20  ;;  %v6534_v19 = vld [vmem:[%s7577_s17 + $0xc] sm:$0xf]  ;;  %v5268_v20 = vld [vmem:[%s7577_s17 + $0x18] sm:$0xf0]  ;;  %v1501_v21 = vadd.f32 %v1500_v9, %v1481_v5 }
 0x1f4   : > { %2531 = vmatpush.bf16.msrb.mxu3 %v5591_v25  ;;  %v1699_v10 = vadd.f32 %v1517_v3, %v847_v51  ;;  %v5523_v25 = vor.u32 %v6600_v18, %v5522_v15  ;;  %v5271_v28 = vor.u32 %v6534_v19, %v5268_v20  ;;  %v849_v19 = vld [vmem:[#allocation2 + $0x8] sm:$0xff] }
 0x1f5   : > { %2427 = vmatmul.bf16.gmra.mxu1 %v7712_v55 }
 0x1f6   : > { %2494 = vmatpush.bf16.msrb.mxu1 %v5319_v42  ;;  %1715 = vst [vmem:[#allocation2 + $0x50] sm:$0xff] %v1699_v10  ;;  %2408 = vmatmul.bf16.gmra.mxu0 %v7710_v54 }
 0x1f7   : > { %2513 = vmatpush.bf16.msrb.mxu2 %v5447_v37  ;;  %2475 = vmatpush.bf16.msrb.mxu0 %v5571_v38  ;;  %v855_v37 = vld [vmem:[#allocation2 + $0x60] sm:$0xff] }
 0x1f8   : > { %2532 = vmatpush.bf16.msrb.mxu3 %v5575_v43  ;;  %2446 = vmatmul.bf16.gmra.mxu2 %v7705_v49  ;;  %v1538_v32 = vpop.f32.mrf.mxu3 }
 0x1f9   : > { %2465 = vmatmul.bf16.gmra.mxu3 %v7710_v54  ;;  %v1519_v27 = vpop.f32.mrf.mxu2  ;;  %v1483_v33 = vpop.f32.mrf.mxu0 }
 0x1fa   : > { %2495 = vmatpush.bf16.msrb.mxu1 %v5303_v60  ;;  %v1520_v31 = vadd.f32 %v1519_v27, %v1501_v21  ;;  %v1502_v34 = vpop.f32.mrf.mxu1 }
 0x1fb   : > { %2514 = vmatpush.bf16.msrb.mxu2 %v5431_v52  ;;  %2476 = vmatpush.bf16.msrb.mxu0 %v5555_v53  ;;  %v1503_v36 = vadd.f32 %v1502_v34, %v1483_v33 }
 0x1fc   : > { %2533 = vmatpush.bf16.msrb.mxu3 %v5559_v63  ;;  %v1703_v35 = vadd.f32 %v1520_v31, %v851_v26 }
 0x1fe   : > { %2496 = vmatpush.bf16.msrb.mxu1 %v5287_v16  ;;  %1719 = vst [vmem:[#allocation2 + $0x40] sm:$0xff] %v1703_v35  ;;  %v850_v35 = vld [vmem:[#allocation2 + $0x48] sm:$0xff] }
 0x1ff   : > { %2515 = vmatpush.bf16.msrb.mxu2 %v5415_v11  ;;  %2477 = vmatpush.bf16.msrb.mxu0 %v5539_v12 }
 0x200   : > { %2534 = vmatpush.bf16.msrb.mxu3 %v5543_v17  ;;  %v1540_v40 = vpop.f32.mrf.mxu3 }
 0x201   : > { %v1521_v38 = vpop.f32.mrf.mxu2 }
 0x202   : > { %2497 = vmatpush.bf16.msrb.mxu1 %v5271_v28  ;;  %v1522_v39 = vadd.f32 %v1521_v38, %v1503_v36  ;;  %v1571_v42 = vpop.f32.mrf.mxu1 }
 0x203   : > { %2516 = vmatpush.bf16.msrb.mxu2 %v5399_v24  ;;  %2478 = vmatpush.bf16.msrb.mxu0 %v5523_v25  ;;  %v1552_v41 = vpop.f32.mrf.mxu0 }
 0x204   : > { %2535 = vmatpush.bf16.msrb.mxu3 %v5527_v29  ;;  %v1707_v43 = vadd.f32 %v1522_v39, %v855_v37  ;;  %v1553_v44 = vadd.f32 %v1552_v41, %v7997_v30  ;;  %v848_v30 = vld [vmem:[#allocation2 + $0x68] sm:$0xff] }
 0x205   : > { %2498 = vmatmul.bf16.vlgmr.msrb.gmra.mxu1 %v7657_v56 }
 0x206   : > { %1723 = vst [vmem:[#allocation2 + $0x60] sm:$0xff] %v1707_v43  ;;  %v1572_v46 = vadd.f32 %v1571_v42, %v1553_v44  ;;  %2479 = vmatmul.bf16.vlgmr.msrb.gmra.mxu0 %v7664_v62  ;;  %v857_v44 = vld [vmem:[#allocation2 + $0x78] sm:$0xff] }
 0x208   : > { %2517 = vmatmul.bf16.vlgmr.msrb.gmra.mxu2 %v7662_v61  ;;  %v1696_v47 = vadd.f32 %v1572_v46, %v844_v45  ;;  %v852_v61 = vld [vmem:[#allocation2 + $0x20] sm:$0xff] }
 0x209   : > { %2536 = vmatmul.bf16.vlgmr.msrb.gmra.mxu3 %v7664_v62 }
 0x20a   : > { %1712 = vst [vmem:[#allocation2] sm:$0xff] %v1696_v47  ;;  %v1573_v52 = vpop.f32.mrf.mxu1  ;;  %v854_v47 = vld [vmem:[#allocation2 + $0x38] sm:$0xff] }
 0x20b   : > { %v1590_v48 = vpop.f32.mrf.mxu2  ;;  %v1554_v51 = vpop.f32.mrf.mxu0 }
 0x20c   : > { %v1609_v50 = vpop.f32.mrf.mxu3  ;;  %v1555_v53 = vadd.f32 %v1554_v51, %v8015_v4 }
 0x20d   : > { %v1610_v10 = vadd.f32 %v1609_v50, %v1590_v48 }
 0x20e   : > { %v1574_v57 = vadd.f32 %v1573_v52, %v1555_v53 }
 0x210   : > { %v1700_v58 = vadd.f32 %v1574_v57, %v848_v30 }
 0x212   : > { %1716 = vst [vmem:[#allocation2 + $0x68] sm:$0xff] %v1700_v58  ;;  %v1576_v56 = vpop.f32.mrf.mxu1 }
 0x213   : > { %v1592_v59 = vpop.f32.mrf.mxu2  ;;  %v1557_v63 = vpop.f32.mrf.mxu0 }
 0x214   : > { %v1611_v60 = vpop.f32.mrf.mxu3  ;;  %v1558_v0 = vadd.f32 %v1557_v63, %v1538_v32  ;;  %v853_v32 = vld [vmem:[#allocation2 + $0x10] sm:$0xff] }
 0x215   : > { %2503 = vmatmul.bf16.gmra.mxu1 %v7705_v49 }
 0x216   : > { %v1577_v1 = vadd.f32 %v1576_v56, %v1558_v0  ;;  %2484 = vmatmul.bf16.gmra.mxu0 %v7712_v55 }
 0x218   : > { %2522 = vmatmul.bf16.gmra.mxu2 %v7710_v54  ;;  %v1704_v62 = vadd.f32 %v1577_v1, %v852_v61  ;;  %v1727_v61 = vld [vmem:[#allocation3 + $0x28] sm:$0xff] }
 0x219   : > { %2541 = vmatmul.bf16.gmra.mxu3 %v7712_v55  ;;  %v1612_v55 = vadd.f32 %v1611_v60, %v1592_v59  ;;  %v858_v60 = vld [vmem:[#allocation2 + $0x28] sm:$0xff] }
 0x21a   : > { %1720 = vst [vmem:[#allocation2 + $0x20] sm:$0xff] %v1704_v62  ;;  %v1578_v5 = vpop.f32.mrf.mxu1 }
 0x21b   : > { %v1595_v2 = vpop.f32.mrf.mxu2  ;;  %v1559_v4 = vpop.f32.mrf.mxu0 }
 0x21c   : > { %v1614_v3 = vpop.f32.mrf.mxu3  ;;  %v1560_v6 = vadd.f32 %v1559_v4, %v1540_v40 }
 0x21d   : > { %v1615_v27 = vadd.f32 %v1614_v3, %v1595_v2 }
 0x21e   : > { %v1579_v8 = vadd.f32 %v1578_v5, %v1560_v6 }
 0x220   : > { %v1708_v9 = vadd.f32 %v1579_v8, %v856_v7  ;;  %v1731_v7 = vld [vmem:[#allocation3 + $0x48] sm:$0xff] }
 0x222   : > { %1724 = vst [vmem:[#allocation2 + $0x70] sm:$0xff] %v1708_v9  ;;  %v1647_v14 = vpop.f32.mrf.mxu1 }
 0x223   : > { %v1597_v11 = vpop.f32.mrf.mxu2  ;;  %v1628_v49 = vpop.f32.mrf.mxu0 }
 0x224   : > { %v1616_v12 = vpop.f32.mrf.mxu3  ;;  %v1629_v54 = vadd.f32 %v1628_v49, %v1610_v10 }
 0x225   : > { %v1617_v40 = vadd.f32 %v1616_v12, %v1597_v11 }
 0x226   : > { %v1697_v15 = vadd.f32 %v1629_v54, %v845_v13 }
 0x228   : > { %1713 = vst [vmem:[#allocation2 + $0x58] sm:$0xff] %v1697_v15 }
 0x22a   : > { %v1649_v21 = vpop.f32.mrf.mxu1 }
 0x22b   : > { %v1666_v16 = vpop.f32.mrf.mxu2  ;;  %v1630_v20 = vpop.f32.mrf.mxu0 }
 0x22c   : > { %v1685_v17 = vpop.f32.mrf.mxu3  ;;  %v1667_v18 = vadd.f32 %v1666_v16, %v1647_v14  ;;  %v1631_v23 = vadd.f32 %v1630_v20, %v1612_v55  ;;  %v1735_v14 = vld [vmem:[#allocation3 + $0x20] sm:$0xff] }
 0x22d   : > { %v1739_v20 = vld [vmem:[#allocation3] sm:$0xff] }
 0x22e   : > { %v1686_v24 = vadd.f32 %v1685_v17, %v1667_v18  ;;  %v1701_v25 = vadd.f32 %v1631_v23, %v849_v19 }
 0x230   : > { %v1698_v26 = vadd.f32 %v1686_v24, %v846_v22  ;;  %1717 = vst [vmem:[#allocation2 + $0x8] sm:$0xff] %v1701_v25 }
 0x232   : > { %1714 = vst [vmem:[#allocation2 + $0x18] sm:$0xff] %v1698_v26  ;;  %v1652_v34 = vpop.f32.mrf.mxu1 }
 0x233   : > { %v1668_v28 = vpop.f32.mrf.mxu2  ;;  %v1633_v33 = vpop.f32.mrf.mxu0 }
 0x234   : > { %v1687_v29 = vpop.f32.mrf.mxu3  ;;  %v1669_v31 = vadd.f32 %v1668_v28, %v1649_v21  ;;  %v1634_v36 = vadd.f32 %v1633_v33, %v1615_v27  ;;  %v1728_v28 = vld [vmem:[#allocation3 + $0x68] sm:$0xff] }
 0x236   : > { %v1688_v37 = vadd.f32 %v1687_v29, %v1669_v31  ;;  %v1705_v38 = vadd.f32 %v1634_v36, %v853_v32 }
 0x238   : > { %v1702_v39 = vadd.f32 %v1688_v37, %v850_v35  ;;  %1721 = vst [vmem:[#allocation2 + $0x10] sm:$0xff] %v1705_v38  ;;  %v1732_v37 = vld [vmem:[#allocation3 + $0x30] sm:$0xff] }
 0x23a   : > { %1718 = vst [vmem:[#allocation2 + $0x48] sm:$0xff] %v1702_v39  ;;  %v1654_v46 = vpop.f32.mrf.mxu1 }
 0x23b   : > { %v1671_v41 = vpop.f32.mrf.mxu2  ;;  %v1635_v45 = vpop.f32.mrf.mxu0 }
 0x23c   : > { %v1690_v42 = vpop.f32.mrf.mxu3  ;;  %v1672_v43 = vadd.f32 %v1671_v41, %v1652_v34  ;;  %v1636_v48 = vadd.f32 %v1635_v45, %v1617_v40  ;;  %v1736_v45 = vld [vmem:[#allocation3 + $0x78] sm:$0xff] }
 0x23e   : > { %v1691_v50 = vadd.f32 %v1690_v42, %v1672_v43  ;;  %v1709_v51 = vadd.f32 %v1636_v48, %v857_v44 }
 0x240   : > { %v1706_v52 = vadd.f32 %v1691_v50, %v854_v47  ;;  %1725 = vst [vmem:[#allocation2 + $0x78] sm:$0xff] %v1709_v51 }
 0x242   : > { %1722 = vst [vmem:[#allocation2 + $0x38] sm:$0xff] %v1706_v52  ;;  %v2347_v59 = vpop.f32.mrf.mxu1 }
 0x243   : > { %v1673_v53 = vpop.f32.mrf.mxu2  ;;  %v2328_v58 = vpop.f32.mrf.mxu0 }
 0x244   : > { %v1692_v30 = vpop.f32.mrf.mxu3  ;;  %v1674_v57 = vadd.f32 %v1673_v53, %v1654_v46  ;;  %v2348_v0 = vadd.f32 %v2347_v59, %v2328_v58 }
 0x246   : > { %v1693_v63 = vadd.f32 %v1692_v30, %v1674_v57  ;;  %v1740_v30 = vld [vmem:[#allocation3 + $0x8] sm:$0xff] }
 0x248   : > { %v1710_v56 = vadd.f32 %v1693_v63, %v858_v60 }
 0x24a   : > { %1726 = vst [vmem:[#allocation2 + $0x28] sm:$0xff] %v1710_v56  ;;  %v2349_v4 = vpop.f32.mrf.mxu1  ;;  %v1729_v56 = vld [vmem:[#allocation3 + $0x10] sm:$0xff] }
 0x24b   : > { %v2366_v1 = vpop.f32.mrf.mxu2  ;;  %v2330_v3 = vpop.f32.mrf.mxu0 }
 0x24c   : > { %v2385_v62 = vpop.f32.mrf.mxu3  ;;  %v2367_v2 = vadd.f32 %v2366_v1, %v2348_v0  ;;  %v2350_v6 = vadd.f32 %v2349_v4, %v2330_v3 }
 0x24e   : > { %v2547_v5 = vadd.f32 %v2367_v2, %v1727_v61 }
 0x250   : > { %2563 = vst [vmem:[#allocation3 + $0x28] sm:$0xff] %v2547_v5 }
 0x252   : > { %v2352_v12 = vpop.f32.mrf.mxu1 }
 0x253   : > { %v2368_v8 = vpop.f32.mrf.mxu2  ;;  %v2333_v11 = vpop.f32.mrf.mxu0 }
 0x254   : > { %v2387_v9 = vpop.f32.mrf.mxu3  ;;  %v2369_v10 = vadd.f32 %v2368_v8, %v2350_v6  ;;  %v2353_v49 = vadd.f32 %v2352_v12, %v2333_v11  ;;  %v1733_v6 = vld [vmem:[#allocation3 + $0x70] sm:$0xff]  ;;  %v1730_v8 = vld [vmem:[#allocation3 + $0x40] sm:$0xff] }
 0x256   : > { %v2551_v13 = vadd.f32 %v2369_v10, %v1731_v7 }
 0x258   : > { %2567 = vst [vmem:[#allocation3 + $0x48] sm:$0xff] %v2551_v13 }
 0x25a   : > { %v2354_v17 = vpop.f32.mrf.mxu1 }
 0x25b   : > { %v2371_v54 = vpop.f32.mrf.mxu2  ;;  %v2335_v16 = vpop.f32.mrf.mxu0 }
 0x25c   : > { %v2390_v15 = vpop.f32.mrf.mxu3  ;;  %v2372_v55 = vadd.f32 %v2371_v54, %v2353_v49  ;;  %v2355_v19 = vadd.f32 %v2354_v17, %v2335_v16  ;;  %v1734_v17 = vld [vmem:[#allocation3 + $0x38] sm:$0xff] }
 0x25e   : > { %v2555_v18 = vadd.f32 %v2372_v55, %v1735_v14  ;;  %v1737_v55 = vld [vmem:[#allocation3 + $0x18] sm:$0xff] }
 0x260   : > { %2571 = vst [vmem:[#allocation3 + $0x20] sm:$0xff] %v2555_v18 }
 0x262   : > { %v2423_v25 = vpop.f32.mrf.mxu1 }
 0x263   : > { %v2373_v21 = vpop.f32.mrf.mxu2  ;;  %v2404_v24 = vpop.f32.mrf.mxu0 }
 0x264   : > { %v2392_v22 = vpop.f32.mrf.mxu3  ;;  %v2374_v23 = vadd.f32 %v2373_v21, %v2355_v19  ;;  %v2405_v26 = vadd.f32 %v2404_v24, %v2385_v62 }
 0x266   : > { %v2559_v27 = vadd.f32 %v2374_v23, %v1739_v20  ;;  %v2424_v29 = vadd.f32 %v2423_v25, %v2405_v26 }
 0x268   : > { %2575 = vst [vmem:[#allocation3] sm:$0xff] %v2559_v27  ;;  %v2548_v31 = vadd.f32 %v2424_v29, %v1728_v28  ;;  %v1741_v27 = vld [vmem:[#allocation3 + $0x60] sm:$0xff]  ;;  %v1738_v29 = vld [vmem:[#allocation3 + $0x58] sm:$0xff] }
 0x26a   : > { %2564 = vst [vmem:[#allocation3 + $0x68] sm:$0xff] %v2548_v31  ;;  %v2425_v35 = vpop.f32.mrf.mxu1 }
 0x26b   : > { %v2442_v32 = vpop.f32.mrf.mxu2  ;;  %v2406_v34 = vpop.f32.mrf.mxu0 }
 0x26c   : > { %v2461_v33 = vpop.f32.mrf.mxu3  ;;  %v2407_v36 = vadd.f32 %v2406_v34, %v2387_v9 }
 0x26d   : > { %v2462_v59 = vadd.f32 %v2461_v33, %v2442_v32 }
 0x26e   : > { %v2426_v38 = vadd.f32 %v2425_v35, %v2407_v36 }
 0x270   : > { %v2552_v39 = vadd.f32 %v2426_v38, %v1732_v37  ;;  %v1742_v38 = vld [vmem:[#allocation3 + $0x50] sm:$0xff] }
 0x272   : > { %2568 = vst [vmem:[#allocation3 + $0x30] sm:$0xff] %v2552_v39  ;;  %v2428_v43 = vpop.f32.mrf.mxu1 }
 0x273   : > { %v2444_v40 = vpop.f32.mrf.mxu2  ;;  %v2409_v42 = vpop.f32.mrf.mxu0 }
 0x274   : > { %v2463_v41 = vpop.f32.mrf.mxu3  ;;  %v2410_v44 = vadd.f32 %v2409_v42, %v2390_v15 }
 0x275   : > { %v2464_v2 = vadd.f32 %v2463_v41, %v2444_v40 }
 0x276   : > { %v2429_v46 = vadd.f32 %v2428_v43, %v2410_v44 }
 0x278   : > { %v2556_v47 = vadd.f32 %v2429_v46, %v1736_v45 }
 0x27a   : > { %2572 = vst [vmem:[#allocation3 + $0x78] sm:$0xff] %v2556_v47  ;;  %v2430_v52 = vpop.f32.mrf.mxu1 }
 0x27b   : > { %v2447_v48 = vpop.f32.mrf.mxu2  ;;  %v2411_v51 = vpop.f32.mrf.mxu0 }
 0x27c   : > { %v2466_v50 = vpop.f32.mrf.mxu3  ;;  %v2412_v53 = vadd.f32 %v2411_v51, %v2392_v22 }
 0x27d   : > { %v2467_v49 = vadd.f32 %v2466_v50, %v2447_v48 }
 0x27e   : > { %v2431_v57 = vadd.f32 %v2430_v52, %v2412_v53 }
 0x280   : > { %v2560_v58 = vadd.f32 %v2431_v57, %v1740_v30 }
 0x282   : > { %2576 = vst [vmem:[#allocation3 + $0x8] sm:$0xff] %v2560_v58  ;;  %v2499_v1 = vpop.f32.mrf.mxu1 }
 0x283   : > { %v2449_v60 = vpop.f32.mrf.mxu2  ;;  %v2480_v0 = vpop.f32.mrf.mxu0 }
 0x284   : > { %v2468_v63 = vpop.f32.mrf.mxu3  ;;  %v2481_v61 = vadd.f32 %v2480_v0, %v2462_v59 }
 0x285   : > { %v2469_v23 = vadd.f32 %v2468_v63, %v2449_v60 }
 0x286   : > { %v2549_v62 = vadd.f32 %v2481_v61, %v1729_v56 }
 0x288   : > { %2565 = vst [vmem:[#allocation3 + $0x10] sm:$0xff] %v2549_v62 }
 0x28a   : > { %v2501_v12 = vpop.f32.mrf.mxu1 }
 0x28b   : > { %v2518_v3 = vpop.f32.mrf.mxu2  ;;  %v2482_v7 = vpop.f32.mrf.mxu0 }
 0x28c   : > { %v2537_v4 = vpop.f32.mrf.mxu3  ;;  %v2519_v5 = vadd.f32 %v2518_v3, %v2499_v1  ;;  %v2483_v9 = vadd.f32 %v2482_v7, %v2464_v2 }
 0x28e   : > { %v2538_v10 = vadd.f32 %v2537_v4, %v2519_v5  ;;  %v2553_v11 = vadd.f32 %v2483_v9, %v1733_v6 }
 0x290   : > { %v2550_v13 = vadd.f32 %v2538_v10, %v1730_v8  ;;  %2569 = vst [vmem:[#allocation3 + $0x70] sm:$0xff] %v2553_v11 }
 0x292   : > { %2566 = vst [vmem:[#allocation3 + $0x40] sm:$0xff] %v2550_v13  ;;  %v2504_v22 = vpop.f32.mrf.mxu1 }
 0x293   : > { %v2520_v14 = vpop.f32.mrf.mxu2  ;;  %v2485_v16 = vpop.f32.mrf.mxu0 }
 0x294   : > { %v2539_v54 = vpop.f32.mrf.mxu3  ;;  %v2521_v15 = vadd.f32 %v2520_v14, %v2501_v12  ;;  %v2486_v18 = vadd.f32 %v2485_v16, %v2467_v49 }
 0x296   : > { %v2540_v19 = vadd.f32 %v2539_v54, %v2521_v15  ;;  %v2557_v20 = vadd.f32 %v2486_v18, %v1737_v55 }
 0x298   : > { %v2554_v21 = vadd.f32 %v2540_v19, %v1734_v17  ;;  %2573 = vst [vmem:[#allocation3 + $0x18] sm:$0xff] %v2557_v20 }
 0x29a   : > { %2570 = vst [vmem:[#allocation3 + $0x38] sm:$0xff] %v2554_v21  ;;  %v2506_v35 = vpop.f32.mrf.mxu1 }
 0x29b   : > { %v2523_v24 = vpop.f32.mrf.mxu2  ;;  %v2487_v28 = vpop.f32.mrf.mxu0 }
 0x29c   : > { %v2542_v25 = vpop.f32.mrf.mxu3  ;;  %v2524_v26 = vadd.f32 %v2523_v24, %v2504_v22  ;;  %v2488_v31 = vadd.f32 %v2487_v28, %v2469_v23 }
 0x29e   : > { %v2543_v32 = vadd.f32 %v2542_v25, %v2524_v26  ;;  %v2561_v33 = vadd.f32 %v2488_v31, %v1741_v27 }
 0x2a0   : > { %v2558_v34 = vadd.f32 %v2543_v32, %v1738_v29  ;;  %2577 = vst [vmem:[#allocation3 + $0x60] sm:$0xff] %v2561_v33 }
 0x2a2   : > { %2574 = vst [vmem:[#allocation3 + $0x58] sm:$0xff] %v2558_v34 }
 0x2a3   : > { %v2525_v36 = vpop.f32.mrf.mxu2 }
 0x2a4   : > { %v2526_v37 = vadd.f32 %v2525_v36, %v2506_v35  ;;  %v2544_v39 = vpop.f32.mrf.mxu3 }
 0x2a6   : > { %v2545_v40 = vadd.f32 %v2544_v39, %v2526_v37  ;;  %2582 = sbr.rel (%p5640_p4) target bundleno = 1128 (0x468), region = 120 }
 0x2a8   : > { %v2562_v41 = vadd.f32 %v2545_v40, %v1742_v38 }
 0x2aa   : > { %2578 = vst [vmem:[#allocation3 + $0x50] sm:$0xff] %v2562_v41 }
 0x2ab   : > { %v5827_v42 = vld [vmem:[%s7571_s6 + $0x150] sm:$0xf]  ;;  %v6674_v43 = vld [vmem:[%s7571_s6 + $0x164] sm:$0xf0]  ;;  %v5803_v30 = vld [vmem:[%s7571_s6 + $0x120] sm:$0xf] }
 0x2ac   : > { %v6019_v44 = vld [vmem:[%s7571_s6 + $0x2d0] sm:$0xf]  ;;  %v5828_v45 = vor.u32 %v6674_v43, %v5827_v42  ;;  %v6722_v46 = vld [vmem:[%s7571_s6 + $0x2e4] sm:$0xf0]  ;;  %v6668_v58 = vld [vmem:[%s7571_s6 + $0x134] sm:$0xf0] }
 0x2ad   : > { %v6211_v47 = vld [vmem:[%s7571_s6 + $0x450] sm:$0xf]  ;;  %v6770_v48 = vld [vmem:[%s7571_s6 + $0x464] sm:$0xf0]  ;;  %v6020_v50 = vor.u32 %v6722_v46, %v6019_v44  ;;  %v5995_v59 = vld [vmem:[%s7571_s6 + $0x2a0] sm:$0xf]  ;;  %v5804_v63 = vor.u32 %v6668_v58, %v5803_v30 }
 0x2ae   : > { %v6212_v51 = vor.u32 %v6770_v48, %v6211_v47  ;;  %v6403_v52 = vld [vmem:[%s7571_s6 + $0x5d0] sm:$0xf]  ;;  %v6818_v53 = vld [vmem:[%s7571_s6 + $0x5e4] sm:$0xf0]  ;;  %4135 = vmatpush.bf16.msra.mxu0 %v5828_v45  ;;  %v6716_v60 = vld [vmem:[%s7571_s6 + $0x2b4] sm:$0xf0] }
 0x2af   : > { %v6404_v57 = vor.u32 %v6818_v53, %v6403_v52  ;;  %4154 = vmatpush.bf16.msra.mxu1 %v6020_v50  ;;  %v5996_v56 = vor.u32 %v6716_v60, %v5995_v59  ;;  %v6187_v0 = vld [vmem:[%s7571_s6 + $0x420] sm:$0xf]  ;;  %v6764_v61 = vld [vmem:[%s7571_s6 + $0x434] sm:$0xf0]  ;;  %v5779_v3 = vld [vmem:[%s7571_s6 + $0xf0] sm:$0xf] }
 0x2b0   : > { %4173 = vmatpush.bf16.msra.mxu2 %v6212_v51  ;;  %v6379_v1 = vld [vmem:[%s7571_s6 + $0x5a0] sm:$0xf]  ;;  %v6188_v62 = vor.u32 %v6764_v61, %v6187_v0  ;;  %v6812_v2 = vld [vmem:[%s7571_s6 + $0x5b4] sm:$0xf0]  ;;  %v6662_v4 = vld [vmem:[%s7571_s6 + $0x104] sm:$0xf0] }
 0x2b1   : > { %4192 = vmatpush.bf16.msra.mxu3 %v6404_v57  ;;  %v6380_v5 = vor.u32 %v6812_v2, %v6379_v1  ;;  %v5971_v6 = vld [vmem:[%s7571_s6 + $0x270] sm:$0xf]  ;;  %v6710_v7 = vld [vmem:[%s7571_s6 + $0x284] sm:$0xf0]  ;;  %v5780_v9 = vor.u32 %v6662_v4, %v5779_v3  ;;  %v5755_v14 = vld [vmem:[%s7571_s6 + $0xc0] sm:$0xf] }
 0x2b2   : > { %v6163_v8 = vld [vmem:[%s7571_s6 + $0x3f0] sm:$0xf]  ;;  %4136 = vmatpush.bf16.msra.mxu0 %v5804_v63  ;;  %v6758_v10 = vld [vmem:[%s7571_s6 + $0x404] sm:$0xf0]  ;;  %v5972_v13 = vor.u32 %v6710_v7, %v5971_v6  ;;  %v6656_v54 = vld [vmem:[%s7571_s6 + $0xd4] sm:$0xf0] }
 0x2b3   : > { %v6355_v11 = vld [vmem:[%s7571_s6 + $0x570] sm:$0xf]  ;;  %v6806_v12 = vld [vmem:[%s7571_s6 + $0x584] sm:$0xf0]  ;;  %4155 = vmatpush.bf16.msra.mxu1 %v5996_v56  ;;  %v6164_v49 = vor.u32 %v6758_v10, %v6163_v8  ;;  %v5947_v15 = vld [vmem:[%s7571_s6 + $0x240] sm:$0xf]  ;;  %v5756_v21 = vor.u32 %v6656_v54, %v5755_v14 }
 0x2b4   : > { %4174 = vmatpush.bf16.msra.mxu2 %v6188_v62  ;;  %v6356_v55 = vor.u32 %v6806_v12, %v6355_v11  ;;  %v6704_v16 = vld [vmem:[%s7571_s6 + $0x254] sm:$0xf0]  ;;  %v6139_v17 = vld [vmem:[%s7571_s6 + $0x3c0] sm:$0xf]  ;;  %v5731_v24 = vld [vmem:[%s7571_s6 + $0x90] sm:$0xf] }
 0x2b5   : > { %4193 = vmatpush.bf16.msra.mxu3 %v6380_v5  ;;  %v6752_v18 = vld [vmem:[%s7571_s6 + $0x3d4] sm:$0xf0]  ;;  %v6331_v19 = vld [vmem:[%s7571_s6 + $0x540] sm:$0xf]  ;;  %v5948_v22 = vor.u32 %v6704_v16, %v5947_v15  ;;  %v6650_v25 = vld [vmem:[%s7571_s6 + $0xa4] sm:$0xf0] }
 0x2b6   : > { %v6800_v20 = vld [vmem:[%s7571_s6 + $0x554] sm:$0xf0]  ;;  %4137 = vmatpush.bf16.msra.mxu0 %v5780_v9  ;;  %v6140_v23 = vor.u32 %v6752_v18, %v6139_v17  ;;  %v5923_v26 = vld [vmem:[%s7571_s6 + $0x210] sm:$0xf]  ;;  %v6698_v28 = vld [vmem:[%s7571_s6 + $0x224] sm:$0xf0]  ;;  %v5732_v34 = vor.u32 %v6650_v25, %v5731_v24 }
 0x2b7   : > { %4156 = vmatpush.bf16.msra.mxu1 %v5972_v13  ;;  %v6332_v27 = vor.u32 %v6800_v20, %v6331_v19  ;;  %v6115_v29 = vld [vmem:[%s7571_s6 + $0x390] sm:$0xf]  ;;  %v6746_v31 = vld [vmem:[%s7571_s6 + $0x3a4] sm:$0xf0]  ;;  %v5924_v35 = vor.u32 %v6698_v28, %v5923_v26  ;;  %v5707_v37 = vld [vmem:[%s7571_s6 + $0x60] sm:$0xf] }
 0x2b8   : > { %4175 = vmatpush.bf16.msra.mxu2 %v6164_v49  ;;  %v6307_v32 = vld [vmem:[%s7571_s6 + $0x510] sm:$0xf]  ;;  %v6794_v33 = vld [vmem:[%s7571_s6 + $0x524] sm:$0xf0]  ;;  %v6116_v36 = vor.u32 %v6746_v31, %v6115_v29  ;;  %v6644_v38 = vld [vmem:[%s7571_s6 + $0x74] sm:$0xf0] }
 0x2b9   : > { %4194 = vmatpush.bf16.msra.mxu3 %v6356_v55  ;;  %v5899_v39 = vld [vmem:[%s7571_s6 + $0x1e0] sm:$0xf]  ;;  %v6308_v40 = vor.u32 %v6794_v33, %v6307_v32  ;;  %v6692_v41 = vld [vmem:[%s7571_s6 + $0x1f4] sm:$0xf0]  ;;  %v5683_v46 = vld [vmem:[%s7571_s6 + $0x30] sm:$0xf]  ;;  %v5708_v47 = vor.u32 %v6644_v38, %v5707_v37 }
 0x2ba   : > { %4138 = vmatpush.bf16.msra.mxu0 %v5756_v21  ;;  %v6091_v42 = vld [vmem:[%s7571_s6 + $0x360] sm:$0xf]  ;;  %v6740_v43 = vld [vmem:[%s7571_s6 + $0x374] sm:$0xf0]  ;;  %v6638_v48 = vld [vmem:[%s7571_s6 + $0x44] sm:$0xf0]  ;;  %v5900_v52 = vor.u32 %v6692_v41, %v5899_v39 }
 0x2bb   : > { %4157 = vmatpush.bf16.msra.mxu1 %v5948_v22  ;;  %v6283_v44 = vld [vmem:[%s7571_s6 + $0x4e0] sm:$0xf]  ;;  %v6788_v45 = vld [vmem:[%s7571_s6 + $0x4f4] sm:$0xf0]  ;;  %v5875_v50 = vld [vmem:[%s7571_s6 + $0x1b0] sm:$0xf]  ;;  %v6092_v53 = vor.u32 %v6740_v43, %v6091_v42  ;;  %v5684_v2 = vor.u32 %v6638_v48, %v5683_v46 }
 0x2bc   : > { %4176 = vmatpush.bf16.msra.mxu2 %v6140_v23  ;;  %v6686_v51 = vld [vmem:[%s7571_s6 + $0x1c4] sm:$0xf0]  ;;  %v6067_v30 = vld [vmem:[%s7571_s6 + $0x330] sm:$0xf]  ;;  %v6284_v59 = vor.u32 %v6788_v45, %v6283_v44  ;;  %v5659_v0 = vld [vmem:[%s7571_s6] sm:$0xf] }
 0x2bd   : > { %4195 = vmatpush.bf16.msra.mxu3 %v6332_v27  ;;  %v6734_v57 = vld [vmem:[%s7571_s6 + $0x344] sm:$0xf0]  ;;  %v6259_v58 = vld [vmem:[%s7571_s6 + $0x4b0] sm:$0xf]  ;;  %v6632_v61 = vld [vmem:[%s7571_s6 + $0x14] sm:$0xf0]  ;;  %v5876_v3 = vor.u32 %v6686_v51, %v5875_v50 }
 0x2be   : > { %4139 = vmatpush.bf16.msra.mxu0 %v5732_v34  ;;  %v6782_v60 = vld [vmem:[%s7571_s6 + $0x4c4] sm:$0xf0]  ;;  %v8099_v63 = vld [vmem:[#allocation2 + $0x30] sm:$0xff]  ;;  %v5851_v4 = vld [vmem:[%s7571_s6 + $0x180] sm:$0xf]  ;;  %v6068_v10 = vor.u32 %v6734_v57, %v6067_v30  ;;  %v5660_v18 = vor.u32 %v6632_v61, %v5659_v0 }
 0x2bf   : > { %4158 = vmatpush.bf16.msra.mxu1 %v5924_v35  ;;  %v8101_v56 = vld [vmem:[#allocation2 + $0x50] sm:$0xff]  ;;  %v5641_v1 = vmul.f32 -1.442695, %v8099_v63  ;;  %v6680_v5 = vld [vmem:[%s7571_s6 + $0x194] sm:$0xf0]  ;;  %v8111_v8 = vld [vmem:[#allocation2] sm:$0xff]  ;;  %v6260_v49 = vor.u32 %v6782_v60, %v6259_v58 }
 0x2c0   : > { %4177 = vmatpush.bf16.msra.mxu2 %v6116_v36  ;;  %v5645_v62 = vmul.f32 -1.442695, %v8101_v56  ;;  %v6043_v6 = vld [vmem:[%s7571_s6 + $0x300] sm:$0xf]  ;;  %v6728_v7 = vld [vmem:[%s7571_s6 + $0x314] sm:$0xf0]  ;;  %v5852_v19 = vor.u32 %v6680_v5, %v5851_v4 }
 0x2c1   : > { %4196 = vmatpush.bf16.msra.mxu3 %v6308_v40  ;;  %v8113_v9 = vld [vmem:[#allocation2 + $0x68] sm:$0xff]  ;;  %6905 = vpow2.f32 %v5641_v1  ;;  %v5642_v11 = vmul.f32 -1.442695, %v8111_v8  ;;  %v8117_v13 = vld [vmem:[#allocation2 + $0x58] sm:$0xff]  ;;  %v6235_v14 = vld [vmem:[%s7571_s6 + $0x480] sm:$0xf]  ;;  %v6044_v20 = vor.u32 %v6728_v7, %v6043_v6 }
 0x2c2   : > { %4140 = vmatpush.bf16.msra.mxu0 %v5708_v47  ;;  %v5646_v12 = vmul.f32 -1.442695, %v8113_v9  ;;  %6907 = vpow2.f32 %v5645_v62  ;;  %v8120_v54 = vld [vmem:[#allocation2 + $0x8] sm:$0xff]  ;;  %v5643_v15 = vmul.f32 -1.442695, %v8117_v13  ;;  %v8125_v17 = vld [vmem:[#allocation2 + $0x18] sm:$0xff] }
 0x2c3   : > { %4159 = vmatpush.bf16.msra.mxu1 %v5900_v52  ;;  %v6776_v55 = vld [vmem:[%s7571_s6 + $0x494] sm:$0xf0]  ;;  %6909 = vpow2.f32 %v5642_v11  ;;  %v5647_v16 = vmul.f32 -1.442695, %v8120_v54  ;;  %v5644_v21 = vmul.f32 -1.442695, %v8125_v17 }
 0x2c4   : > { %4178 = vmatpush.bf16.msra.mxu2 %v6092_v53  ;;  %6911 = vpow2.f32 %v5646_v12  ;;  %v6236_v22 = vor.u32 %v6776_v55, %v6235_v14  ;;  %v8128_v23 = vld [vmem:[#allocation2 + $0x48] sm:$0xff]  ;;  %v8132_v27 = vld [vmem:[#allocation2 + $0x40] sm:$0xff]  ;;  %v8350_v58 = vld [vmem:[%s7571_s6 + $0xf4] sm:$0xf] }
 0x2c5   : > { %4197 = vmatpush.bf16.msra.mxu3 %v6284_v59  ;;  %6913 = vpow2.f32 %v5643_v15  ;;  %v8134_v28 = vld [vmem:[#allocation2 + $0x60] sm:$0xff]  ;;  %v5648_v32 = vmul.f32 -1.442695, %v8128_v23  ;;  %v8146_v38 = vmul.f32 -1.442695, %v8132_v27 }
 0x2c6   : > { %4141 = vmatpush.bf16.msra.mxu0 %v5684_v2  ;;  %6915 = vpow2.f32 %v5647_v16  ;;  %v8141_v35 = vld [vmem:[#allocation2 + $0x20] sm:$0xff]  ;;  %v8149_v39 = vmul.f32 -1.442695, %v8134_v28 }
 0x2c7   : > { %4160 = vmatpush.bf16.msra.mxu1 %v5876_v3  ;;  %v6906_v24 = vpop.eup %6905  ;;  %6917 = vpow2.f32 %v5644_v21  ;;  %v8161_v46 = vmul.f32 -1.442695, %v8141_v35 }
 0x2c8   : > { %4179 = vmatpush.bf16.msra.mxu2 %v6068_v10  ;;  %v6908_v25 = vpop.eup %6907  ;;  %v8130_v26 = vadd.f32 1.0, %v6906_v24 }
 0x2c9   : > { %4198 = vmatpush.bf16.msra.mxu3 %v6260_v49  ;;  %v6910_v29 = vpop.eup %6909  ;;  %v8136_v31 = vadd.f32 1.0, %v6908_v25 }
 0x2ca   : > { %4142 = vmatpush.bf16.msra.mxu0 %v5660_v18  ;;  %v6912_v33 = vpop.eup %6911  ;;  %6919 = vrcp.f32 %v8130_v26  ;;  %v2690_v34 = vand.u32 2147483648, %v8130_v26  ;;  %v2688_v37 = vand.u32 2147483647, %v8130_v26  ;;  %v8153_v43 = vadd.f32 1.0, %v6910_v29  ;;  %v2601_v29 = vld [vmem:[#allocation3 + $0x10] sm:$0xff] }
 0x2cb   : > { %4161 = vmatpush.bf16.msra.mxu1 %v5852_v19  ;;  %v6914_v36 = vpop.eup %6913  ;;  %6921 = vrcp.f32 %v8136_v31  ;;  %v2748_v41 = vand.u32 2147483647, %v8136_v31  ;;  %v2750_v42 = vand.u32 2147483648, %v8136_v31  ;;  %v8155_v44 = vadd.f32 1.0, %v6912_v33  ;;  %v6767_v33 = vld [vmem:[%s7571_s6 + $0x454] sm:$0xf] }
 0x2cc   : > { %4180 = vmatpush.bf16.msra.mxu2 %v6044_v20  ;;  %v6916_v40 = vpop.eup %6915  ;;  %vm2684_vm0 = vweird.f32 %v8130_v26  ;;  %v8158_v45 = vadd.f32 1.0, %v6914_v36  ;;  %6923 = vpow2.f32 %v5648_v32  ;;  %v8163_v47 = vor.u32 1.1754944e-38, %v2690_v34  ;;  %v6213_v34 = vld [vmem:[%s7571_s6 + $0x468] sm:$0xf0] }
 0x2cd   : > { %4199 = vmatpush.bf16.msra.mxu3 %v6236_v22  ;;  %vm2744_vm1 = vweird.f32 %v8136_v31  ;;  %6925 = vrcp.f32 %v8153_v43  ;;  %v2705_v48 = vand.u32 2147483648, %v8153_v43  ;;  %v6918_v50 = vpop.eup %6917  ;;  %vm8168_vm2 = vcmp.eq.f32.partialorder %v2688_v37, 8.507059e+37 }
 0x2ce   : > { %v2703_v52 = vand.u32 2147483647, %v8153_v43  ;;  %6927 = vrcp.f32 %v8155_v44  ;;  %v2765_v53 = vand.u32 2147483648, %v8155_v44  ;;  %v8175_v30 = vadd.f32 1.0, %v6916_v40  ;;  %v6381_v40 = vld [vmem:[%s7571_s6 + $0x5b8] sm:$0xf0] }
 0x2cf   : > { %vm8177_vm3 = vcmp.eq.f32.partialorder %v2748_v41, 8.507059e+37  ;;  %v2751_v59 = vor.u32 1.1754944e-38, %v2750_v42  ;;  %v2763_v60 = vand.u32 2147483647, %v8155_v44  ;;  %6929 = vrcp.f32 %v8158_v45 }
 0x2d0   : > { %v6920_v57 = vpop.eup %6919  ;;  %vm2699_vm4 = vweird.f32 %v8153_v43  ;;  %v8185_v1 = vor.u32 1.1754944e-38, %v2705_v48  ;;  %vm2759_vm5 = vweird.f32 %v8155_v44  ;;  %vm2714_vm6 = vweird.f32 %v8158_v45 }
 0x2d1   : > { %v6922_v0 = vpop.eup %6921  ;;  %v2680_v61 = vmul.f32 %v6920_v57, %v8130_v26  ;;  %v2718_v2 = vand.u32 2147483647, %v8158_v45  ;;  %v2720_v3 = vand.u32 2147483648, %v8158_v45  ;;  %vm2685_vm7 = vweird.f32 %v6920_v57 }
 0x2d2   : > { %v2740_v62 = vmul.f32 %v6922_v0, %v8136_v31  ;;  %v6924_v4 = vpop.eup %6923  ;;  %vm8192_vm8 = vcmp.eq.f32.partialorder %v2703_v52, 8.507059e+37  ;;  %v8196_v7 = vor.u32 1.1754944e-38, %v2765_v53  ;;  %6931 = vrcp.f32 %v8175_v30  ;;  %vm8214_vm13 = vmor %vm2684_vm0, %vm2685_vm7 }
 0x2d3   : > { %v2681_v5 = vsub.f32 1.0, %v2680_v61  ;;  %v6926_v10 = vpop.eup %6925  ;;  %vm2745_vm9 = vweird.f32 %v6922_v0  ;;  %vm8199_vm10 = vcmp.eq.f32.partialorder %v2763_v60, 8.507059e+37  ;;  %v2778_v49 = vand.u32 2147483647, %v8175_v30  ;;  %v2599_v61 = vld [vmem:[#allocation3 + $0x28] sm:$0xff] }
 0x2d4   : > { %v2741_v11 = vsub.f32 1.0, %v2740_v62  ;;  %v6928_v14 = vpop.eup %6927  ;;  %v2695_v55 = vmul.f32 %v6926_v10, %v8153_v43  ;;  %vm8206_vm12 = vcmp.eq.f32.partialorder %v2718_v2, 8.507059e+37  ;;  %v2721_v18 = vor.u32 1.1754944e-38, %v2720_v3  ;;  %vm8222_vm11 = vmor %vm2744_vm1, %vm2745_vm9 }
 0x2d5   : > { %v2682_v15 = vmul.f32 %v6920_v57, %v2681_v5  ;;  %v2780_v19 = vand.u32 2147483648, %v8175_v30  ;;  %v6930_v20 = vpop.eup %6929  ;;  %vm2700_vm14 = vweird.f32 %v6926_v10  ;;  %v2755_v24 = vmul.f32 %v6928_v14, %v8155_v44 }
 0x2d6   : > { %v2742_v22 = vmul.f32 %v6922_v0, %v2741_v11  ;;  %vm2760_vm15 = vweird.f32 %v6928_v14  ;;  %v2696_v32 = vsub.f32 1.0, %v2695_v55  ;;  %v2710_v26 = vmul.f32 %v6930_v20, %v8158_v45  ;;  %vm8249_vm1 = vmor %vm2699_vm4, %vm2700_vm14 }
 0x2d7   : > { %v2683_v25 = vadd.f32 %v6920_v57, %v2682_v15  ;;  %vm2715_vm0 = vweird.f32 %v6930_v20  ;;  %v2756_v37 = vsub.f32 1.0, %v2755_v24  ;;  %vm8229_vm7 = vcmp.eq.f32.partialorder %v2778_v49, 8.507059e+37  ;;  %v2604_v24 = vld [vmem:[#allocation3 + $0x30] sm:$0xff] }
 0x2d8   : > { %v2743_v36 = vadd.f32 %v6922_v0, %v2742_v22  ;;  %v8233_v41 = vadd.f32 1.0, %v6918_v50  ;;  %v8235_v42 = vadd.f32 1.0, %v6924_v4  ;;  %v8237_v31 = vpop.eup %6931  ;;  %v2697_v52 = vmul.f32 %v6926_v10, %v2696_v32  ;;  %v2603_v4 = vld [vmem:[#allocation3 + $0x48] sm:$0xff]  ;;  %vm8269_vm4 = vmor %vm2714_vm6, %vm2715_vm0 }
 0x2d9   : > { %v2687_v48 = vsel %vm8214_vm13, %v6920_v57, %v2683_v25  ;;  %v2711_v53 = vsub.f32 1.0, %v2710_v26  ;;  %v6216_v60 = vor.u32 %v6767_v33, %v6213_v34  ;;  %v2757_v3 = vmul.f32 %v6928_v14, %v2756_v37  ;;  %v5829_v26 = vld [vmem:[%s7571_s6 + $0x168] sm:$0xf0] }
 0x2da   : > { %v2692_v62 = vsel %vm8168_vm2, %v8163_v47, %v2687_v48  ;;  %v2747_v2 = vsel %vm8222_vm11, %v6922_v0, %v2743_v36  ;;  %v2770_v57 = vmul.f32 %v8237_v31, %v8175_v30  ;;  %v2698_v51 = vadd.f32 %v6926_v10, %v2697_v52  ;;  %vm8261_vm2 = vmor %vm2759_vm5, %vm2760_vm15  ;;  %v6021_v33 = vld [vmem:[%s7571_s6 + $0x2e8] sm:$0xf0]  ;;  %v6815_v36 = vld [vmem:[%s7571_s6 + $0x5d4] sm:$0xf] }
 0x2db   : > { %v2752_v5 = vsel %vm8177_vm3, %v2751_v59, %v2747_v2  ;;  %v2919_v47 = vmul.f32 %v2692_v62, %v8099_v63  ;;  %v2712_v0 = vmul.f32 %v6930_v20, %v2711_v53  ;;  %4249 = vmatpush.bf16.msrb.mxu2 %v6216_v60  ;;  %v2758_v49 = vadd.f32 %v6928_v14, %v2757_v3  ;;  %v6405_v37 = vld [vmem:[%s7571_s6 + $0x5e8] sm:$0xf0]  ;;  %v6761_v48 = vld [vmem:[%s7571_s6 + $0x424] sm:$0xf]  ;;  %v8323_v52 = vld [vmem:[%s7571_s6 + $0x138] sm:$0xf0] }
 0x2dc   : > { %v2923_v11 = vmul.f32 %v2752_v5, %v8101_v56  ;;  %v2771_v63 = vsub.f32 1.0, %v2770_v57  ;;  %vm2775_vm3 = vweird.f32 %v8237_v31  ;;  %v2702_v59 = vsel %vm8249_vm1, %v6926_v10, %v2698_v51  ;;  %v2600_v56 = vld [vmem:[#allocation3 + $0x68] sm:$0xff]  ;;  %v5997_v53 = vld [vmem:[%s7571_s6 + $0x2b8] sm:$0xf0]  ;;  %v8336_v3 = vld [vmem:[%s7571_s6 + $0x5a4] sm:$0xf] }
 0x2dd   : > { %v2935_v44 = vmul.f32 %v2919_v47, %v2599_v61  ;;  %v2713_v15 = vadd.f32 %v6930_v20, %v2712_v0  ;;  %6933 = vrcp.f32 %v8233_v41  ;;  %v2707_v45 = vsel %vm8192_vm8, %v8185_v1, %v2702_v59  ;;  %v2605_v61 = vld [vmem:[#allocation3 + $0x70] sm:$0xff]  ;;  %v6165_v51 = vld [vmem:[%s7571_s6 + $0x408] sm:$0xf0] }
 0x2de   : > { %v2939_v55 = vmul.f32 %v2923_v11, %v2603_v4  ;;  %v2762_v21 = vsel %vm8261_vm2, %v6928_v14, %v2758_v49  ;;  %v2772_v22 = vmul.f32 %v8237_v31, %v2771_v63  ;;  %v2920_v25 = vmul.f32 %v2707_v45, %v8111_v8  ;;  %v6755_v47 = vld [vmem:[%s7571_s6 + $0x3f4] sm:$0xf] }
 0x2df   : > { %v2767_v10 = vsel %vm8199_vm10, %v8196_v7, %v2762_v21  ;;  %v2717_v1 = vsel %vm8269_vm4, %v6930_v20, %v2713_v15  ;;  %vm9129_vm5 = vweird.f32 %v8175_v30  ;;  %v2781_v12 = vor.u32 1.1754944e-38, %v2780_v19  ;;  %v6671_v20 = vld [vmem:[%s7571_s6 + $0x154] sm:$0xf]  ;;  %v8354_v15 = vld [vmem:[%s7571_s6 + $0x108] sm:$0xf0] }
 0x2e0   : > { %vm8293_vm6 = vmor %vm9129_vm5, %vm2775_vm3  ;;  %v8297_v7 = vpack.c.bf16 %v2939_v55, %v2935_v44  ;;  %v2924_v8 = vmul.f32 %v2767_v10, %v8113_v9  ;;  %v2722_v14 = vsel %vm8206_vm12, %v2721_v18, %v2717_v1  ;;  %v2773_v32 = vadd.f32 %v8237_v31, %v2772_v22  ;;  %v6719_v30 = vld [vmem:[%s7571_s6 + $0x2d4] sm:$0xf]  ;;  %v6189_v9 = vld [vmem:[%s7571_s6 + $0x438] sm:$0xf0] }
 0x2e1   : > { %v2936_v34 = vmul.f32 %v2920_v25, %v2600_v56  ;;  %v2921_v19 = vmul.f32 %v2722_v14, %v8117_v13  ;;  %6935 = vpow2.f32 %v8146_v38  ;;  %vm2729_vm8 = vweird.f32 %v8233_v41  ;;  %v8320_v13 = vld [vmem:[%s7571_s6 + $0x124] sm:$0xf]  ;;  %v8357_v55 = vld [vmem:[%s7571_s6 + $0x274] sm:$0xf]  ;;  %v6141_v14 = vld [vmem:[%s7571_s6 + $0x3d8] sm:$0xf0] }
 0x2e2   : > { %4143 = vmatmul.bf16.vlgmr.msra.gmra.mxu0 %v8297_v7  ;;  %v2940_v16 = vmul.f32 %v2924_v8, %v2604_v24  ;;  %v2777_v18 = vsel %vm8293_vm6, %v8237_v31, %v2773_v32  ;;  %6937 = vrcp.f32 %v8235_v42  ;;  %v8326_v38 = vld [vmem:[%s7571_s6 + $0x2a4] sm:$0xf]  ;;  %v2733_v2 = vand.u32 2147483647, %v8233_v41  ;;  %v5973_v24 = vld [vmem:[%s7571_s6 + $0x288] sm:$0xf0] }
 0x2e3   : > { %v8329_v60 = vpop.eup %6933  ;;  %v2782_v31 = vsel %vm8229_vm7, %v2781_v12, %v2777_v18  ;;  %v2937_v62 = vmul.f32 %v2921_v19, %v2601_v29  ;;  %v2735_v50 = vand.u32 2147483648, %v8233_v41  ;;  %v2793_v43 = vand.u32 2147483647, %v8235_v42  ;;  %v6803_v10 = vld [vmem:[%s7571_s6 + $0x574] sm:$0xf] }
 0x2e4   : > { %v8338_v57 = vpack.c.bf16 %v2940_v16, %v2936_v34  ;;  %v2925_v4 = vmul.f32 %v2782_v31, %v8120_v54  ;;  %v2725_v5 = vmul.f32 %v8329_v60, %v8233_v41  ;;  %vm2730_vm9 = vweird.f32 %v8329_v60  ;;  %v6357_v12 = vld [vmem:[%s7571_s6 + $0x588] sm:$0xf0]  ;;  %v6749_v8 = vld [vmem:[%s7571_s6 + $0x3c4] sm:$0xf]  ;;  %v8393_v34 = vld [vmem:[#allocation2 + $0x70] sm:$0xff] }
 0x2e5   : > { %v2795_v0 = vand.u32 2147483648, %v8235_v42  ;;  %v5832_v11 = vor.u32 %v6671_v20, %v5829_v26  ;;  %v6024_v49 = vor.u32 %v6719_v30, %v6021_v33  ;;  %v6408_v44 = vor.u32 %v6815_v36, %v6405_v37  ;;  %vm8383_vm12 = vmor %vm2729_vm8, %vm2730_vm9  ;;  %v6653_v36 = vld [vmem:[%s7571_s6 + $0xc4] sm:$0xf]  ;;  %v5757_v37 = vld [vmem:[%s7571_s6 + $0xd8] sm:$0xf0] }
 0x2e6   : > { %4162 = vmatmul.bf16.vlgmr.msra.gmra.mxu1 %v8338_v57  ;;  %v2941_v54 = vmul.f32 %v2925_v4, %v2605_v61  ;;  %v2726_v63 = vsub.f32 1.0, %v2725_v5  ;;  %v6192_v59 = vor.u32 %v6761_v48, %v6189_v9  ;;  %vm8359_vm10 = vcmp.eq.f32.partialorder %v2733_v2, 8.507059e+37  ;;  %v8402_v48 = vld [vmem:[#allocation2 + $0x10] sm:$0xff]  ;;  %v6797_v4 = vld [vmem:[%s7571_s6 + $0x544] sm:$0xf] }
 0x2e7   : > { %v6936_v56 = vpop.eup %6935  ;;  %vm2789_vm11 = vweird.f32 %v8235_v42  ;;  %4211 = vmatpush.bf16.msrb.mxu0 %v5832_v11  ;;  %4230 = vmatpush.bf16.msrb.mxu1 %v6024_v49  ;;  %v5808_v21 = vor.u32 %v8320_v13, %v8323_v52  ;;  %v6000_v22 = vor.u32 %v8326_v38, %v5997_v53  ;;  %v6384_v6 = vor.u32 %v8336_v3, %v6381_v40  ;;  %v6701_v52 = vld [vmem:[%s7571_s6 + $0x244] sm:$0xf]  ;;  %v5949_v38 = vld [vmem:[%s7571_s6 + $0x258] sm:$0xf0] }
 0x2e8   : > { %v8369_v25 = vpop.eup %6937  ;;  %v8371_v29 = vpack.c.bf16 %v2941_v54, %v2937_v62  ;;  %v2727_v1 = vmul.f32 %v8329_v60, %v2726_v63  ;;  %4268 = vmatpush.bf16.msrb.mxu3 %v6408_v44  ;;  %4250 = vmatpush.bf16.msrb.mxu2 %v6192_v59  ;;  %6939 = vpow2.f32 %v8149_v39  ;;  %v2736_v20 = vor.u32 1.1754944e-38, %v2735_v50  ;;  %v8407_v53 = vld [vmem:[#allocation2 + $0x78] sm:$0xff]  ;;  %v8444_v44 = vld [vmem:[#allocation2 + $0x28] sm:$0xff] }
 0x2e9   : > { %v2785_v26 = vmul.f32 %v8369_v25, %v8235_v42  ;;  %vm8389_vm13 = vcmp.eq.f32.partialorder %v2793_v43, 8.507059e+37  ;;  %v6168_v33 = vor.u32 %v6755_v47, %v6165_v51  ;;  %vm2790_vm14 = vweird.f32 %v8369_v25  ;;  %v6333_v5 = vld [vmem:[%s7571_s6 + $0x558] sm:$0xf0] }
 0x2ea   : > { %4181 = vmatmul.bf16.vlgmr.msra.gmra.mxu2 %v8371_v29  ;;  %v2728_v39 = vadd.f32 %v8329_v60, %v2727_v1  ;;  %v2796_v41 = vor.u32 1.1754944e-38, %v2795_v0  ;;  %v5784_v19 = vor.u32 %v8350_v58, %v8354_v15  ;;  %v5976_v16 = vor.u32 %v8357_v55, %v5973_v24  ;;  %vm8426_vm15 = vmor %vm2789_vm11, %vm2790_vm14  ;;  %v8437_v42 = vld [vmem:[#allocation2 + $0x38] sm:$0xff]  ;;  %v2602_v58 = vld [vmem:[#allocation3 + $0x40] sm:$0xff] }
 0x2eb   : > { %v2786_v9 = vsub.f32 1.0, %v2785_v26  ;;  %4212 = vmatpush.bf16.msrb.mxu0 %v5808_v21  ;;  %4231 = vmatpush.bf16.msrb.mxu1 %v6000_v22  ;;  %v6360_v18 = vor.u32 %v6803_v10, %v6357_v12  ;;  %v6144_v13 = vor.u32 %v6749_v8, %v6141_v14  ;;  %v8412_v31 = vadd.f32 1.0, %v6936_v56  ;;  %v2606_v15 = vld [vmem:[#allocation3 + $0x38] sm:$0xff] }
 0x2ec   : > { %v2732_v61 = vsel %vm8383_vm12, %v8329_v60, %v2728_v39  ;;  %4269 = vmatpush.bf16.msrb.mxu3 %v6384_v6  ;;  %4251 = vmatpush.bf16.msrb.mxu2 %v6168_v33  ;;  %6941 = vpow2.f32 %v8161_v46  ;;  %v5654_v62 = vmul.f32 -1.442695, %v8393_v34  ;;  %v5760_v3 = vor.u32 %v6653_v36, %v5757_v37 }
 0x2ed   : > { %v2737_v2 = vsel %vm8359_vm10, %v2736_v20, %v2732_v61  ;;  %v2787_v50 = vmul.f32 %v8369_v25, %v2786_v9  ;;  %v5651_v40 = vmul.f32 -1.442695, %v8402_v48  ;;  %v5952_v51 = vor.u32 %v6701_v52, %v5949_v38  ;;  %v6785_v9 = vld [vmem:[%s7571_s6 + $0x4e4] sm:$0xf] }
 0x2ee   : > { %v6940_v47 = vpop.eup %6939  ;;  %v2922_v46 = vmul.f32 %v2737_v2, %v8125_v17  ;;  %6943 = vrcp.f32 %v8412_v31  ;;  %v5655_v43 = vmul.f32 -1.442695, %v8407_v53  ;;  %v2808_v49 = vand.u32 2147483647, %v8412_v31 }
 0x2ef   : > { %v2788_v0 = vadd.f32 %v8369_v25, %v2787_v50  ;;  %4213 = vmatpush.bf16.msrb.mxu0 %v5784_v19  ;;  %4232 = vmatpush.bf16.msrb.mxu1 %v5976_v16  ;;  %v8434_v11 = vadd.f32 1.0, %v6940_v47  ;;  %6945 = vpow2.f32 %v5654_v62  ;;  %v6336_v17 = vor.u32 %v6797_v4, %v6333_v5 }
 0x2f0   : > { %4270 = vmatpush.bf16.msrb.mxu3 %v6360_v18  ;;  %4252 = vmatpush.bf16.msrb.mxu2 %v6144_v13  ;;  %v2810_v54 = vand.u32 2147483648, %v8412_v31  ;;  %6947 = vpow2.f32 %v5651_v40  ;;  %vm2804_vm0 = vweird.f32 %v8412_v31  ;;  %v5652_v56 = vmul.f32 -1.442695, %v8437_v42 }
 0x2f1   : > { %v2792_v63 = vsel %vm8426_vm15, %v8369_v25, %v2788_v0  ;;  %6949 = vrcp.f32 %v8434_v11  ;;  %v2938_v21 = vmul.f32 %v2922_v46, %v2602_v58  ;;  %vm8451_vm7 = vcmp.eq.f32.partialorder %v2808_v49, 8.507059e+37 }
 0x2f2   : > { %v6942_v59 = vpop.eup %6941  ;;  %v2797_v55 = vsel %vm8389_vm13, %v2796_v41, %v2792_v63  ;;  %6951 = vpow2.f32 %v5655_v43  ;;  %v2811_v25 = vor.u32 1.1754944e-38, %v2810_v54  ;;  %v2868_v1 = vand.u32 2147483647, %v8434_v11  ;;  %v2607_v54 = vld [vmem:[#allocation3 + $0x20] sm:$0xff] }
 0x2f3   : > { %v2926_v45 = vmul.f32 %v2797_v55, %v8128_v23  ;;  %4214 = vmatpush.bf16.msrb.mxu0 %v5760_v3  ;;  %4233 = vmatpush.bf16.msrb.mxu1 %v5952_v51  ;;  %v8455_v24 = vadd.f32 1.0, %v6942_v59  ;;  %v2870_v6 = vand.u32 2147483648, %v8434_v11  ;;  %v5656_v12 = vmul.f32 -1.442695, %v8444_v44 }
 0x2f4   : > { %v6944_v10 = vpop.eup %6943  ;;  %4271 = vmatpush.bf16.msrb.mxu3 %v6336_v17  ;;  %vm2864_vm1 = vweird.f32 %v8434_v11  ;;  %vm8472_vm4 = vcmp.eq.f32.partialorder %v2868_v1, 8.507059e+37 }
 0x2f5   : > { %v6946_v8 = vpop.eup %6945  ;;  %v2942_v23 = vmul.f32 %v2926_v45, %v2606_v15  ;;  %v2800_v14 = vmul.f32 %v6944_v10, %v8412_v31  ;;  %6953 = vrcp.f32 %v8455_v24  ;;  %vm2805_vm2 = vweird.f32 %v6944_v10 }
 0x2f6   : > { %v6948_v32 = vpop.eup %6947  ;;  %v8463_v20 = vadd.f32 1.0, %v6946_v8  ;;  %v2823_v26 = vand.u32 2147483647, %v8455_v24  ;;  %6955 = vpow2.f32 %v5652_v56  ;;  %v2825_v41 = vand.u32 2147483648, %v8455_v24  ;;  %vm8482_vm6 = vmor %vm2804_vm0, %vm2805_vm2 }
 0x2f7   : > { %v6950_v30 = vpop.eup %6949  ;;  %v8466_v33 = vpack.c.bf16 %v2942_v23, %v2938_v21  ;;  %v2801_v39 = vsub.f32 1.0, %v2800_v14  ;;  %v8469_v19 = vadd.f32 1.0, %v6948_v32  ;;  %v2871_v16 = vor.u32 1.1754944e-38, %v2870_v6 }
 0x2f8   : > { %v6952_v36 = vpop.eup %6951  ;;  %v2860_v37 = vmul.f32 %v6950_v30, %v8434_v11  ;;  %6957 = vpow2.f32 %v5656_v12  ;;  %vm2865_vm3 = vweird.f32 %v6950_v30  ;;  %vm2819_vm5 = vweird.f32 %v8455_v24 }
 0x2f9   : > { %4200 = vmatmul.bf16.vlgmr.msra.gmra.mxu3 %v8466_v33  ;;  %v2802_v18 = vmul.f32 %v6944_v10, %v2801_v39  ;;  %6959 = vrcp.f32 %v8463_v20  ;;  %v2883_v38 = vand.u32 2147483647, %v8463_v20  ;;  %v8487_v61 = vadd.f32 1.0, %v6952_v36  ;;  %vm8503_vm11 = vmor %vm2864_vm1, %vm2865_vm3 }
 0x2fa   : > { %v2861_v52 = vsub.f32 1.0, %v2860_v37  ;;  %6961 = vrcp.f32 %v8469_v19  ;;  %vm8490_vm8 = vcmp.eq.f32.partialorder %v2823_v26, 8.507059e+37  ;;  %v2826_v3 = vor.u32 1.1754944e-38, %v2825_v41 }
 0x2fb   : > { %v6954_v62 = vpop.eup %6953  ;;  %v2803_v2 = vadd.f32 %v6944_v10, %v2802_v18  ;;  %v2885_v31 = vand.u32 2147483648, %v8463_v20  ;;  %vm2879_vm9 = vweird.f32 %v8463_v20  ;;  %vm2834_vm10 = vweird.f32 %v8469_v19 }
 0x2fc   : > { %v6956_v4 = vpop.eup %6955  ;;  %v2862_v5 = vmul.f32 %v6950_v30, %v2861_v52  ;;  %v2815_v40 = vmul.f32 %v6954_v62, %v8455_v24  ;;  %v2838_v46 = vand.u32 2147483647, %v8469_v19  ;;  %v2840_v51 = vand.u32 2147483648, %v8469_v19 }
 0x2fd   : > { %v2807_v47 = vsel %vm8482_vm6, %v6944_v10, %v2803_v2  ;;  %6963 = vrcp.f32 %v8487_v61  ;;  %vm2820_vm12 = vweird.f32 %v6954_v62  ;;  %vm8512_vm13 = vcmp.eq.f32.partialorder %v2883_v38, 8.507059e+37  ;;  %v2611_v10 = vld [vmem:[#allocation3] sm:$0xff]  ;;  %v2612_v2 = vld [vmem:[#allocation3 + $0x8] sm:$0xff] }
 0x2fe   : > { %v6958_v43 = vpop.eup %6957  ;;  %v2812_v0 = vsel %vm8451_vm7, %v2811_v25, %v2807_v47  ;;  %v2863_v49 = vadd.f32 %v6950_v30, %v2862_v5  ;;  %v2816_v58 = vsub.f32 1.0, %v2815_v40  ;;  %v2886_v59 = vor.u32 1.1754944e-38, %v2885_v31  ;;  %vm8527_vm15 = vmor %vm2819_vm5, %vm2820_vm12  ;;  %v6743_v40 = vld [vmem:[%s7571_s6 + $0x394] sm:$0xf]  ;;  %v6117_v47 = vld [vmem:[%s7571_s6 + $0x3a8] sm:$0xf0] }
 0x2ff   : > { %v6960_v11 = vpop.eup %6959  ;;  %v2927_v63 = vmul.f32 %v2812_v0, %v8132_v27  ;;  %v2841_v15 = vor.u32 1.1754944e-38, %v2840_v51  ;;  %vm2894_vm14 = vweird.f32 %v8487_v61  ;;  %v2898_v22 = vand.u32 2147483647, %v8487_v61  ;;  %v6647_v0 = vld [vmem:[%s7571_s6 + $0x94] sm:$0xf] }
 0x300   : > { %v6962_v55 = vpop.eup %6961  ;;  %v2867_v56 = vsel %vm8503_vm11, %v6950_v30, %v2863_v49  ;;  %v2817_v45 = vmul.f32 %v6954_v62, %v2816_v58  ;;  %v2875_v21 = vmul.f32 %v6960_v11, %v8463_v20  ;;  %vm2880_vm0 = vweird.f32 %v6960_v11  ;;  %v5733_v49 = vld [vmem:[%s7571_s6 + $0xa8] sm:$0xf0]  ;;  %v6779_v51 = vld [vmem:[%s7571_s6 + $0x4b4] sm:$0xf] }
 0x301   : > { %v2872_v25 = vsel %vm8472_vm4, %v2871_v16, %v2867_v56  ;;  %v2830_v1 = vmul.f32 %v6962_v55, %v8469_v19  ;;  %v2900_v6 = vand.u32 2147483648, %v8487_v61  ;;  %v2943_v8 = vmul.f32 %v2927_v63, %v2607_v54  ;;  %vm8549_vm1 = vmor %vm2879_vm9, %vm2880_vm0  ;;  %v2609_v19 = vld [vmem:[#allocation3 + $0x18] sm:$0xff]  ;;  %v5925_v63 = vld [vmem:[%s7571_s6 + $0x228] sm:$0xf0] }
 0x302   : > { %v2931_v12 = vmul.f32 %v2872_v25, %v8134_v28  ;;  %v2818_v23 = vadd.f32 %v6954_v62, %v2817_v45  ;;  %v2876_v14 = vsub.f32 1.0, %v2875_v21  ;;  %vm2835_vm7 = vweird.f32 %v6962_v55  ;;  %v2613_v45 = vld [vmem:[#allocation3 + $0x60] sm:$0xff] }
 0x303   : > { %v8534_v32 = vpop.eup %6963  ;;  %v2831_v26 = vsub.f32 1.0, %v2830_v1  ;;  %v8536_v30 = vadd.f32 1.0, %v6956_v4  ;;  %v8538_v24 = vadd.f32 1.0, %v6958_v43  ;;  %vm8561_vm4 = vmor %vm2834_vm10, %vm2835_vm7  ;;  %vm8565_vm3 = vcmp.eq.f32.partialorder %v2838_v46, 8.507059e+37 }
 0x304   : > { %v2947_v39 = vmul.f32 %v2931_v12, %v2611_v10  ;;  %v2822_v41 = vsel %vm8527_vm15, %v6954_v62, %v2818_v23  ;;  %v2877_v36 = vmul.f32 %v6960_v11, %v2876_v14  ;;  %v2890_v37 = vmul.f32 %v8534_v32, %v8487_v61  ;;  %v2608_v62 = vld [vmem:[#allocation3 + $0x78] sm:$0xff]  ;;  %v6695_v61 = vld [vmem:[%s7571_s6 + $0x214] sm:$0xf]  ;;  %v6737_v10 = vld [vmem:[%s7571_s6 + $0x364] sm:$0xf] }
 0x305   : > { %v2827_v28 = vsel %vm8490_vm8, %v2826_v3, %v2822_v41  ;;  %v2832_v16 = vmul.f32 %v6962_v55, %v2831_v26  ;;  %vm2895_vm2 = vweird.f32 %v8534_v32  ;;  %6965 = vrcp.f32 %v8536_v30  ;;  %v5709_v12 = vld [vmem:[%s7571_s6 + $0x78] sm:$0xf0] }
 0x306   : > { %v8555_v18 = vpack.c.bf16 %v2947_v39, %v2943_v8  ;;  %v2878_v13 = vadd.f32 %v6960_v11, %v2877_v36  ;;  %v2928_v52 = vmul.f32 %v2827_v28, %v8141_v35  ;;  %v2891_v38 = vsub.f32 1.0, %v2890_v37  ;;  %vm8589_vm6 = vmor %vm2894_vm14, %vm2895_vm2  ;;  %v5901_v26 = vld [vmem:[%s7571_s6 + $0x1f8] sm:$0xf0] }
 0x307   : > { %v2833_v50 = vadd.f32 %v6962_v55, %v2832_v16  ;;  %v2855_v31 = vand.u32 2147483648, %v8536_v30  ;;  %vm8574_vm5 = vcmp.eq.f32.partialorder %v2898_v22, 8.507059e+37  ;;  %6967 = vrcp.f32 %v8538_v24  ;;  %v6285_v16 = vld [vmem:[%s7571_s6 + $0x4f8] sm:$0xf0] }
 0x308   : > { %4148 = vmatmul.bf16.gmra.mxu0 %v8555_v18  ;;  %v2882_v35 = vsel %vm8549_vm1, %v6960_v11, %v2878_v13  ;;  %v2892_v4 = vmul.f32 %v8534_v32, %v2891_v38  ;;  %v2901_v43 = vor.u32 1.1754944e-38, %v2900_v6  ;;  %vm2849_vm8 = vweird.f32 %v8536_v30  ;;  %v6641_v6 = vld [vmem:[%s7571_s6 + $0x64] sm:$0xf] }
 0x309   : > { %v2887_v60 = vsel %vm8512_vm13, %v2886_v59, %v2882_v35  ;;  %v2837_v46 = vsel %vm8561_vm4, %v6962_v55, %v2833_v50  ;;  %v2944_v17 = vmul.f32 %v2928_v52, %v2608_v62  ;;  %v6791_v59 = vld [vmem:[%s7571_s6 + $0x514] sm:$0xf]  ;;  %v6309_v55 = vld [vmem:[%s7571_s6 + $0x528] sm:$0xf0]  ;;  %v8608_v22 = vor.u32 1.1754944e-38, %v2855_v31 }
 0x30a   : > { %v2932_v58 = vmul.f32 %v2887_v60, %v8393_v34  ;;  %v2842_v11 = vsel %vm8565_vm3, %v2841_v15, %v2837_v46  ;;  %v2893_v54 = vadd.f32 %v8534_v32, %v2892_v4  ;;  %v2853_v34 = vand.u32 2147483647, %v8536_v30  ;;  %v6731_v62 = vld [vmem:[%s7571_s6 + $0x334] sm:$0xf]  ;;  %v5685_v35 = vld [vmem:[%s7571_s6 + $0x48] sm:$0xf0] }
 0x30b   : > { %v8604_v56 = vpop.eup %6965  ;;  %v2929_v21 = vmul.f32 %v2842_v11, %v8402_v48  ;;  %v6120_v15 = vor.u32 %v6743_v40, %v6117_v47  ;;  %vm2909_vm9 = vweird.f32 %v8538_v24  ;;  %v6093_v48 = vld [vmem:[%s7571_s6 + $0x378] sm:$0xf0]  ;;  %v2913_v14 = vand.u32 2147483647, %v8538_v24  ;;  %v6635_v31 = vld [vmem:[%s7571_s6 + $0x34] sm:$0xf] }
 0x30c   : > { %v2948_v25 = vmul.f32 %v2932_v58, %v2612_v2  ;;  %v2897_v27 = vsel %vm8589_vm6, %v8534_v32, %v2893_v54  ;;  %v2845_v1 = vmul.f32 %v8604_v56, %v8536_v30  ;;  %vm2850_vm10 = vweird.f32 %v8604_v56  ;;  %v6689_v32 = vld [vmem:[%s7571_s6 + $0x1e4] sm:$0xf]  ;;  %v6069_v2 = vld [vmem:[%s7571_s6 + $0x348] sm:$0xf0]  ;;  %v6045_v54 = vld [vmem:[%s7571_s6 + $0x318] sm:$0xf0] }
 0x30d   : > { %v2902_v8 = vsel %vm8574_vm5, %v2901_v43, %v2897_v27  ;;  %v2945_v23 = vmul.f32 %v2929_v21, %v2609_v19  ;;  %4253 = vmatpush.bf16.msrb.mxu2 %v6120_v15  ;;  %v8626_v39 = vpop.eup %6967  ;;  %v5736_v28 = vor.u32 %v6647_v0, %v5733_v49  ;;  %v2915_v52 = vand.u32 2147483648, %v8538_v24  ;;  %v6683_v19 = vld [vmem:[%s7571_s6 + $0x1b4] sm:$0xf]  ;;  %vm8648_vm12 = vmor %vm2849_vm8, %vm2850_vm10  ;;  %v5877_v46 = vld [vmem:[%s7571_s6 + $0x1c8] sm:$0xf0] }
 0x30e   : > { %v8628_v41 = vpack.c.bf16 %v2948_v25, %v2944_v17  ;;  %v2933_v36 = vmul.f32 %v2902_v8, %v8407_v53  ;;  %v2846_v37 = vsub.f32 1.0, %v2845_v1  ;;  %v2905_v13 = vmul.f32 %v8626_v39, %v8538_v24  ;;  %v6261_v58 = vld [vmem:[%s7571_s6 + $0x4c8] sm:$0xf0]  ;;  %v6725_v17 = vld [vmem:[%s7571_s6 + $0x304] sm:$0xf]  ;;  %v2610_v25 = vld [vmem:[#allocation3 + $0x58] sm:$0xff] }
 0x30f   : > { %v5928_v20 = vor.u32 %v6695_v61, %v5925_v63  ;;  %v6312_v38 = vor.u32 %v6791_v59, %v6309_v55  ;;  %vm2910_vm11 = vweird.f32 %v8626_v39  ;;  %4215 = vmatpush.bf16.msrb.mxu0 %v5736_v28  ;;  %v6096_v3 = vor.u32 %v6737_v10, %v6093_v48  ;;  %v6629_v61 = vld [vmem:[%s7571_s6 + $0x4] sm:$0xf]  ;;  %v5661_v63 = vld [vmem:[%s7571_s6 + $0x18] sm:$0xf0]  ;;  %v6219_v15 = vld [vmem:[%s7571_s6 + $0x458] sm:$0xf] }
 0x310   : > { %4167 = vmatmul.bf16.gmra.mxu1 %v8628_v41  ;;  %v2949_v53 = vmul.f32 %v2933_v36, %v2613_v45  ;;  %v2847_v50 = vmul.f32 %v8604_v56, %v2846_v37  ;;  %v2906_v5 = vsub.f32 1.0, %v2905_v13  ;;  %v5712_v40 = vor.u32 %v6641_v6, %v5709_v12  ;;  %vm8675_vm14 = vmor %vm2909_vm9, %vm2910_vm11  ;;  %v6771_v10 = vld [vmem:[%s7571_s6 + $0x46c] sm:$0xf0]  ;;  %v6677_v48 = vld [vmem:[%s7571_s6 + $0x184] sm:$0xf] }
 0x311   : > { %4234 = vmatpush.bf16.msrb.mxu1 %v5928_v20  ;;  %4272 = vmatpush.bf16.msrb.mxu3 %v6312_v38  ;;  %v5904_v47 = vor.u32 %v6689_v32, %v5901_v26  ;;  %v6288_v60 = vor.u32 %v6785_v9, %v6285_v16  ;;  %vm8657_vm13 = vcmp.eq.f32.partialorder %v2853_v34, 8.507059e+37  ;;  %v6072_v49 = vor.u32 %v6731_v62, %v6069_v2  ;;  %v5853_v6 = vld [vmem:[%s7571_s6 + $0x198] sm:$0xf0]  ;;  %v5835_v32 = vld [vmem:[%s7571_s6 + $0x158] sm:$0xf]  ;;  %v2614_v9 = vld [vmem:[#allocation3 + $0x50] sm:$0xff] }
 0x312   : > { %v8654_v43 = vpack.c.bf16 %v2949_v53, %v2945_v23  ;;  %v2848_v30 = vadd.f32 %v8604_v56, %v2847_v50  ;;  %4254 = vmatpush.bf16.msrb.mxu2 %v6096_v3  ;;  %v2907_v11 = vmul.f32 %v8626_v39, %v2906_v5  ;;  %v2916_v45 = vor.u32 1.1754944e-38, %v2915_v52  ;;  %v6773_v23 = vld [vmem:[%s7571_s6 + $0x484] sm:$0xf]  ;;  %v6675_v36 = vld [vmem:[%s7571_s6 + $0x16c] sm:$0xf0] }
 0x313   : > { %4216 = vmatpush.bf16.msrb.mxu0 %v5712_v40  ;;  %v5688_v21 = vor.u32 %v6635_v31, %v5685_v35  ;;  %v5880_v34 = vor.u32 %v6683_v19, %v5877_v46  ;;  %vm8685_vm15 = vcmp.eq.f32.partialorder %v2913_v14, 8.507059e+37  ;;  %v6264_v1 = vor.u32 %v6779_v51, %v6261_v58  ;;  %v6027_v37 = vld [vmem:[%s7571_s6 + $0x2d8] sm:$0xf]  ;;  %v6723_v28 = vld [vmem:[%s7571_s6 + $0x2ec] sm:$0xf0] }
 0x314   : > { %4186 = vmatmul.bf16.gmra.mxu2 %v8654_v43  ;;  %v2852_v59 = vsel %vm8648_vm12, %v8604_v56, %v2848_v30  ;;  %v2908_v24 = vadd.f32 %v8626_v39, %v2907_v11  ;;  %v6048_v8 = vor.u32 %v6725_v17, %v6045_v54  ;;  %v6220_v26 = vor.u32 %v6771_v10, %v6219_v15  ;;  %v6411_v38 = vld [vmem:[%s7571_s6 + $0x5d8] sm:$0xf]  ;;  %v6819_v62 = vld [vmem:[%s7571_s6 + $0x5ec] sm:$0xf0]  ;;  %v6195_v50 = vld [vmem:[%s7571_s6 + $0x428] sm:$0xf] }
 0x315   : > { %v2857_v56 = vsel %vm8657_vm13, %v8608_v22, %v2852_v59  ;;  %4235 = vmatpush.bf16.msrb.mxu1 %v5904_v47  ;;  %4273 = vmatpush.bf16.msrb.mxu3 %v6288_v60  ;;  %v6237_v22 = vld [vmem:[%s7571_s6 + $0x498] sm:$0xf0]  ;;  %v5664_v16 = vor.u32 %v6629_v61, %v5661_v63  ;;  %v5856_v13 = vor.u32 %v6677_v48, %v5853_v6  ;;  %v6765_v3 = vld [vmem:[%s7571_s6 + $0x43c] sm:$0xf0]  ;;  %v5811_v31 = vld [vmem:[%s7571_s6 + $0x128] sm:$0xf] }
 0x316   : > { %v2930_v12 = vmul.f32 %v2857_v56, %v8437_v42  ;;  %4255 = vmatpush.bf16.msrb.mxu2 %v6072_v49  ;;  %v2912_v14 = vsel %vm8675_vm14, %v8626_v39, %v2908_v24  ;;  %v6240_v20 = vor.u32 %v6773_v23, %v6237_v22  ;;  %v5836_v2 = vor.u32 %v6675_v36, %v5835_v32  ;;  %v6003_v19 = vld [vmem:[%s7571_s6 + $0x2a8] sm:$0xf]  ;;  %v6717_v4 = vld [vmem:[%s7571_s6 + $0x2bc] sm:$0xf0]  ;;  %v6171_v0 = vld [vmem:[%s7571_s6 + $0x3f8] sm:$0xf] }
 0x317   : > { %v2917_v42 = vsel %vm8685_vm15, %v2916_v45, %v2912_v14  ;;  %4217 = vmatpush.bf16.msrb.mxu0 %v5688_v21  ;;  %v6028_v53 = vor.u32 %v6723_v28, %v6027_v37  ;;  %v6412_v5 = vor.u32 %v6819_v62, %v6411_v38  ;;  %v6196_v47 = vor.u32 %v6765_v3, %v6195_v50  ;;  %v6387_v60 = vld [vmem:[%s7571_s6 + $0x5a8] sm:$0xf]  ;;  %v6813_v46 = vld [vmem:[%s7571_s6 + $0x5bc] sm:$0xf0]  ;;  %v6759_v49 = vld [vmem:[%s7571_s6 + $0x40c] sm:$0xf0] }
 0x318   : > { %v2934_v52 = vmul.f32 %v2917_v42, %v8444_v44  ;;  %v2946_v39 = vmul.f32 %v2930_v12, %v2610_v25  ;;  %v6669_v44 = vld [vmem:[%s7571_s6 + $0x13c] sm:$0xf0]  ;;  %v6004_v30 = vor.u32 %v6717_v4, %v6003_v19  ;;  %v5787_v58 = vld [vmem:[%s7571_s6 + $0xf8] sm:$0xf]  ;;  %v6663_v17 = vld [vmem:[%s7571_s6 + $0x10c] sm:$0xf0]  ;;  %v6388_v61 = vor.u32 %v6813_v46, %v6387_v60 }
 0x319   : > { %4236 = vmatpush.bf16.msrb.mxu1 %v5880_v34  ;;  %4274 = vmatpush.bf16.msrb.mxu3 %v6264_v1  ;;  %v5812_v51 = vor.u32 %v6669_v44, %v5811_v31  ;;  %v5979_v11 = vld [vmem:[%s7571_s6 + $0x278] sm:$0xf]  ;;  %v6711_v54 = vld [vmem:[%s7571_s6 + $0x28c] sm:$0xf0]  ;;  %v6172_v63 = vor.u32 %v6759_v49, %v6171_v0  ;;  %v5788_v45 = vor.u32 %v6663_v17, %v5787_v58  ;;  %v6147_v34 = vld [vmem:[%s7571_s6 + $0x3c8] sm:$0xf] }
 0x31a   : > { %4256 = vmatpush.bf16.msrb.mxu2 %v6048_v8  ;;  %v2950_v35 = vmul.f32 %v2934_v52, %v2614_v9  ;;  %v6363_v59 = vld [vmem:[%s7571_s6 + $0x578] sm:$0xf]  ;;  %v6807_v55 = vld [vmem:[%s7571_s6 + $0x58c] sm:$0xf0]  ;;  %v5980_v21 = vor.u32 %v6711_v54, %v5979_v11  ;;  %v6753_v15 = vld [vmem:[%s7571_s6 + $0x3dc] sm:$0xf0] }
 0x31b   : > { %4218 = vmatpush.bf16.msrb.mxu0 %v5664_v16  ;;  %v5763_v10 = vld [vmem:[%s7571_s6 + $0xc8] sm:$0xf]  ;;  %v6657_v25 = vld [vmem:[%s7571_s6 + $0xdc] sm:$0xf0]  ;;  %v6364_v27 = vor.u32 %v6807_v55, %v6363_v59  ;;  %v6148_v1 = vor.u32 %v6753_v15, %v6147_v34  ;;  %v6123_v23 = vld [vmem:[%s7571_s6 + $0x398] sm:$0xf] }
 0x31c   : > { %v8712_v40 = vpack.c.bf16 %v2950_v35, %v2946_v39  ;;  %v5955_v56 = vld [vmem:[%s7571_s6 + $0x248] sm:$0xf]  ;;  %v6705_v24 = vld [vmem:[%s7571_s6 + $0x25c] sm:$0xf0]  ;;  %v5764_v12 = vor.u32 %v6657_v25, %v5763_v10  ;;  %v6747_v22 = vld [vmem:[%s7571_s6 + $0x3ac] sm:$0xf0] }
 0x31d   : > { %4237 = vmatpush.bf16.msrb.mxu1 %v5856_v13  ;;  %4275 = vmatpush.bf16.msrb.mxu3 %v6240_v20  ;;  %v6339_v48 = vld [vmem:[%s7571_s6 + $0x548] sm:$0xf]  ;;  %v6801_v6 = vld [vmem:[%s7571_s6 + $0x55c] sm:$0xf0]  ;;  %v5956_v8 = vor.u32 %v6705_v24, %v5955_v56  ;;  %v5739_v32 = vld [vmem:[%s7571_s6 + $0x98] sm:$0xf]  ;;  %v6124_v28 = vor.u32 %v6747_v22, %v6123_v23 }
 0x31e   : > { %4325 = vmatpush.bf16.msra.mxu2 %v6220_v26  ;;  %4205 = vmatmul.bf16.gmra.mxu3 %v8712_v40  ;;  %v6651_v14 = vld [vmem:[%s7571_s6 + $0xac] sm:$0xf0]  ;;  %v5931_v26 = vld [vmem:[%s7571_s6 + $0x218] sm:$0xf]  ;;  %v6340_v37 = vor.u32 %v6801_v6, %v6339_v48  ;;  %v6099_v52 = vld [vmem:[%s7571_s6 + $0x368] sm:$0xf] }
 0x31f   : > { %4287 = vmatpush.bf16.msra.mxu0 %v5836_v2  ;;  %v6699_v36 = vld [vmem:[%s7571_s6 + $0x22c] sm:$0xf0]  ;;  %v6315_v9 = vld [vmem:[%s7571_s6 + $0x518] sm:$0xf]  ;;  %v5740_v16 = vor.u32 %v6651_v14, %v5739_v32  ;;  %v6741_v39 = vld [vmem:[%s7571_s6 + $0x37c] sm:$0xf0] }
 0x320   : > { %4219 = vmatmul.bf16.vlgmr.msrb.gmra.mxu0 %v8297_v7  ;;  %4238 = vmatmul.bf16.vlgmr.msrb.gmra.mxu1 %v8338_v57  ;;  %v6795_v42 = vld [vmem:[%s7571_s6 + $0x52c] sm:$0xf0]  ;;  %v5932_v13 = vor.u32 %v6699_v36, %v5931_v26  ;;  %v5715_v20 = vld [vmem:[%s7571_s6 + $0x68] sm:$0xf]  ;;  %v6645_v38 = vld [vmem:[%s7571_s6 + $0x7c] sm:$0xf0]  ;;  %v6100_v50 = vor.u32 %v6741_v39, %v6099_v52 }
 0x321   : > { %4306 = vmatpush.bf16.msra.mxu1 %v6028_v53  ;;  %4344 = vmatpush.bf16.msra.mxu3 %v6412_v5  ;;  %v5907_v62 = vld [vmem:[%s7571_s6 + $0x1e8] sm:$0xf]  ;;  %v6693_v2 = vld [vmem:[%s7571_s6 + $0x1fc] sm:$0xf0]  ;;  %v6316_v53 = vor.u32 %v6795_v42, %v6315_v9  ;;  %v5716_v35 = vor.u32 %v6645_v38, %v5715_v20  ;;  %v6075_v19 = vld [vmem:[%s7571_s6 + $0x338] sm:$0xf] }
 0x322   : > { %4326 = vmatpush.bf16.msra.mxu2 %v6196_v47  ;;  %v6291_v3 = vld [vmem:[%s7571_s6 + $0x4e8] sm:$0xf]  ;;  %v6789_v31 = vld [vmem:[%s7571_s6 + $0x4fc] sm:$0xf0]  ;;  %v5908_v44 = vor.u32 %v6693_v2, %v5907_v62  ;;  %v6735_v4 = vld [vmem:[%s7571_s6 + $0x34c] sm:$0xf0] }
 0x323   : > { %4288 = vmatpush.bf16.msra.mxu0 %v5812_v51  ;;  %v5691_v5 = vld [vmem:[%s7571_s6 + $0x38] sm:$0xf]  ;;  %v6639_v47 = vld [vmem:[%s7571_s6 + $0x4c] sm:$0xf0]  ;;  %v6292_v51 = vor.u32 %v6789_v31, %v6291_v3  ;;  %v6076_v0 = vor.u32 %v6735_v4, %v6075_v19  ;;  %v6051_v58 = vld [vmem:[%s7571_s6 + $0x308] sm:$0xf] }
 0x324   : > { %4257 = vmatmul.bf16.vlgmr.msrb.gmra.mxu2 %v8371_v29  ;;  %v5883_v60 = vld [vmem:[%s7571_s6 + $0x1b8] sm:$0xf]  ;;  %v6687_v46 = vld [vmem:[%s7571_s6 + $0x1cc] sm:$0xf0]  ;;  %v6729_v17 = vld [vmem:[%s7571_s6 + $0x31c] sm:$0xf0]  ;;  %v5692_v11 = vor.u32 %v6639_v47, %v5691_v5 }
 0x325   : > { %4307 = vmatpush.bf16.msra.mxu1 %v6004_v30  ;;  %4345 = vmatpush.bf16.msra.mxu3 %v6388_v61  ;;  %v6267_v30 = vld [vmem:[%s7571_s6 + $0x4b8] sm:$0xf]  ;;  %v6783_v49 = vld [vmem:[%s7571_s6 + $0x4cc] sm:$0xf0]  ;;  %v5884_v54 = vor.u32 %v6687_v46, %v5883_v60  ;;  %v5667_v61 = vld [vmem:[%s7571_s6 + $0x8] sm:$0xf]  ;;  %v6052_v56 = vor.u32 %v6729_v17, %v6051_v58 }
 0x326   : > { %4327 = vmatpush.bf16.msra.mxu2 %v6172_v63  ;;  %v6633_v63 = vld [vmem:[%s7571_s6 + $0x1c] sm:$0xf0]  ;;  %v5859_v59 = vld [vmem:[%s7571_s6 + $0x188] sm:$0xf]  ;;  %v6268_v34 = vor.u32 %v6783_v49, %v6267_v30  ;;  %v6221_v15 = vld [vmem:[%s7571_s6 + $0x470] sm:$0xf0] }
 0x327   : > { %4289 = vmatpush.bf16.msra.mxu0 %v5788_v45  ;;  %v6681_v55 = vld [vmem:[%s7571_s6 + $0x19c] sm:$0xf0]  ;;  %v6243_v45 = vld [vmem:[%s7571_s6 + $0x488] sm:$0xf]  ;;  %v6672_v10 = vld [vmem:[%s7571_s6 + $0x15c] sm:$0xf]  ;;  %v5668_v48 = vor.u32 %v6633_v63, %v5667_v61 }
 0x328   : > { %v5837_v25 = vld [vmem:[%s7571_s6 + $0x170] sm:$0xf0]  ;;  %v6777_v24 = vld [vmem:[%s7571_s6 + $0x49c] sm:$0xf0]  ;;  %v5860_v6 = vor.u32 %v6681_v55, %v5859_v59  ;;  %v6762_v36 = vld [vmem:[%s7571_s6 + $0x42c] sm:$0xf] }
 0x329   : > { %4308 = vmatpush.bf16.msra.mxu1 %v5980_v21  ;;  %4346 = vmatpush.bf16.msra.mxu3 %v6364_v27  ;;  %v6768_v21 = vld [vmem:[%s7571_s6 + $0x45c] sm:$0xf]  ;;  %v5840_v22 = vor.u32 %v6672_v10, %v5837_v25  ;;  %v6244_v32 = vor.u32 %v6777_v24, %v6243_v45  ;;  %v5813_v9 = vld [vmem:[%s7571_s6 + $0x140] sm:$0xf0]  ;;  %v6714_v42 = vld [vmem:[%s7571_s6 + $0x2ac] sm:$0xf] }
 0x32a   : > { %4328 = vmatpush.bf16.msra.mxu2 %v6148_v1  ;;  %v6720_v27 = vld [vmem:[%s7571_s6 + $0x2dc] sm:$0xf]  ;;  %v6029_v1 = vld [vmem:[%s7571_s6 + $0x2f0] sm:$0xf0]  ;;  %v6224_v23 = vor.u32 %v6768_v21, %v6221_v15  ;;  %v6389_v52 = vld [vmem:[%s7571_s6 + $0x5c0] sm:$0xf0] }
 0x32b   : > { %4290 = vmatpush.bf16.msra.mxu0 %v5764_v12  ;;  %v6816_v12 = vld [vmem:[%s7571_s6 + $0x5dc] sm:$0xf]  ;;  %v6032_v14 = vor.u32 %v6720_v27, %v6029_v1  ;;  %v6173_v2 = vld [vmem:[%s7571_s6 + $0x410] sm:$0xf0]  ;;  %v6750_v47 = vld [vmem:[%s7571_s6 + $0x3cc] sm:$0xf] }
 0x32c   : > { %v6756_v62 = vld [vmem:[%s7571_s6 + $0x3fc] sm:$0xf]  ;;  %v5789_v3 = vld [vmem:[%s7571_s6 + $0x110] sm:$0xf0]  ;;  %v6149_v60 = vld [vmem:[%s7571_s6 + $0x3e0] sm:$0xf0] }
 0x32d   : > { %4309 = vmatpush.bf16.msra.mxu1 %v5956_v8  ;;  %4347 = vmatpush.bf16.msra.mxu3 %v6340_v37  ;;  %v6413_v8 = vld [vmem:[%s7571_s6 + $0x5f0] sm:$0xf0]  ;;  %v6197_v37 = vld [vmem:[%s7571_s6 + $0x440] sm:$0xf0]  ;;  %v6708_v31 = vld [vmem:[%s7571_s6 + $0x27c] sm:$0xf]  ;;  %v6176_v4 = vor.u32 %v6756_v62, %v6173_v2 }
 0x32e   : > { %4329 = vmatpush.bf16.msra.mxu2 %v6124_v28  ;;  %4276 = vmatmul.bf16.vlgmr.msrb.gmra.mxu3 %v8466_v33  ;;  %v6416_v26 = vor.u32 %v6816_v12, %v6413_v8  ;;  %v6666_v28 = vld [vmem:[%s7571_s6 + $0x12c] sm:$0xf]  ;;  %v6200_v39 = vor.u32 %v6762_v36, %v6197_v37  ;;  %v6365_v19 = vld [vmem:[%s7571_s6 + $0x590] sm:$0xf0]  ;;  %v5957_v58 = vld [vmem:[%s7571_s6 + $0x260] sm:$0xf0] }
 0x32f   : > { %4291 = vmatpush.bf16.msra.mxu0 %v5740_v16  ;;  %v6005_v16 = vld [vmem:[%s7571_s6 + $0x2c0] sm:$0xf0]  ;;  %v5816_v20 = vor.u32 %v6666_v28, %v5813_v9  ;;  %v6654_v30 = vld [vmem:[%s7571_s6 + $0xcc] sm:$0xf]  ;;  %v6744_v63 = vld [vmem:[%s7571_s6 + $0x39c] sm:$0xf] }
 0x330   : > { %4224 = vmatmul.bf16.gmra.mxu0 %v8555_v18  ;;  %4243 = vmatmul.bf16.gmra.mxu1 %v8628_v41  ;;  %v6008_v38 = vor.u32 %v6714_v42, %v6005_v16  ;;  %v6702_v49 = vld [vmem:[%s7571_s6 + $0x24c] sm:$0xf]  ;;  %v6125_v59 = vld [vmem:[%s7571_s6 + $0x3b0] sm:$0xf0]  ;;  %v6648_v21 = vld [vmem:[%s7571_s6 + $0x9c] sm:$0xf] }
 0x331   : > { %4310 = vmatpush.bf16.msra.mxu1 %v5932_v13  ;;  %4348 = vmatpush.bf16.msra.mxu3 %v6316_v53  ;;  %v6810_v13 = vld [vmem:[%s7571_s6 + $0x5ac] sm:$0xf]  ;;  %v5960_v55 = vor.u32 %v6702_v49, %v5957_v58  ;;  %v6696_v15 = vld [vmem:[%s7571_s6 + $0x21c] sm:$0xf]  ;;  %v5933_v10 = vld [vmem:[%s7571_s6 + $0x230] sm:$0xf0]  ;;  %v6128_v24 = vor.u32 %v6744_v63, %v6125_v59 }
 0x332   : > { %4330 = vmatpush.bf16.msra.mxu2 %v6100_v50  ;;  %v6392_v53 = vor.u32 %v6810_v13, %v6389_v52  ;;  %v6660_v50 = vld [vmem:[%s7571_s6 + $0xfc] sm:$0xf]  ;;  %v6798_v17 = vld [vmem:[%s7571_s6 + $0x54c] sm:$0xf]  ;;  %v6077_v9 = vld [vmem:[%s7571_s6 + $0x350] sm:$0xf0] }
 0x333   : > { %4292 = vmatpush.bf16.msra.mxu0 %v5716_v35  ;;  %v5981_v35 = vld [vmem:[%s7571_s6 + $0x290] sm:$0xf0]  ;;  %v5792_v5 = vor.u32 %v6660_v50, %v5789_v3  ;;  %v6792_v25 = vld [vmem:[%s7571_s6 + $0x51c] sm:$0xf]  ;;  %v6738_v1 = vld [vmem:[%s7571_s6 + $0x36c] sm:$0xf] }
 0x334   : > { %4262 = vmatmul.bf16.gmra.mxu2 %v8654_v43  ;;  %v5984_v46 = vor.u32 %v6708_v31, %v5981_v35  ;;  %v6642_v8 = vld [vmem:[%s7571_s6 + $0x6c] sm:$0xf]  ;;  %v6732_v28 = vld [vmem:[%s7571_s6 + $0x33c] sm:$0xf]  ;;  %v5693_v52 = vld [vmem:[%s7571_s6 + $0x50] sm:$0xf0] }
 0x335   : > { %4311 = vmatpush.bf16.msra.mxu1 %v5908_v44  ;;  %4349 = vmatpush.bf16.msra.mxu3 %v6292_v51  ;;  %v6804_v44 = vld [vmem:[%s7571_s6 + $0x57c] sm:$0xf]  ;;  %v6269_v62 = vld [vmem:[%s7571_s6 + $0x4d0] sm:$0xf0]  ;;  %v6726_v2 = vld [vmem:[%s7571_s6 + $0x30c] sm:$0xf] }
 0x336   : > { %4331 = vmatpush.bf16.msra.mxu2 %v6076_v0  ;;  %v6368_v51 = vor.u32 %v6804_v44, %v6365_v19  ;;  %v5765_v0 = vld [vmem:[%s7571_s6 + $0xe0] sm:$0xf0]  ;;  %v6636_v13 = vld [vmem:[%s7571_s6 + $0x3c] sm:$0xf]  ;;  %v6630_v31 = vld [vmem:[%s7571_s6 + $0xc] sm:$0xf] }
 0x337   : > { %4293 = vmatpush.bf16.msra.mxu0 %v5692_v11  ;;  %v6341_v11 = vld [vmem:[%s7571_s6 + $0x560] sm:$0xf0]  ;;  %v5768_v61 = vor.u32 %v6654_v30, %v5765_v0  ;;  %v5696_v50 = vor.u32 %v6636_v13, %v5693_v52  ;;  %v5843_v30 = vld [vmem:[%s7571_s6 + $0x160] sm:$0xf]  ;;  %v6676_v0 = vld [vmem:[%s7571_s6 + $0x174] sm:$0xf0] }
 0x338   : > { %v6344_v45 = vor.u32 %v6798_v17, %v6341_v11  ;;  %v6053_v3 = vld [vmem:[%s7571_s6 + $0x320] sm:$0xf0]  ;;  %v6035_v49 = vld [vmem:[%s7571_s6 + $0x2e0] sm:$0xf]  ;;  %v6724_v11 = vld [vmem:[%s7571_s6 + $0x2f4] sm:$0xf0] }
 0x339   : > { %4312 = vmatpush.bf16.msra.mxu1 %v5884_v54  ;;  %4350 = vmatpush.bf16.msra.mxu3 %v6268_v34  ;;  %v6152_v54 = vor.u32 %v6750_v47, %v6149_v60  ;;  %v5741_v34 = vld [vmem:[%s7571_s6 + $0xb0] sm:$0xf0]  ;;  %v5669_v35 = vld [vmem:[%s7571_s6 + $0x20] sm:$0xf0]  ;;  %v6774_v47 = vld [vmem:[%s7571_s6 + $0x48c] sm:$0xf]  ;;  %v6056_v58 = vor.u32 %v6726_v2, %v6053_v3 }
 0x33a   : > { %4332 = vmatpush.bf16.msra.mxu2 %v6052_v56  ;;  %v6317_v56 = vld [vmem:[%s7571_s6 + $0x530] sm:$0xf0]  ;;  %v5744_v27 = vor.u32 %v6648_v21, %v5741_v34  ;;  %v6245_v60 = vld [vmem:[%s7571_s6 + $0x4a0] sm:$0xf0]  ;;  %v5672_v17 = vor.u32 %v6630_v31, %v5669_v35  ;;  %v6036_v21 = vor.u32 %v6724_v11, %v6035_v49  ;;  %v6155_v13 = vld [vmem:[%s7571_s6 + $0x3d0] sm:$0xf] }
 0x33b   : > { %4294 = vmatpush.bf16.msra.mxu0 %v5668_v48  ;;  %v6101_v48 = vld [vmem:[%s7571_s6 + $0x380] sm:$0xf0]  ;;  %v6320_v12 = vor.u32 %v6792_v25, %v6317_v56  ;;  %v6248_v59 = vor.u32 %v6774_v47, %v6245_v60  ;;  %v5819_v25 = vld [vmem:[%s7571_s6 + $0x130] sm:$0xf]  ;;  %v6670_v56 = vld [vmem:[%s7571_s6 + $0x144] sm:$0xf0] }
 0x33c   : > { %v6104_v36 = vor.u32 %v6738_v1, %v6101_v48  ;;  %v6395_v1 = vld [vmem:[%s7571_s6 + $0x5b0] sm:$0xf]  ;;  %v6814_v48 = vld [vmem:[%s7571_s6 + $0x5c4] sm:$0xf0]  ;;  %v5747_v47 = vld [vmem:[%s7571_s6 + $0xa0] sm:$0xf] }
 0x33d   : > { %4313 = vmatpush.bf16.msra.mxu1 %v5860_v6  ;;  %4351 = vmatpush.bf16.msra.mxu3 %v6244_v32  ;;  %v5936_v6 = vor.u32 %v6696_v15, %v5933_v10  ;;  %v5909_v32 = vld [vmem:[%s7571_s6 + $0x200] sm:$0xf0]  ;;  %v6203_v15 = vld [vmem:[%s7571_s6 + $0x430] sm:$0xf]  ;;  %v6766_v10 = vld [vmem:[%s7571_s6 + $0x444] sm:$0xf0] }
 0x33e   : > { %4401 = vmatpush.bf16.msrb.mxu2 %v6224_v23  ;;  %4281 = vmatmul.bf16.gmra.mxu3 %v8712_v40  ;;  %v5717_v23 = vld [vmem:[%s7571_s6 + $0x80] sm:$0xf0]  ;;  %v6754_v52 = vld [vmem:[%s7571_s6 + $0x3e4] sm:$0xf0]  ;;  %v5963_v2 = vld [vmem:[%s7571_s6 + $0x250] sm:$0xf] }
 0x33f   : > { %4363 = vmatpush.bf16.msrb.mxu0 %v5840_v22  ;;  %v6690_v22 = vld [vmem:[%s7571_s6 + $0x1ec] sm:$0xf]  ;;  %v5720_v37 = vor.u32 %v6642_v8, %v5717_v23  ;;  %v6179_v23 = vld [vmem:[%s7571_s6 + $0x400] sm:$0xf]  ;;  %v6802_v3 = vld [vmem:[%s7571_s6 + $0x564] sm:$0xf0]  ;;  %v6156_v31 = vor.u32 %v6754_v52, %v6155_v13 }
 0x340   : > { %4295 = vmatmul.bf16.vlgmr.msra.gmra.mxu0 %v8297_v7  ;;  %4314 = vmatmul.bf16.vlgmr.msra.gmra.mxu1 %v8338_v57  ;;  %v5912_v42 = vor.u32 %v6690_v22, %v5909_v32  ;;  %v6760_v22 = vld [vmem:[%s7571_s6 + $0x414] sm:$0xf0]  ;;  %v6396_v32 = vor.u32 %v6814_v48, %v6395_v1  ;;  %v6742_v11 = vld [vmem:[%s7571_s6 + $0x384] sm:$0xf0]  ;;  %v5699_v1 = vld [vmem:[%s7571_s6 + $0x40] sm:$0xf] }
 0x341   : > { %4382 = vmatpush.bf16.msrb.mxu1 %v6032_v14  ;;  %4420 = vmatpush.bf16.msrb.mxu3 %v6416_v26  ;;  %v6786_v14 = vld [vmem:[%s7571_s6 + $0x4ec] sm:$0xf]  ;;  %v6293_v26 = vld [vmem:[%s7571_s6 + $0x500] sm:$0xf0]  ;;  %v6652_v60 = vld [vmem:[%s7571_s6 + $0xb4] sm:$0xf0] }
 0x342   : > { %4402 = vmatpush.bf16.msrb.mxu2 %v6200_v39  ;;  %v6296_v16 = vor.u32 %v6786_v14, %v6293_v26  ;;  %v6684_v39 = vld [vmem:[%s7571_s6 + $0x1bc] sm:$0xf]  ;;  %v5795_v14 = vld [vmem:[%s7571_s6 + $0x100] sm:$0xf]  ;;  %v6664_v26 = vld [vmem:[%s7571_s6 + $0x114] sm:$0xf0] }
 0x343   : > { %4364 = vmatpush.bf16.msrb.mxu0 %v5816_v20  ;;  %v5885_v20 = vld [vmem:[%s7571_s6 + $0x1d0] sm:$0xf0]  ;;  %v6640_v48 = vld [vmem:[%s7571_s6 + $0x54] sm:$0xf0]  ;;  %v5867_v13 = vld [vmem:[%s7571_s6 + $0x190] sm:$0xf] }
 0x344   : > { %4333 = vmatmul.bf16.vlgmr.msra.gmra.mxu2 %v8371_v29  ;;  %v5888_v44 = vor.u32 %v6684_v39, %v5885_v20  ;;  %v6682_v52 = vld [vmem:[%s7571_s6 + $0x1a4] sm:$0xf0] }
 0x345   : > { %4383 = vmatpush.bf16.msrb.mxu1 %v6008_v38  ;;  %4421 = vmatpush.bf16.msrb.mxu3 %v6392_v53  ;;  %v6780_v38 = vld [vmem:[%s7571_s6 + $0x4bc] sm:$0xf]  ;;  %v6080_v53 = vor.u32 %v6732_v28, %v6077_v9  ;;  %v6371_v28 = vld [vmem:[%s7571_s6 + $0x580] sm:$0xf]  ;;  %v6808_v9 = vld [vmem:[%s7571_s6 + $0x594] sm:$0xf0] }
 0x346   : > { %4403 = vmatpush.bf16.msrb.mxu2 %v6176_v4  ;;  %v6272_v19 = vor.u32 %v6780_v38, %v6269_v62  ;;  %v6678_v4 = vld [vmem:[%s7571_s6 + $0x18c] sm:$0xf]  ;;  %v6372_v20 = vor.u32 %v6808_v9, %v6371_v28  ;;  %v5771_v38 = vld [vmem:[%s7571_s6 + $0xd0] sm:$0xf]  ;;  %v6658_v62 = vld [vmem:[%s7571_s6 + $0xe4] sm:$0xf0] }
 0x347   : > { %4365 = vmatpush.bf16.msrb.mxu0 %v5792_v5  ;;  %v5861_v5 = vld [vmem:[%s7571_s6 + $0x1a0] sm:$0xf0]  ;;  %v5772_v35 = vor.u32 %v6658_v62, %v5771_v38  ;;  %v6634_v28 = vld [vmem:[%s7571_s6 + $0x24] sm:$0xf0]  ;;  %v6229_v62 = vld [vmem:[%s7571_s6 + $0x478] sm:$0xf0] }
 0x348   : > { %v5864_v63 = vor.u32 %v6678_v4, %v5861_v5  ;;  %v6769_v38 = vld [vmem:[%s7571_s6 + $0x464] sm:$0xf] }
 0x349   : > { %4384 = vmatpush.bf16.msrb.mxu1 %v5984_v46  ;;  %4422 = vmatpush.bf16.msrb.mxu3 %v6368_v51  ;;  %v6227_v46 = vld [vmem:[%s7571_s6 + $0x460] sm:$0xf]  ;;  %v6772_v51 = vld [vmem:[%s7571_s6 + $0x474] sm:$0xf0] }
 0x34a   : > { %4404 = vmatpush.bf16.msrb.mxu2 %v6152_v54  ;;  %v6419_v54 = vld [vmem:[%s7571_s6 + $0x5e0] sm:$0xf] }
 0x34b   : > { %4366 = vmatpush.bf16.msrb.mxu0 %v5768_v61  ;;  %v6820_v61 = vld [vmem:[%s7571_s6 + $0x5f4] sm:$0xf0] }
 0x34c   : > { %v6420_v34 = vor.u32 %v6820_v61, %v6419_v54 }
 0x34d   : > { %4385 = vmatpush.bf16.msrb.mxu1 %v5960_v55  ;;  %4423 = vmatpush.bf16.msrb.mxu3 %v6344_v45  ;;  %v6228_v55 = vor.u32 %v6772_v51, %v6227_v46  ;;  %v5844_v45 = vor.u32 %v6676_v0, %v5843_v30  ;;  %v5939_v46 = vld [vmem:[%s7571_s6 + $0x220] sm:$0xf]  ;;  %v6700_v51 = vld [vmem:[%s7571_s6 + $0x234] sm:$0xf0] }
 0x34e   : > { %4405 = vmatpush.bf16.msrb.mxu2 %v6128_v24  ;;  %4352 = vmatmul.bf16.vlgmr.msra.gmra.mxu3 %v8466_v33  ;;  %v6011_v24 = vld [vmem:[%s7571_s6 + $0x2b0] sm:$0xf]  ;;  %v6323_v30 = vld [vmem:[%s7571_s6 + $0x520] sm:$0xf]  ;;  %v6796_v0 = vld [vmem:[%s7571_s6 + $0x534] sm:$0xf0]  ;;  %v5940_v54 = vor.u32 %v6700_v51, %v5939_v46  ;;  %v6232_v46 = vor.u32 %v6769_v38, %v6229_v62 }
 0x34f   : > { %4367 = vmatpush.bf16.msrb.mxu0 %v5744_v27  ;;  %v6718_v27 = vld [vmem:[%s7571_s6 + $0x2c4] sm:$0xf0]  ;;  %v6324_v61 = vor.u32 %v6796_v0, %v6323_v30  ;;  %v6703_v38 = vld [vmem:[%s7571_s6 + $0x254] sm:$0xf]  ;;  %v5965_v62 = vld [vmem:[%s7571_s6 + $0x268] sm:$0xf0] }
 0x350   : > { %4300 = vmatmul.bf16.gmra.mxu0 %v8555_v18  ;;  %4319 = vmatmul.bf16.gmra.mxu1 %v8628_v41  ;;  %v6012_v8 = vor.u32 %v6718_v27, %v6011_v24 }
 0x351   : > { %4386 = vmatpush.bf16.msrb.mxu1 %v5936_v6  ;;  %4424 = vmatpush.bf16.msrb.mxu3 %v6320_v12  ;;  %v6204_v6 = vor.u32 %v6766_v10, %v6203_v15  ;;  %v5820_v12 = vor.u32 %v6670_v56, %v5819_v25  ;;  %v6083_v25 = vld [vmem:[%s7571_s6 + $0x340] sm:$0xf]  ;;  %v6736_v56 = vld [vmem:[%s7571_s6 + $0x354] sm:$0xf0] }
 0x352   : > { %4406 = vmatpush.bf16.msrb.mxu2 %v6104_v36  ;;  %v5987_v36 = vld [vmem:[%s7571_s6 + $0x280] sm:$0xf] }
 0x353   : > { %4368 = vmatpush.bf16.msrb.mxu0 %v5720_v37  ;;  %v6712_v37 = vld [vmem:[%s7571_s6 + $0x294] sm:$0xf0] }
 0x354   : > { %4338 = vmatmul.bf16.gmra.mxu2 %v8654_v43  ;;  %v5988_v39 = vor.u32 %v6712_v37, %v5987_v36  ;;  %v5675_v37 = vld [vmem:[%s7571_s6 + $0x10] sm:$0xf] }
 0x355   : > { %4387 = vmatpush.bf16.msrb.mxu1 %v5912_v42  ;;  %4425 = vmatpush.bf16.msrb.mxu3 %v6296_v16  ;;  %v6180_v42 = vor.u32 %v6760_v22, %v6179_v23  ;;  %v5796_v16 = vor.u32 %v6664_v26, %v5795_v14  ;;  %v6784_v23 = vld [vmem:[%s7571_s6 + $0x4d4] sm:$0xf0]  ;;  %v6059_v22 = vld [vmem:[%s7571_s6 + $0x310] sm:$0xf]  ;;  %v5700_v14 = vor.u32 %v6640_v48, %v5699_v1  ;;  %v6730_v26 = vld [vmem:[%s7571_s6 + $0x324] sm:$0xf0] }
 0x356   : > { %4407 = vmatpush.bf16.msrb.mxu2 %v6080_v53  ;;  %v6706_v53 = vld [vmem:[%s7571_s6 + $0x264] sm:$0xf0]  ;;  %v6181_v1 = vld [vmem:[%s7571_s6 + $0x418] sm:$0xf0] }
 0x357   : > { %4369 = vmatpush.bf16.msrb.mxu0 %v5696_v50  ;;  %v6347_v50 = vld [vmem:[%s7571_s6 + $0x550] sm:$0xf]  ;;  %v5964_v4 = vor.u32 %v6706_v53, %v5963_v2  ;;  %v6673_v2 = vld [vmem:[%s7571_s6 + $0x164] sm:$0xf]  ;;  %v5845_v53 = vld [vmem:[%s7571_s6 + $0x178] sm:$0xf0] }
 0x358   : > { %v6348_v5 = vor.u32 %v6802_v3, %v6347_v50  ;;  %v6721_v50 = vld [vmem:[%s7571_s6 + $0x2e4] sm:$0xf]  ;;  %v5848_v51 = vor.u32 %v6673_v2, %v5845_v53  ;;  %v6799_v2 = vld [vmem:[%s7571_s6 + $0x554] sm:$0xf]  ;;  %v6349_v53 = vld [vmem:[%s7571_s6 + $0x568] sm:$0xf0] }
 0x359   : > { %4388 = vmatpush.bf16.msrb.mxu1 %v5888_v44  ;;  %4426 = vmatpush.bf16.msrb.mxu3 %v6272_v19  ;;  %v6131_v44 = vld [vmem:[%s7571_s6 + $0x3a0] sm:$0xf]  ;;  %v6748_v19 = vld [vmem:[%s7571_s6 + $0x3b4] sm:$0xf0] }
 0x35a   : > { %4408 = vmatpush.bf16.msrb.mxu2 %v6056_v58  ;;  %v6132_v49 = vor.u32 %v6748_v19, %v6131_v44  ;;  %v5748_v58 = vor.u32 %v6652_v60, %v5747_v47  ;;  %v5676_v44 = vor.u32 %v6634_v28, %v5675_v37  ;;  %v6037_v19 = vld [vmem:[%s7571_s6 + $0x2f8] sm:$0xf0]  ;;  %v5868_v47 = vor.u32 %v6682_v52, %v5867_v13 }
 0x35b   : > { %4370 = vmatpush.bf16.msrb.mxu0 %v5672_v17  ;;  %v6107_v17 = vld [vmem:[%s7571_s6 + $0x370] sm:$0xf]  ;;  %v6040_v30 = vor.u32 %v6721_v50, %v6037_v19  ;;  %v6745_v19 = vld [vmem:[%s7571_s6 + $0x3a4] sm:$0xf] }
 0x35c   : > { %v6108_v15 = vor.u32 %v6742_v11, %v6107_v17  ;;  %v6205_v17 = vld [vmem:[%s7571_s6 + $0x448] sm:$0xf0]  ;;  %v6667_v11 = vld [vmem:[%s7571_s6 + $0x134] sm:$0xf] }
 0x35d   : > { %4389 = vmatpush.bf16.msrb.mxu1 %v5864_v63  ;;  %4427 = vmatpush.bf16.msrb.mxu3 %v6248_v59  ;;  %v5723_v63 = vld [vmem:[%s7571_s6 + $0x70] sm:$0xf]  ;;  %v6646_v59 = vld [vmem:[%s7571_s6 + $0x84] sm:$0xf0] }
 0x35e   : > { %4477 = vmatpush.bf16.msra.mxu2 %v6228_v55  ;;  %4357 = vmatmul.bf16.gmra.mxu3 %v8712_v40  ;;  %v5915_v55 = vld [vmem:[%s7571_s6 + $0x1f0] sm:$0xf]  ;;  %v5724_v10 = vor.u32 %v6646_v59, %v5723_v63  ;;  %v6013_v63 = vld [vmem:[%s7571_s6 + $0x2c8] sm:$0xf0] }
 0x35f   : > { %4439 = vmatpush.bf16.msra.mxu0 %v5844_v45  ;;  %v6694_v45 = vld [vmem:[%s7571_s6 + $0x204] sm:$0xf0]  ;;  %v4144_v36 = vpop.f32.mrf.mxu0  ;;  %v2965_v50 = vld [vmem:[#allocation4 + $0xb0] sm:$0xff] }
 0x360   : > { %4371 = vmatmul.bf16.vlgmr.msrb.gmra.mxu0 %v8297_v7  ;;  %4390 = vmatmul.bf16.vlgmr.msrb.gmra.mxu1 %v8338_v57  ;;  %v5916_v24 = vor.u32 %v6694_v45, %v5915_v55  ;;  %v6811_v55 = vld [vmem:[%s7571_s6 + $0x5b4] sm:$0xf]  ;;  %v6397_v45 = vld [vmem:[%s7571_s6 + $0x5c8] sm:$0xf0] }
 0x361   : > { %4458 = vmatpush.bf16.msra.mxu1 %v6036_v21  ;;  %4496 = vmatpush.bf16.msra.mxu3 %v6420_v34  ;;  %v6299_v21 = vld [vmem:[%s7571_s6 + $0x4f0] sm:$0xf]  ;;  %v6790_v34 = vld [vmem:[%s7571_s6 + $0x504] sm:$0xf0]  ;;  %v6400_v48 = vor.u32 %v6811_v55, %v6397_v45  ;;  %v6643_v45 = vld [vmem:[%s7571_s6 + $0x74] sm:$0xf] }
 0x362   : > { %4478 = vmatpush.bf16.msra.mxu2 %v6204_v6  ;;  %v6300_v27 = vor.u32 %v6790_v34, %v6299_v21  ;;  %v5891_v6 = vld [vmem:[%s7571_s6 + $0x1c0] sm:$0xf]  ;;  %v2959_v21 = vld [vmem:[#allocation4 + $0x88] sm:$0xff] }
 0x363   : > { %4440 = vmatpush.bf16.msra.mxu0 %v5820_v12  ;;  %v6688_v12 = vld [vmem:[%s7571_s6 + $0x1d4] sm:$0xf0] }
 0x364   : > { %4409 = vmatmul.bf16.vlgmr.msrb.gmra.mxu2 %v8371_v29  ;;  %v5892_v9 = vor.u32 %v6688_v12, %v5891_v6  ;;  %v6661_v6 = vld [vmem:[%s7571_s6 + $0x104] sm:$0xf]  ;;  %v5797_v12 = vld [vmem:[%s7571_s6 + $0x118] sm:$0xf0] }
 0x365   : > { %4459 = vmatpush.bf16.msra.mxu1 %v6012_v8  ;;  %4497 = vmatpush.bf16.msra.mxu3 %v6396_v32  ;;  %v6275_v8 = vld [vmem:[%s7571_s6 + $0x4c0] sm:$0xf]  ;;  %v6084_v32 = vor.u32 %v6736_v56, %v6083_v25  ;;  %v5800_v28 = vor.u32 %v6661_v6, %v5797_v12 }
 0x366   : > { %4479 = vmatpush.bf16.msra.mxu2 %v6180_v42  ;;  %v6276_v42 = vor.u32 %v6784_v23, %v6275_v8  ;;  %v6709_v8 = vld [vmem:[%s7571_s6 + $0x284] sm:$0xf] }
 0x367   : > { %4441 = vmatpush.bf16.msra.mxu0 %v5796_v16  ;;  %v4163_v16 = vpop.f32.mrf.mxu1  ;;  %v4146_v59 = vpop.f32.mrf.mxu0 }
 0x369   : > { %4460 = vmatpush.bf16.msra.mxu1 %v5988_v39  ;;  %4498 = vmatpush.bf16.msra.mxu3 %v6372_v20  ;;  %v6251_v39 = vld [vmem:[%s7571_s6 + $0x490] sm:$0xf]  ;;  %v6778_v20 = vld [vmem:[%s7571_s6 + $0x4a4] sm:$0xf0] }
 0x36a   : > { %4480 = vmatpush.bf16.msra.mxu2 %v6156_v31  ;;  %v6060_v31 = vor.u32 %v6730_v26, %v6059_v22  ;;  %v6252_v60 = vor.u32 %v6778_v20, %v6251_v39  ;;  %v6805_v26 = vld [vmem:[%s7571_s6 + $0x584] sm:$0xf]  ;;  %v6655_v39 = vld [vmem:[%s7571_s6 + $0xd4] sm:$0xf]  ;;  %v5773_v20 = vld [vmem:[%s7571_s6 + $0xe8] sm:$0xf0] }
 0x36b   : > { %4442 = vmatpush.bf16.msra.mxu0 %v5772_v35  ;;  %v4164_v35 = vadd.f32 %v4163_v16, %v4144_v36  ;;  %v6373_v36 = vld [vmem:[%s7571_s6 + $0x598] sm:$0xf0]  ;;  %v6157_v16 = vld [vmem:[%s7571_s6 + $0x3e8] sm:$0xf0] }
 0x36c   : > { %v6376_v52 = vor.u32 %v6805_v26, %v6373_v36  ;;  %v6277_v26 = vld [vmem:[%s7571_s6 + $0x4d8] sm:$0xf0] }
 0x36d   : > { %4461 = vmatpush.bf16.msra.mxu1 %v5964_v4  ;;  %4499 = vmatpush.bf16.msra.mxu3 %v6348_v5  ;;  %v4182_v3 = vpop.f32.mrf.mxu2  ;;  %v6817_v4 = vld [vmem:[%s7571_s6 + $0x5e4] sm:$0xf]  ;;  %v6421_v5 = vld [vmem:[%s7571_s6 + $0x5f8] sm:$0xf0] }
 0x36e   : > { %4481 = vmatpush.bf16.msra.mxu2 %v6132_v49  ;;  %4428 = vmatmul.bf16.vlgmr.msrb.gmra.mxu3 %v8466_v33  ;;  %v6424_v0 = vor.u32 %v6817_v4, %v6421_v5  ;;  %v4183_v49 = vadd.f32 %v4182_v3, %v4164_v35  ;;  %v6133_v4 = vld [vmem:[%s7571_s6 + $0x3b8] sm:$0xf0]  ;;  %v5968_v5 = vor.u32 %v6703_v38, %v5965_v62  ;;  %v5869_v38 = vld [vmem:[%s7571_s6 + $0x1a8] sm:$0xf0]  ;;  %v6775_v62 = vld [vmem:[%s7571_s6 + $0x494] sm:$0xf] }
 0x36f   : > { %4443 = vmatpush.bf16.msra.mxu0 %v5748_v58  ;;  %v6763_v58 = vld [vmem:[%s7571_s6 + $0x434] sm:$0xf] }
 0x370   : > { %4376 = vmatmul.bf16.gmra.mxu0 %v8555_v18  ;;  %4395 = vmatmul.bf16.gmra.mxu1 %v8628_v41 }
 0x371   : > { %4462 = vmatpush.bf16.msra.mxu1 %v5940_v54  ;;  %4500 = vmatpush.bf16.msra.mxu3 %v6324_v61  ;;  %v5821_v54 = vld [vmem:[%s7571_s6 + $0x148] sm:$0xf0]  ;;  %v6715_v61 = vld [vmem:[%s7571_s6 + $0x2b4] sm:$0xf] }
 0x372   : > { %4482 = vmatpush.bf16.msra.mxu2 %v6108_v15  ;;  %v6208_v15 = vor.u32 %v6763_v58, %v6205_v17  ;;  %v5824_v56 = vor.u32 %v6667_v11, %v5821_v54  ;;  %v6325_v58 = vld [vmem:[%s7571_s6 + $0x538] sm:$0xf0]  ;;  %v6136_v11 = vor.u32 %v6745_v19, %v6133_v4 }
 0x373   : > { %4444 = vmatpush.bf16.msra.mxu0 %v5724_v10  ;;  %v4165_v10 = vpop.f32.mrf.mxu1 }
 0x374   : > { %4414 = vmatmul.bf16.gmra.mxu2 %v8654_v43 }
 0x375   : > { %4463 = vmatpush.bf16.msra.mxu1 %v5916_v24  ;;  %4501 = vmatpush.bf16.msra.mxu3 %v6300_v27  ;;  %v6016_v24 = vor.u32 %v6715_v61, %v6013_v63  ;;  %v6757_v27 = vld [vmem:[%s7571_s6 + $0x404] sm:$0xf]  ;;  %v4184_v23 = vpop.f32.mrf.mxu2  ;;  %v6739_v61 = vld [vmem:[%s7571_s6 + $0x374] sm:$0xf]  ;;  %v6109_v63 = vld [vmem:[%s7571_s6 + $0x388] sm:$0xf0] }
 0x376   : > { %4483 = vmatpush.bf16.msra.mxu2 %v6084_v32  ;;  %v4166_v32 = vadd.f32 %v4165_v10, %v4146_v59  ;;  %v6184_v37 = vor.u32 %v6757_v27, %v6181_v1  ;;  %v6787_v10 = vld [vmem:[%s7571_s6 + $0x4f4] sm:$0xf]  ;;  %v6733_v1 = vld [vmem:[%s7571_s6 + $0x344] sm:$0xf] }
 0x377   : > { %4445 = vmatpush.bf16.msra.mxu0 %v5700_v14  ;;  %v5989_v14 = vld [vmem:[%s7571_s6 + $0x298] sm:$0xf0] }
 0x378   : > { %v5992_v13 = vor.u32 %v6709_v8, %v5989_v14  ;;  %v6637_v8 = vld [vmem:[%s7571_s6 + $0x44] sm:$0xf] }
 0x379   : > { %4464 = vmatpush.bf16.msra.mxu1 %v5892_v9  ;;  %4502 = vmatpush.bf16.msra.mxu3 %v6276_v42  ;;  %v4185_v9 = vadd.f32 %v4184_v23, %v4166_v32  ;;  %v6751_v42 = vld [vmem:[%s7571_s6 + $0x3d4] sm:$0xf]  ;;  %v5701_v23 = vld [vmem:[%s7571_s6 + $0x58] sm:$0xf0]  ;;  %v6781_v14 = vld [vmem:[%s7571_s6 + $0x4c4] sm:$0xf] }
 0x37a   : > { %4484 = vmatpush.bf16.msra.mxu2 %v6060_v31  ;;  %v6160_v35 = vor.u32 %v6751_v42, %v6157_v16  ;;  %v5893_v32 = vld [vmem:[%s7571_s6 + $0x1d8] sm:$0xf0] }
 0x37b   : > { %4446 = vmatpush.bf16.msra.mxu0 %v5676_v44  ;;  %v5776_v44 = vor.u32 %v6655_v39, %v5773_v20  ;;  %v5677_v39 = vld [vmem:[%s7571_s6 + $0x28] sm:$0xf0]  ;;  %v6679_v20 = vld [vmem:[%s7571_s6 + $0x194] sm:$0xf] }
 0x37c   : > { %v4201_v34 = vpop.f32.mrf.mxu3 }
 0x37d   : > { %4465 = vmatpush.bf16.msra.mxu1 %v5868_v47  ;;  %4503 = vmatpush.bf16.msra.mxu3 %v6252_v60  ;;  %v4202_v25 = vadd.f32 %v4201_v34, %v4183_v49  ;;  %v6352_v47 = vor.u32 %v6799_v2, %v6349_v53  ;;  %v6649_v60 = vld [vmem:[%s7571_s6 + $0xa4] sm:$0xf]  ;;  %v6691_v34 = vld [vmem:[%s7571_s6 + $0x1f4] sm:$0xf]  ;;  %v6253_v2 = vld [vmem:[%s7571_s6 + $0x4a8] sm:$0xf0] }
 0x37e   : > { %4553 = vmatpush.bf16.msrb.mxu2 %v6232_v46  ;;  %4433 = vmatmul.bf16.gmra.mxu3 %v8712_v40  ;;  %v5749_v46 = vld [vmem:[%s7571_s6 + $0xb8] sm:$0xf0]  ;;  %v6793_v49 = vld [vmem:[%s7571_s6 + $0x524] sm:$0xf] }
 0x37f   : > { %4515 = vmatpush.bf16.msrb.mxu0 %v5848_v51  ;;  %v4591_v22 = vadd.f32 %v4202_v25, %v2959_v21  ;;  %v6697_v51 = vld [vmem:[%s7571_s6 + $0x224] sm:$0xf]  ;;  %v5752_v54 = vor.u32 %v6649_v60, %v5749_v46  ;;  %v6328_v55 = vor.u32 %v6793_v49, %v6325_v58  ;;  %v5725_v21 = vld [vmem:[%s7571_s6 + $0x88] sm:$0xf0] }
 0x380   : > { %4447 = vmatmul.bf16.vlgmr.msra.gmra.mxu0 %v8297_v7  ;;  %4466 = vmatmul.bf16.vlgmr.msra.gmra.mxu1 %v8338_v57  ;;  %v6301_v25 = vld [vmem:[%s7571_s6 + $0x508] sm:$0xf0]  ;;  %v5728_v27 = vor.u32 %v6643_v45, %v5725_v21  ;;  %v2971_v46 = vld [vmem:[#allocation4 + $0x20] sm:$0xff] }
 0x381   : > { %4534 = vmatpush.bf16.msrb.mxu1 %v6040_v30  ;;  %4572 = vmatpush.bf16.msrb.mxu3 %v6424_v0  ;;  %4615 = vst [vmem:[#allocation4 + $0x88] sm:$0xff] %v4591_v22  ;;  %v5941_v0 = vld [vmem:[%s7571_s6 + $0x238] sm:$0xf0]  ;;  %v6304_v12 = vor.u32 %v6787_v10, %v6301_v25  ;;  %v6685_v22 = vld [vmem:[%s7571_s6 + $0x1c4] sm:$0xf] }
 0x382   : > { %4554 = vmatpush.bf16.msrb.mxu2 %v6208_v15  ;;  %v5944_v59 = vor.u32 %v6697_v51, %v5941_v0  ;;  %v5917_v15 = vld [vmem:[%s7571_s6 + $0x208] sm:$0xf0]  ;;  %v5896_v16 = vor.u32 %v6685_v22, %v5893_v32 }
 0x383   : > { %4516 = vmatpush.bf16.msrb.mxu0 %v5824_v56  ;;  %v5920_v6 = vor.u32 %v6691_v34, %v5917_v15 }
 0x384   : > { %4485 = vmatmul.bf16.vlgmr.msra.gmra.mxu2 %v8371_v29  ;;  %v4203_v3 = vpop.f32.mrf.mxu3 }
 0x385   : > { %4535 = vmatpush.bf16.msrb.mxu1 %v6016_v24  ;;  %4573 = vmatpush.bf16.msrb.mxu3 %v6400_v48  ;;  %v4204_v31 = vadd.f32 %v4203_v3, %v4185_v9  ;;  %v8960_v17 = vpop.f32.mrf.mxu0  ;;  %v6112_v24 = vor.u32 %v6739_v61, %v6109_v63  ;;  %v6085_v48 = vld [vmem:[%s7571_s6 + $0x358] sm:$0xf0]  ;;  %v6061_v9 = vld [vmem:[%s7571_s6 + $0x328] sm:$0xf0]  ;;  %v2977_v61 = vld [vmem:[#allocation4 + $0x80] sm:$0xff] }
 0x386   : > { %4555 = vmatpush.bf16.msrb.mxu2 %v6184_v37  ;;  %v6088_v36 = vor.u32 %v6733_v1, %v6085_v48  ;;  %v5704_v37 = vor.u32 %v6637_v8, %v5701_v23 }
 0x387   : > { %4517 = vmatpush.bf16.msrb.mxu0 %v5800_v28  ;;  %v4597_v30 = vadd.f32 %v4204_v31, %v2965_v50  ;;  %v6727_v28 = vld [vmem:[%s7571_s6 + $0x314] sm:$0xf]  ;;  %v5872_v31 = vor.u32 %v6679_v20, %v5869_v38 }
 0x388   : > { %v6064_v50 = vor.u32 %v6727_v28, %v6061_v9 }
 0x389   : > { %4536 = vmatpush.bf16.msrb.mxu1 %v5992_v13  ;;  %4574 = vmatpush.bf16.msrb.mxu3 %v6376_v52  ;;  %4621 = vst [vmem:[#allocation4 + $0xb0] sm:$0xff] %v4597_v30  ;;  %v6280_v13 = vor.u32 %v6781_v14, %v6277_v26  ;;  %v6631_v52 = vld [vmem:[%s7571_s6 + $0x14] sm:$0xf] }
 0x38a   : > { %4556 = vmatpush.bf16.msrb.mxu2 %v6160_v35  ;;  %v5680_v3 = vor.u32 %v6631_v52, %v5677_v39  ;;  %v6256_v35 = vor.u32 %v6775_v62, %v6253_v2 }
 0x38b   : > { %4518 = vmatpush.bf16.msrb.mxu0 %v5776_v44 }
 0x38d   : > { %4537 = vmatpush.bf16.msrb.mxu1 %v5968_v5  ;;  %4575 = vmatpush.bf16.msrb.mxu3 %v6352_v47  ;;  %v4168_v56 = vpop.f32.mrf.mxu1  ;;  %v4151_v42 = vpop.f32.mrf.mxu0 }
 0x38e   : > { %4557 = vmatpush.bf16.msrb.mxu2 %v6136_v11  ;;  %4504 = vmatmul.bf16.vlgmr.msra.gmra.mxu3 %v8466_v33  ;;  %v4169_v19 = vadd.f32 %v4168_v56, %v8960_v17 }
 0x38f   : > { %4519 = vmatpush.bf16.msrb.mxu0 %v5752_v54 }
 0x390   : > { %4452 = vmatmul.bf16.gmra.mxu0 %v8555_v18  ;;  %4471 = vmatmul.bf16.gmra.mxu1 %v8628_v41 }
 0x391   : > { %4538 = vmatpush.bf16.msrb.mxu1 %v5944_v59  ;;  %4576 = vmatpush.bf16.msrb.mxu3 %v6328_v55 }
 0x392   : > { %4558 = vmatpush.bf16.msrb.mxu2 %v6112_v24 }
 0x393   : > { %4520 = vmatpush.bf16.msrb.mxu0 %v5728_v27 }
 0x394   : > { %4490 = vmatmul.bf16.gmra.mxu2 %v8654_v43 }
 0x395   : > { %4539 = vmatpush.bf16.msrb.mxu1 %v5920_v6  ;;  %4577 = vmatpush.bf16.msrb.mxu3 %v6304_v12  ;;  %v4170_v53 = vpop.f32.mrf.mxu1  ;;  %v2966_v6 = vld [vmem:[#allocation4 + $0x98] sm:$0xff] }
 0x396   : > { %4559 = vmatpush.bf16.msrb.mxu2 %v6088_v36  ;;  %v4171_v58 = vadd.f32 %v4170_v53, %v4151_v42 }
 0x397   : > { %4521 = vmatpush.bf16.msrb.mxu0 %v5704_v37  ;;  %v4187_v44 = vpop.f32.mrf.mxu2 }
 0x398   : > { %v4188_v47 = vadd.f32 %v4187_v44, %v4169_v19 }
 0x399   : > { %4540 = vmatpush.bf16.msrb.mxu1 %v5896_v16  ;;  %4578 = vmatpush.bf16.msrb.mxu3 %v6280_v13  ;;  %v2978_v13 = vld [vmem:[#allocation4 + $0xa0] sm:$0xff] }
 0x39a   : > { %4560 = vmatpush.bf16.msrb.mxu2 %v6064_v50  ;;  %v2961_v50 = vld [vmem:[#allocation4 + $0x58] sm:$0xff] }
 0x39b   : > { %4522 = vmatpush.bf16.msrb.mxu0 %v5680_v3 }
 0x39d   : > { %4541 = vmatpush.bf16.msrb.mxu1 %v5872_v31  ;;  %4579 = vmatpush.bf16.msrb.mxu3 %v6256_v35  ;;  %v4220_v4 = vpop.f32.mrf.mxu0  ;;  %v4239_v5 = vpop.f32.mrf.mxu1 }
 0x39e   : > { %4509 = vmatmul.bf16.gmra.mxu3 %v8712_v40  ;;  %v4240_v55 = vadd.f32 %v4239_v5, %v4220_v4 }
 0x39f   : > { %v4189_v60 = vpop.f32.mrf.mxu2 }
 0x3a0   : > { %4523 = vmatmul.bf16.vlgmr.msrb.gmra.mxu0 %v8297_v7  ;;  %4542 = vmatmul.bf16.vlgmr.msrb.gmra.mxu1 %v8338_v57  ;;  %v4190_v17 = vadd.f32 %v4189_v60, %v4171_v58  ;;  %v2967_v60 = vld [vmem:[#allocation4 + $0x68] sm:$0xff] }
 0x3a1   : > { %v4206_v51 = vpop.f32.mrf.mxu3 }
 0x3a2   : > { %v4207_v30 = vadd.f32 %v4206_v51, %v4188_v47 }
 0x3a4   : > { %4561 = vmatmul.bf16.vlgmr.msrb.gmra.mxu2 %v8371_v29  ;;  %v4603_v49 = vadd.f32 %v4207_v30, %v2971_v46  ;;  %v2960_v29 = vld [vmem:[#allocation4 + $0x8] sm:$0xff] }
 0x3a5   : > { %v4222_v0 = vpop.f32.mrf.mxu0  ;;  %v4241_v11 = vpop.f32.mrf.mxu1 }
 0x3a6   : > { %4627 = vst [vmem:[#allocation4 + $0x20] sm:$0xff] %v4603_v49  ;;  %v4242_v24 = vadd.f32 %v4241_v11, %v4222_v0 }
 0x3a7   : > { %v4258_v54 = vpop.f32.mrf.mxu2 }
 0x3a8   : > { %v4259_v57 = vadd.f32 %v4258_v54, %v4240_v55  ;;  %v2973_v54 = vld [vmem:[#allocation4 + $0x28] sm:$0xff] }
 0x3a9   : > { %v4208_v63 = vpop.f32.mrf.mxu3 }
 0x3aa   : > { %v4209_v59 = vadd.f32 %v4208_v63, %v4190_v17 }
 0x3ac   : > { %v4609_v7 = vadd.f32 %v4209_v59, %v2977_v61 }
 0x3ad   : > { %v4225_v45 = vpop.f32.mrf.mxu0  ;;  %v4244_v21 = vpop.f32.mrf.mxu1 }
 0x3ae   : > { %4633 = vst [vmem:[#allocation4 + $0x80] sm:$0xff] %v4609_v7  ;;  %4580 = vmatmul.bf16.vlgmr.msrb.gmra.mxu3 %v8466_v33  ;;  %v4245_v8 = vadd.f32 %v4244_v21, %v4225_v45 }
 0x3af   : > { %v4260_v34 = vpop.f32.mrf.mxu2 }
 0x3b0   : > { %4528 = vmatmul.bf16.gmra.mxu0 %v8555_v18  ;;  %4547 = vmatmul.bf16.gmra.mxu1 %v8628_v41  ;;  %v4261_v1 = vadd.f32 %v4260_v34, %v4242_v24  ;;  %v2979_v34 = vld [vmem:[#allocation4 + $0x18] sm:$0xff] }
 0x3b1   : > { %v4277_v15 = vpop.f32.mrf.mxu3 }
 0x3b2   : > { %v4278_v10 = vadd.f32 %v4277_v15, %v4259_v57 }
 0x3b4   : > { %4566 = vmatmul.bf16.gmra.mxu2 %v8654_v43  ;;  %v4592_v56 = vadd.f32 %v4278_v10, %v2960_v29  ;;  %v2972_v43 = vld [vmem:[#allocation4 + $0x10] sm:$0xff] }
 0x3b5   : > { %v4227_v25 = vpop.f32.mrf.mxu0  ;;  %v4246_v27 = vpop.f32.mrf.mxu1 }
 0x3b6   : > { %4616 = vst [vmem:[#allocation4 + $0x8] sm:$0xff] %v4592_v56  ;;  %v4247_v28 = vadd.f32 %v4246_v27, %v4227_v25 }
 0x3b7   : > { %v4263_v48 = vpop.f32.mrf.mxu2 }
 0x3b8   : > { %v4264_v41 = vadd.f32 %v4263_v48, %v4245_v8  ;;  %v2962_v48 = vld [vmem:[#allocation4 + $0x50] sm:$0xff] }
 0x3b9   : > { %v4279_v33 = vpop.f32.mrf.mxu3 }
 0x3ba   : > { %v4280_v12 = vadd.f32 %v4279_v33, %v4261_v1 }
 0x3bc   : > { %v4598_v18 = vadd.f32 %v4280_v12, %v2966_v6 }
 0x3bd   : > { %v4296_v23 = vpop.f32.mrf.mxu0  ;;  %v4315_v22 = vpop.f32.mrf.mxu1 }
 0x3be   : > { %4622 = vst [vmem:[#allocation4 + $0x98] sm:$0xff] %v4598_v18  ;;  %4585 = vmatmul.bf16.gmra.mxu3 %v8712_v40  ;;  %v4316_v20 = vadd.f32 %v4315_v22, %v4296_v23 }
 0x3bf   : > { %v4265_v32 = vpop.f32.mrf.mxu2 }
 0x3c0   : > { %v4266_v42 = vadd.f32 %v4265_v32, %v4247_v28  ;;  %v2968_v32 = vld [vmem:[#allocation4 + $0x30] sm:$0xff] }
 0x3c1   : > { %v4282_v14 = vpop.f32.mrf.mxu3 }
 0x3c2   : > { %v4283_v26 = vadd.f32 %v4282_v14, %v4264_v41 }
 0x3c4   : > { %v4604_v37 = vadd.f32 %v4283_v26, %v2972_v43 }
 0x3c5   : > { %v4298_v36 = vpop.f32.mrf.mxu0  ;;  %v4317_v9 = vpop.f32.mrf.mxu1 }
 0x3c6   : > { %4628 = vst [vmem:[#allocation4 + $0x10] sm:$0xff] %v4604_v37  ;;  %v4318_v19 = vadd.f32 %v4317_v9, %v4298_v36 }
 0x3c7   : > { %v4334_v16 = vpop.f32.mrf.mxu2 }
 0x3c8   : > { %v4335_v40 = vadd.f32 %v4334_v16, %v4316_v20  ;;  %v2974_v16 = vld [vmem:[#allocation4 + $0xa8] sm:$0xff] }
 0x3c9   : > { %v4284_v52 = vpop.f32.mrf.mxu3 }
 0x3ca   : > { %v4285_v39 = vadd.f32 %v4284_v52, %v4266_v42 }
 0x3cc   : > { %v4610_v62 = vadd.f32 %v4285_v39, %v2978_v13 }
 0x3cd   : > { %v4301_v38 = vpop.f32.mrf.mxu0  ;;  %v4320_v2 = vpop.f32.mrf.mxu1 }
 0x3ce   : > { %4634 = vst [vmem:[#allocation4 + $0xa0] sm:$0xff] %v4610_v62  ;;  %v4321_v30 = vadd.f32 %v4320_v2, %v4301_v38 }
 0x3cf   : > { %v4336_v53 = vpop.f32.mrf.mxu2 }
 0x3d0   : > { %v4337_v5 = vadd.f32 %v4336_v53, %v4318_v19  ;;  %v2980_v53 = vld [vmem:[#allocation4 + $0x70] sm:$0xff] }
 0x3d1   : > { %v4353_v3 = vpop.f32.mrf.mxu3 }
 0x3d2   : > { %v4354_v31 = vadd.f32 %v4353_v3, %v4335_v40 }
 0x3d4   : > { %v4593_v44 = vadd.f32 %v4354_v31, %v2961_v50 }
 0x3d5   : > { %v4303_v35 = vpop.f32.mrf.mxu0  ;;  %v4322_v4 = vpop.f32.mrf.mxu1 }
 0x3d6   : > { %4617 = vst [vmem:[#allocation4 + $0x58] sm:$0xff] %v4593_v44  ;;  %v4323_v45 = vadd.f32 %v4322_v4, %v4303_v35 }
 0x3d7   : > { %v4339_v47 = vpop.f32.mrf.mxu2 }
 0x3d8   : > { %v4340_v11 = vadd.f32 %v4339_v47, %v4321_v30  ;;  %v2963_v47 = vld [vmem:[#allocation4 + $0xb8] sm:$0xff] }
 0x3d9   : > { %v4355_v46 = vpop.f32.mrf.mxu3 }
 0x3da   : > { %v4356_v51 = vadd.f32 %v4355_v46, %v4337_v5 }
 0x3dc   : > { %v4599_v49 = vadd.f32 %v4356_v51, %v2967_v60 }
 0x3dd   : > { %v4372_v0 = vpop.f32.mrf.mxu0  ;;  %v4391_v58 = vpop.f32.mrf.mxu1 }
 0x3de   : > { %4623 = vst [vmem:[#allocation4 + $0x68] sm:$0xff] %v4599_v49  ;;  %v4392_v10 = vadd.f32 %v4391_v58, %v4372_v0 }
 0x3df   : > { %v4341_v17 = vpop.f32.mrf.mxu2 }
 0x3e0   : > { %v4342_v21 = vadd.f32 %v4341_v17, %v4323_v45 }
 0x3e1   : > { %v4358_v61 = vpop.f32.mrf.mxu3 }
 0x3e2   : > { %v4359_v63 = vadd.f32 %v4358_v61, %v4340_v11  ;;  %v2969_v11 = vld [vmem:[#allocation4 + $0x78] sm:$0xff] }
 0x3e4   : > { %v4605_v55 = vadd.f32 %v4359_v63, %v2973_v54 }
 0x3e5   : > { %v4374_v59 = vpop.f32.mrf.mxu0  ;;  %v4393_v7 = vpop.f32.mrf.mxu1 }
 0x3e6   : > { %4629 = vst [vmem:[#allocation4 + $0x28] sm:$0xff] %v4605_v55  ;;  %v4394_v23 = vadd.f32 %v4393_v7, %v4374_v59  ;;  %v2975_v7 = vld [vmem:[#allocation4 + $0x60] sm:$0xff] }
 0x3e7   : > { %v4410_v57 = vpop.f32.mrf.mxu2 }
 0x3e8   : > { %v4411_v27 = vadd.f32 %v4410_v57, %v4392_v10 }
 0x3e9   : > { %v4360_v29 = vpop.f32.mrf.mxu3 }
 0x3ea   : > { %v4361_v15 = vadd.f32 %v4360_v29, %v4342_v21 }
 0x3ec   : > { %v4611_v56 = vadd.f32 %v4361_v15, %v2979_v34 }
 0x3ed   : > { %v4377_v25 = vpop.f32.mrf.mxu0  ;;  %v4396_v24 = vpop.f32.mrf.mxu1 }
 0x3ee   : > { %4635 = vst [vmem:[#allocation4 + $0x18] sm:$0xff] %v4611_v56  ;;  %v4397_v26 = vadd.f32 %v4396_v24, %v4377_v25  ;;  %v2981_v24 = vld [vmem:[#allocation4 + $0x90] sm:$0xff] }
 0x3ef   : > { %v4412_v1 = vpop.f32.mrf.mxu2 }
 0x3f0   : > { %v4413_v22 = vadd.f32 %v4412_v1, %v4394_v23 }
 0x3f1   : > { %v4429_v6 = vpop.f32.mrf.mxu3 }
 0x3f2   : > { %v4430_v33 = vadd.f32 %v4429_v6, %v4411_v27 }
 0x3f4   : > { %v4594_v8 = vadd.f32 %v4430_v33, %v2962_v48 }
 0x3f5   : > { %v4379_v12 = vpop.f32.mrf.mxu0  ;;  %v4398_v18 = vpop.f32.mrf.mxu1 }
 0x3f6   : > { %4618 = vst [vmem:[#allocation4 + $0x50] sm:$0xff] %v4594_v8  ;;  %v4399_v20 = vadd.f32 %v4398_v18, %v4379_v12  ;;  %v2964_v18 = vld [vmem:[#allocation4] sm:$0xff] }
 0x3f7   : > { %v4415_v41 = vpop.f32.mrf.mxu2 }
 0x3f8   : > { %v4416_v9 = vadd.f32 %v4415_v41, %v4397_v26 }
 0x3f9   : > { %v4431_v43 = vpop.f32.mrf.mxu3 }
 0x3fa   : > { %v4432_v14 = vadd.f32 %v4431_v43, %v4413_v22 }
 0x3fc   : > { %v4600_v37 = vadd.f32 %v4432_v14, %v2968_v32 }
 0x3fd   : > { %v4448_v36 = vpop.f32.mrf.mxu0  ;;  %v4467_v28 = vpop.f32.mrf.mxu1 }
 0x3fe   : > { %4624 = vst [vmem:[#allocation4 + $0x30] sm:$0xff] %v4600_v37  ;;  %v4468_v31 = vadd.f32 %v4467_v28, %v4448_v36  ;;  %v2970_v37 = vld [vmem:[#allocation4 + $0x40] sm:$0xff] }
 0x3ff   : > { %v4417_v42 = vpop.f32.mrf.mxu2 }
 0x400   : > { %v4418_v2 = vadd.f32 %v4417_v42, %v4399_v20  ;;  %v2976_v20 = vld [vmem:[#allocation4 + $0x48] sm:$0xff] }
 0x401   : > { %v4434_v13 = vpop.f32.mrf.mxu3 }
 0x402   : > { %v4435_v52 = vadd.f32 %v4434_v13, %v4416_v9 }
 0x404   : > { %v4606_v39 = vadd.f32 %v4435_v52, %v2974_v16 }
 0x405   : > { %v4450_v38 = vpop.f32.mrf.mxu0  ;;  %v4469_v62 = vpop.f32.mrf.mxu1 }
 0x406   : > { %4630 = vst [vmem:[#allocation4 + $0xa8] sm:$0xff] %v4606_v39  ;;  %v4470_v30 = vadd.f32 %v4469_v62, %v4450_v38 }
 0x407   : > { %v4486_v40 = vpop.f32.mrf.mxu2 }
 0x408   : > { %v4487_v44 = vadd.f32 %v4486_v40, %v4468_v31  ;;  %v2982_v31 = vld [vmem:[#allocation4 + $0x38] sm:$0xff] }
 0x409   : > { %v4436_v50 = vpop.f32.mrf.mxu3 }
 0x40a   : > { %v4437_v3 = vadd.f32 %v4436_v50, %v4418_v2 }
 0x40c   : > { %v4612_v35 = vadd.f32 %v4437_v3, %v2980_v53 }
 0x40d   : > { %v4453_v4 = vpop.f32.mrf.mxu0  ;;  %v4472_v5 = vpop.f32.mrf.mxu1 }
 0x40e   : > { %4636 = vst [vmem:[#allocation4 + $0x70] sm:$0xff] %v4612_v35  ;;  %v4473_v63 = vadd.f32 %v4472_v5, %v4453_v4 }
 0x40f   : > { %v4488_v19 = vpop.f32.mrf.mxu2 }
 0x410   : > { %v4489_v0 = vadd.f32 %v4488_v19, %v4470_v30 }
 0x411   : > { %v4505_v60 = vpop.f32.mrf.mxu3 }
 0x412   : > { %v4506_v46 = vadd.f32 %v4505_v60, %v4487_v44 }
 0x414   : > { %v4595_v51 = vadd.f32 %v4506_v46, %v2963_v47 }
 0x415   : > { %v4455_v58 = vpop.f32.mrf.mxu0  ;;  %v4474_v54 = vpop.f32.mrf.mxu1 }
 0x416   : > { %4619 = vst [vmem:[#allocation4 + $0xb8] sm:$0xff] %v4595_v51  ;;  %v4475_v10 = vadd.f32 %v4474_v54, %v4455_v58 }
 0x417   : > { %v4491_v49 = vpop.f32.mrf.mxu2 }
 0x418   : > { %v4492_v55 = vadd.f32 %v4491_v49, %v4473_v63 }
 0x419   : > { %v4507_v17 = vpop.f32.mrf.mxu3 }
 0x41a   : > { %v4508_v61 = vadd.f32 %v4507_v17, %v4489_v0 }
 0x41c   : > { %v4601_v59 = vadd.f32 %v4508_v61, %v2969_v11 }
 0x41d   : > { %v4524_v34 = vpop.f32.mrf.mxu0  ;;  %v4543_v29 = vpop.f32.mrf.mxu1 }
 0x41e   : > { %4625 = vst [vmem:[#allocation4 + $0x78] sm:$0xff] %v4601_v59  ;;  %v4544_v48 = vadd.f32 %v4543_v29, %v4524_v34 }
 0x41f   : > { %v4493_v45 = vpop.f32.mrf.mxu2 }
 0x420   : > { %v4494_v25 = vadd.f32 %v4493_v45, %v4475_v10 }
 0x421   : > { %v4510_v21 = vpop.f32.mrf.mxu3 }
 0x422   : > { %v4511_v57 = vadd.f32 %v4510_v21, %v4492_v55 }
 0x424   : > { %v4607_v15 = vadd.f32 %v4511_v57, %v2975_v7 }
 0x425   : > { %v4526_v33 = vpop.f32.mrf.mxu0  ;;  %v4545_v12 = vpop.f32.mrf.mxu1 }
 0x426   : > { %4631 = vst [vmem:[#allocation4 + $0x60] sm:$0xff] %v4607_v15  ;;  %v4546_v43 = vadd.f32 %v4545_v12, %v4526_v33 }
 0x427   : > { %v4562_v56 = vpop.f32.mrf.mxu2 }
 0x428   : > { %v4563_v8 = vadd.f32 %v4562_v56, %v4544_v48 }
 0x429   : > { %v4512_v27 = vpop.f32.mrf.mxu3 }
 0x42a   : > { %v4513_v1 = vadd.f32 %v4512_v27, %v4494_v25 }
 0x42c   : > { %v4613_v6 = vadd.f32 %v4513_v1, %v2981_v24 }
 0x42d   : > { %v4529_v26 = vpop.f32.mrf.mxu0  ;;  %v4548_v36 = vpop.f32.mrf.mxu1 }
 0x42e   : > { %4637 = vst [vmem:[#allocation4 + $0x90] sm:$0xff] %v4613_v6  ;;  %v4549_v16 = vadd.f32 %v4548_v36, %v4529_v26 }
 0x42f   : > { %v4564_v23 = vpop.f32.mrf.mxu2 }
 0x430   : > { %v4565_v14 = vadd.f32 %v4564_v23, %v4546_v43 }
 0x431   : > { %v4581_v22 = vpop.f32.mrf.mxu3 }
 0x432   : > { %v4582_v41 = vadd.f32 %v4581_v22, %v4563_v8 }
 0x434   : > { %v4596_v32 = vadd.f32 %v4582_v41, %v2964_v18 }
 0x435   : > { %v4531_v39 = vpop.f32.mrf.mxu0  ;;  %v4550_v62 = vpop.f32.mrf.mxu1 }
 0x436   : > { %4620 = vst [vmem:[#allocation4] sm:$0xff] %v4596_v32  ;;  %v4551_v50 = vadd.f32 %v4550_v62, %v4531_v39 }
 0x437   : > { %v4567_v9 = vpop.f32.mrf.mxu2 }
 0x438   : > { %v4568_v52 = vadd.f32 %v4567_v9, %v4549_v16 }
 0x439   : > { %v4583_v28 = vpop.f32.mrf.mxu3 }
 0x43a   : > { %v4584_v42 = vadd.f32 %v4583_v28, %v4565_v14 }
 0x43c   : > { %v4602_v13 = vadd.f32 %v4584_v42, %v2970_v37 }
 0x43e   : > { %4626 = vst [vmem:[#allocation4 + $0x40] sm:$0xff] %v4602_v13 }
 0x43f   : > { %v4569_v40 = vpop.f32.mrf.mxu2 }
 0x440   : > { %v4570_v3 = vadd.f32 %v4569_v40, %v4551_v50 }
 0x441   : > { %v4586_v38 = vpop.f32.mrf.mxu3 }
 0x442   : > { %v4587_v2 = vadd.f32 %v4586_v38, %v4568_v52 }
 0x444   : > { %v4608_v53 = vadd.f32 %v4587_v2, %v2976_v20 }
 0x446   : > { %4632 = vst [vmem:[#allocation4 + $0x48] sm:$0xff] %v4608_v53 }
 0x449   : > { %v4588_v35 = vpop.f32.mrf.mxu3 }
 0x44a   : > { %v4589_v44 = vadd.f32 %v4588_v35, %v4570_v3  ;;  %4642 = sbr.rel (%p6425_p5) target bundleno = 1128 (0x468), region = 124 }
 0x44c   : > { %v4614_v19 = vadd.f32 %v4589_v44, %v2982_v31 }
 0x44e   : > { %4638 = vst [vmem:[#allocation4 + $0x38] sm:$0xff] %v4614_v19 }
 0x44f   : > { %v4643_v4 = vld [vmem:[#allocation4 + $0x88] sm:$0xff]  ;;  %v4645_v47 = vld [vmem:[#allocation4 + $0x58] sm:$0xff]  ;;  %v4646_v60 = vld [vmem:[#allocation4 + $0x50] sm:$0xff] }
 0x450   : > { %v4644_v5 = vld [vmem:[#allocation4 + $0x8] sm:$0xff]  ;;  %4667 = vst [vmem:[%s9104_s4] sm:$0xff] %v4643_v4  ;;  %v4647_v46 = vld [vmem:[#allocation4 + $0xb8] sm:$0xff]  ;;  %v4648_v51 = vld [vmem:[#allocation4] sm:$0xff] }
 0x451   : > { %4668 = vst [vmem:[%s9104_s4 + $0x8] sm:$0xff] %v4644_v5  ;;  %v4649_v30 = vld [vmem:[#allocation4 + $0xb0] sm:$0xff]  ;;  %v4650_v0 = vld [vmem:[#allocation4 + $0x98] sm:$0xff]  ;;  %v4651_v49 = vld [vmem:[#allocation4 + $0x68] sm:$0xff] }
 0x452   : > { %4669 = vst [vmem:[%s9104_s4 + $0x10] sm:$0xff] %v4645_v47  ;;  %v4652_v58 = vld [vmem:[#allocation4 + $0x30] sm:$0xff]  ;;  %v4653_v11 = vld [vmem:[#allocation4 + $0x78] sm:$0xff]  ;;  %v4654_v17 = vld [vmem:[#allocation4 + $0x40] sm:$0xff] }
 0x453   : > { %4670 = vst [vmem:[%s9104_s4 + $0x18] sm:$0xff] %v4646_v60  ;;  %v4655_v54 = vld [vmem:[#allocation4 + $0x20] sm:$0xff]  ;;  %v4656_v61 = vld [vmem:[#allocation4 + $0x10] sm:$0xff]  ;;  %v4657_v63 = vld [vmem:[#allocation4 + $0x28] sm:$0xff] }
 0x454   : > { %4671 = vst [vmem:[%s9104_s4 + $0x20] sm:$0xff] %v4647_v46  ;;  %v4658_v59 = vld [vmem:[#allocation4 + $0xa8] sm:$0xff]  ;;  %v4659_v55 = vld [vmem:[#allocation4 + $0x60] sm:$0xff]  ;;  %v4663_v57 = vld [vmem:[#allocation4 + $0x18] sm:$0xff] }
 0x455   : > { %4672 = vst [vmem:[%s9104_s4 + $0x28] sm:$0xff] %v4648_v51  ;;  %v4660_v45 = vld [vmem:[#allocation4 + $0x48] sm:$0xff]  ;;  %v4661_v7 = vld [vmem:[#allocation4 + $0x80] sm:$0xff]  ;;  %v4664_v34 = vld [vmem:[#allocation4 + $0x70] sm:$0xff] }
 0x456   : > { %4673 = vst [vmem:[%s9104_s4 + $0x30] sm:$0xff] %v4649_v30  ;;  %v4662_v21 = vld [vmem:[#allocation4 + $0xa0] sm:$0xff]  ;;  %v4665_v29 = vld [vmem:[#allocation4 + $0x90] sm:$0xff]  ;;  %v4666_v15 = vld [vmem:[#allocation4 + $0x38] sm:$0xff] }
 0x457   : > { %4674 = vst [vmem:[%s9104_s4 + $0x38] sm:$0xff] %v4650_v0 }
 0x458   : > { %4675 = vst [vmem:[%s9104_s4 + $0x40] sm:$0xff] %v4651_v49 }
 0x459   : > { %4676 = vst [vmem:[%s9104_s4 + $0x48] sm:$0xff] %v4652_v58 }
 0x45a   : > { %4677 = vst [vmem:[%s9104_s4 + $0x50] sm:$0xff] %v4653_v11 }
 0x45b   : > { %4678 = vst [vmem:[%s9104_s4 + $0x58] sm:$0xff] %v4654_v17 }
 0x45c   : > { %4679 = vst [vmem:[%s9104_s4 + $0x60] sm:$0xff] %v4655_v54 }
 0x45d   : > { %4680 = vst [vmem:[%s9104_s4 + $0x68] sm:$0xff] %v4656_v61 }
 0x45e   : > { %4681 = vst [vmem:[%s9104_s4 + $0x70] sm:$0xff] %v4657_v63 }
 0x45f   : > { %4682 = vst [vmem:[%s9104_s4 + $0x78] sm:$0xff] %v4658_v59 }
 0x460   : > { %4683 = vst [vmem:[%s9104_s4 + $0x80] sm:$0xff] %v4659_v55 }
 0x461   : > { %4684 = vst [vmem:[%s9104_s4 + $0x88] sm:$0xff] %v4660_v45 }
 0x462   : > { %4685 = vst [vmem:[%s9104_s4 + $0x90] sm:$0xff] %v4661_v7 }
 0x463   : > { %4686 = vst [vmem:[%s9104_s4 + $0x98] sm:$0xff] %v4662_v21 }
 0x464   : > { %4687 = vst [vmem:[%s9104_s4 + $0xa0] sm:$0xff] %v4663_v57 }
 0x465   : > { %4688 = vst [vmem:[%s9104_s4 + $0xa8] sm:$0xff] %v4664_v34 }
 0x466   : > { %4689 = vst [vmem:[%s9104_s4 + $0xb0] sm:$0xff] %v4665_v29 }
 0x467   : > { %4690 = vst [vmem:[%s9104_s4 + $0xb8] sm:$0xff] %v4666_v15 }
 0x468 PF: > { %s14_s23 = sadd.s32 1, %s7039_s23   ;;  %s9172_s15 = smov %s7011_s16 }
 0x469   : > { %p11_p6 = scmp.ge.s32.totalorder %s14_s23, 8   ;;  %s9173_s16 = smov %s7143_s8 }
 0x46a   : > { %s9174_s17 = smov %s7019_s18  ;;  %s9175_s18 = smov %s7133_s29 }
 0x46b   : > { %s9176_s19 = smov %s7031_s21  ;;  %s9177_s20 = smov %s7035_s22 }
 0x46c   : > { %s9178_s21 = smov %s9181_s24  ;;  %s9179_s22 = smov %s9185_s25 }
 0x46d   :  { %13 = sbr.rel (!%p11_p6) target bundleno = 5 (0x5), region = 184 }

</bundles_post_ra>
